<compile_context>
chip_gen: v7x
topology: tpu7x:2x2x1
jax: 0.10.0
libtpu: 0.0.40
codegen_flags: <defaults>
</compile_context>

<pallas_src>
import jax
import jax.numpy as jnp
from jax.experimental import pallas as pl
from jax.experimental.pallas import tpu as pltpu


# ----------------------------- fused kernel ---------------------------------

def _net2_kernel(x_ref, w1t_ref, b1t_ref, sel_ref, w2t_ref, b2t_ref,
                 woe_ref, bo_ref, out_ref, xpad_ref, y1sp_ref):
    f32 = jnp.float32
    bf16 = jnp.bfloat16

    # ---- stage 0: zero-pad the 28x28 image (SAME pad=2) into VMEM ----------
    xpad_ref[...] = jnp.zeros_like(xpad_ref)                     # (32, 32) f32
    xpad_ref[pl.ds(2, 28), pl.ds(2, 28)] = x_ref[...]

    # ---- stage 1: conv1 (1->16, 5x5) as 5 Toeplitz matmuls ------------------
    # a1[i, 16*j + c]: lane-dense (rows = H, lanes = W*Cout = 448).
    acc1 = jnp.dot(xpad_ref[pl.ds(0, 28), :].astype(bf16), w1t_ref[0],
                   preferred_element_type=f32)
    for kh in range(1, 5):
        acc1 = acc1 + jnp.dot(xpad_ref[pl.ds(kh, 28), :].astype(bf16),
                              w1t_ref[kh], preferred_element_type=f32)
    a1 = jnp.maximum(acc1 + b1t_ref[...], 0.0)                   # (28, 448)

    # ---- stage 2: 2x2 max-pool ----------------------------------------------
    # Vertical / horizontal pair-maxima via shifted (unit-stride) value slices;
    # dense rows via a tiny selection matmul; the horizontal sparsity (valid
    # data only in even 16-lane groups) is absorbed by zero rows of w2t.
    va = jnp.maximum(a1[0:27, :], a1[1:28, :])                   # (27, 448)
    ph = jnp.maximum(va[:, 0:432], va[:, 16:448])                # (27, 432)
    pooled = jnp.dot(sel_ref[...], ph.astype(bf16),              # (14, 432)
                     preferred_element_type=f32)

    # Padded, lane-dense conv2 input slab: group g of row r holds the pooled
    # value for padded coords (row=r, col=g//2); odd g / borders are dead.
    y1sp_ref[...] = jnp.zeros_like(y1sp_ref)                     # (18, 576) f32
    y1sp_ref[pl.ds(2, 14), pl.ds(64, 432)] = pooled

    # ---- stage 3: conv2 (16->32, 5x5) as 5 Toeplitz matmuls -----------------
    acc2 = jnp.dot(y1sp_ref[pl.ds(0, 14), :].astype(bf16), w2t_ref[0],
                   preferred_element_type=f32)
    for kh in range(1, 5):
        acc2 = acc2 + jnp.dot(y1sp_ref[pl.ds(kh, 14), :].astype(bf16),
                              w2t_ref[kh], preferred_element_type=f32)
    a2 = jnp.maximum(acc2 + b2t_ref[...], 0.0)                   # (14, 448)

    # ---- stage 4: 2x2 max-pool + flatten + classifier -----------------------
    # Pool sparsity and PyTorch's (C,H,W) flatten are folded into the
    # pre-expanded classifier weight (one (416,10) slab per pooled output row).
    va2 = jnp.maximum(a2[0:13, :], a2[1:14, :])                  # (13, 448)
    ph2 = jnp.maximum(va2[:, 0:416], va2[:, 32:448])             # (13, 416)
    logits = bo_ref[...]                                         # (1, 10) f32
    for io in range(7):
        logits = logits + jnp.dot(ph2[2 * io:2 * io + 1, :].astype(bf16),
                                  woe_ref[io], preferred_element_type=f32)
    out_ref[...] = logits


# ----------------------------- wrapper ---------------------------------------

def net2_forward(x_nchw, kparams):
    """x_nchw: (B, 1, 28, 28) float32; kparams from prepare_params()."""
    w1t, b1t, sel, w2t, b2t, woe, bo = kparams
    B = x_nchw.shape[0]
    x = x_nchw.reshape(B, 28, 28)            # C=1: pure metadata reshape

    def const_spec(a):
        zeros = (0,) * a.ndim
        return pl.BlockSpec(a.shape, lambda b, zeros=zeros: zeros)

    out3 = pl.pallas_call(
        _net2_kernel,
        out_shape=jax.ShapeDtypeStruct((B, 1, 10), jnp.float32),
        grid=(B,),
        in_specs=[pl.BlockSpec((None, 28, 28), lambda b: (b, 0, 0)),
                  const_spec(w1t), const_spec(b1t), const_spec(sel),
                  const_spec(w2t), const_spec(b2t), const_spec(woe),
                  const_spec(bo)],
        out_specs=pl.BlockSpec((None, 1, 10), lambda b: (b, 0, 0)),
        scratch_shapes=[
            pltpu.VMEM((32, 32), jnp.float32),    # zero-padded input image
            pltpu.VMEM((18, 576), jnp.float32),   # padded pooled conv1 slab
        ],
        compiler_params=pltpu.CompilerParams(
            dimension_semantics=("parallel",)),   # megacore-shardable on v7x
    )(x, w1t, b1t, sel, w2t, b2t, woe, bo)
    return out3.reshape(B, 10)


# ------------------------ trace-time weight packing ---------------------------

def prepare_params(params_pt):
    """Pack PyTorch-layout weights into the kernel's layouts (done once)."""
    w1_pt, b1_pt, w2_pt, b2_pt, wo_pt, bo_pt = params_pt
    f32, bf16 = jnp.float32, jnp.bfloat16

    # conv1 Toeplitz: w1t[kh, p, 16*j + c] = w1[c, 0, kh, p - j] if 0<=p-j<5.
    w1_k = jnp.transpose(w1_pt, (2, 3, 1, 0)).reshape(5, 5, 16)    # [kh, kw, c]
    p = jnp.arange(32)[:, None]
    j = jnp.arange(28)[None, :]
    kw = p - j
    w1t = jnp.where(((kw >= 0) & (kw < 5))[None, :, :, None],
                    w1_k[:, jnp.clip(kw, 0, 4), :], 0.0).reshape(5, 32, 448)
    b1t = jnp.tile(b1_pt, 28)[None, :]                              # (1, 448)

    # pool1 row-compaction (select even rows): sel[io, i] = [i == 2*io].
    sel = (jnp.arange(27)[None, :] == 2 * jnp.arange(14)[:, None]).astype(f32)

    # conv2 Toeplitz over the sparse-lane slab:
    # w2t[kh, 16*g + cin, 32*jo + co] = w2[co, cin, kh, g//2 - jo]
    #                                   if g even and 0 <= g//2 - jo < 5 else 0.
    w2_k = jnp.transpose(w2_pt, (2, 3, 1, 0))                   # (5,5,16,32)
    g = jnp.arange(36)[:, None]
    jo = jnp.arange(14)[None, :]
    kw2 = g // 2 - jo
    valid2 = (g % 2 == 0) & (kw2 >= 0) & (kw2 < 5)              # (36, 14)
    gath = w2_k[:, jnp.clip(kw2, 0, 4), :, :]                   # (5,36,14,16,32)
    w2t = jnp.where(valid2[None, :, :, None, None], gath, 0.0)
    w2t = jnp.transpose(w2t, (0, 1, 3, 2, 4)).reshape(5, 576, 448)
    b2t = jnp.tile(b2_pt, 14)[None, :]                              # (1, 448)

    # classifier, expanded per pooled output row; odd 32-lane groups are zero
    # and PyTorch's (C,H,W) flatten order is baked into the row permutation:
    # woe[io, 64*jo + co, n] = wo[n, co*49 + io*7 + jo].
    wo_r = jnp.transpose(wo_pt.reshape(10, 32, 7, 7), (2, 3, 1, 0))  # (7,7,32,10)
    woe = jnp.zeros((7, 13, 32, 10), f32).at[:, 0::2, :, :].set(wo_r)
    woe = woe.reshape(7, 416, 10)
    bo = bo_pt[None, :]                                              # (1, 10)

    return (w1t.astype(bf16), b1t.astype(f32), sel.astype(bf16),
            w2t.astype(bf16), b2t.astype(f32), woe.astype(bf16),
            bo.astype(f32))


# ----------------------------- pure-JAX reference -----------------------------

def reference_forward(x_nchw, params_pt):
    w1, b1, w2, b2, wo, bo = params_pt
    dn = ("NCHW", "OIHW", "NCHW")
    y = jax.lax.conv_general_dilated(x_nchw, w1, (1, 1), ((2, 2), (2, 2)),
                                     dimension_numbers=dn)
    y = jnp.maximum(y + b1[None, :, None, None], 0.0)
    y = jax.lax.reduce_window(y, -jnp.inf, jax.lax.max, (1, 1, 2, 2),
                              (1, 1, 2, 2), "VALID")
    y = jax.lax.conv_general_dilated(y, w2, (1, 1), ((2, 2), (2, 2)),
                                     dimension_numbers=dn)
    y = jnp.maximum(y + b2[None, :, None, None], 0.0)
    y = jax.lax.reduce_window(y, -jnp.inf, jax.lax.max, (1, 1, 2, 2),
                              (1, 1, 2, 2), "VALID")
    y = y.reshape(y.shape[0], -1)
    return y @ wo.T + bo


# ----------------------------- main -------------------------------------------

if __name__ == "__main__":
    key = jax.random.PRNGKey(0)
    kx, k1, k2, k3, k4, k5, k6 = jax.random.split(key, 7)

    B = 2
    x = jax.random.normal(kx, (B, 1, 28, 28), dtype=jnp.float32)

    # Deterministic parameters in PyTorch layouts.
    w1_pt = jax.random.normal(k1, (16, 1, 5, 5), dtype=jnp.float32) * 0.10
    b1_pt = jax.random.normal(k2, (16,), dtype=jnp.float32) * 0.10
    w2_pt = jax.random.normal(k3, (32, 16, 5, 5), dtype=jnp.float32) * 0.05
    b2_pt = jax.random.normal(k4, (32,), dtype=jnp.float32) * 0.10
    wo_pt = jax.random.normal(k5, (10, 32 * 7 * 7), dtype=jnp.float32) * 0.02
    bo_pt = jax.random.normal(k6, (10,), dtype=jnp.float32) * 0.10

    params_pt = (w1_pt, b1_pt, w2_pt, b2_pt, wo_pt, bo_pt)
    kparams = jax.tree_util.tree_map(jax.block_until_ready,
                                     prepare_params(params_pt))

    fwd = jax.jit(net2_forward)
    out = jax.block_until_ready(fwd(x, kparams))
    assert out.shape == (B, 10) and out.dtype == jnp.float32

    ref = jax.block_until_ready(reference_forward(x, params_pt))
    # bf16 MXU operands with f32 accumulation -> loose-ish tolerance.
    assert jnp.allclose(out, ref, rtol=2e-2, atol=2e-2), "mismatch vs reference"

    print("KERNEL_OK")
</pallas_src>

<mosaic_0001>
module attributes {stable_mosaic.version = 11 : i64} {
  func.func @_net2_kernel(%arg0: i32, %arg1: memref<1x28x28xf32, #tpu.memory_space<vmem>>, %arg2: memref<5x32x448xbf16, #tpu.memory_space<vmem>>, %arg3: memref<1x448xf32, #tpu.memory_space<vmem>>, %arg4: memref<14x27xbf16, #tpu.memory_space<vmem>>, %arg5: memref<5x576x448xbf16, #tpu.memory_space<vmem>>, %arg6: memref<1x448xf32, #tpu.memory_space<vmem>>, %arg7: memref<7x416x10xbf16, #tpu.memory_space<vmem>>, %arg8: memref<1x10xf32, #tpu.memory_space<vmem>>, %arg9: memref<1x1x10xf32, #tpu.memory_space<vmem>>, %arg10: memref<32x32xf32, #tpu.memory_space<vmem>>, %arg11: memref<18x576xf32, #tpu.memory_space<vmem>>) attributes {dimension_semantics = [#tpu.dimension_semantics<parallel>], iteration_bounds = array<i64: 2>, scalar_prefetch = 0 : i64, scratch_operands = 2 : i64, tpu.core_type = #tpu.core_type<tc>, window_params = [{transform_indices = @transform_0, window_bounds = array<i64: 1, 28, 28>}, {pipeline_mode = #tpu.pipeline_mode<synchronous>, transform_indices = @transform_1, window_bounds = array<i64: 5, 32, 448>}, {pipeline_mode = #tpu.pipeline_mode<synchronous>, transform_indices = @transform_2, window_bounds = array<i64: 1, 448>}, {pipeline_mode = #tpu.pipeline_mode<synchronous>, transform_indices = @transform_3, window_bounds = array<i64: 14, 27>}, {pipeline_mode = #tpu.pipeline_mode<synchronous>, transform_indices = @transform_4, window_bounds = array<i64: 5, 576, 448>}, {pipeline_mode = #tpu.pipeline_mode<synchronous>, transform_indices = @transform_5, window_bounds = array<i64: 1, 448>}, {pipeline_mode = #tpu.pipeline_mode<synchronous>, transform_indices = @transform_6, window_bounds = array<i64: 7, 416, 10>}, {pipeline_mode = #tpu.pipeline_mode<synchronous>, transform_indices = @transform_7, window_bounds = array<i64: 1, 10>}, {transform_indices = @transform_8, window_bounds = array<i64: 1, 1, 10>}]} {
    %cst = arith.constant 0.000000e+00 : f32
    %0 = vector.broadcast %cst : f32 to vector<32x32xf32>
    %c0 = arith.constant 0 : index
    %c0_0 = arith.constant 0 : index
    %1 = vector.load %arg10[%c0, %c0_0] : memref<32x32xf32, #tpu.memory_space<vmem>>, vector<32x32xf32>
    tpu.vector_store %arg10[%c0, %c0_0], %0 {strides = array<i32>} : memref<32x32xf32, #tpu.memory_space<vmem>>, vector<32x32xf32>,
    %c0_1 = arith.constant 0 : index
    %c0_2 = arith.constant 0 : index
    %c0_3 = arith.constant 0 : index
    %2 = vector.load %arg1[%c0_1, %c0_2, %c0_3] : memref<1x28x28xf32, #tpu.memory_space<vmem>>, vector<1x28x28xf32>
    %3 = vector.shape_cast %2 : vector<1x28x28xf32> to vector<28x28xf32>
    %c2 = arith.constant 2 : index
    %c2_4 = arith.constant 2 : index
    %4 = vector.load %arg10[%c2, %c2_4] : memref<32x32xf32, #tpu.memory_space<vmem>>, vector<28x28xf32>
    tpu.vector_store %arg10[%c2, %c2_4], %3 {strides = array<i32>} : memref<32x32xf32, #tpu.memory_space<vmem>>, vector<28x28xf32>,
    %c0_5 = arith.constant 0 : index
    %c0_6 = arith.constant 0 : index
    %5 = vector.load %arg10[%c0_5, %c0_6] : memref<32x32xf32, #tpu.memory_space<vmem>>, vector<28x32xf32>
    %6 = arith.truncf %5 : vector<28x32xf32> to vector<28x32xbf16>
    %c0_7 = arith.constant 0 : index
    %c0_8 = arith.constant 0 : index
    %c0_9 = arith.constant 0 : index
    %7 = vector.load %arg2[%c0_7, %c0_8, %c0_9] : memref<5x32x448xbf16, #tpu.memory_space<vmem>>, vector<1x32x448xbf16>
    %8 = vector.shape_cast %7 : vector<1x32x448xbf16> to vector<32x448xbf16>
    %cst_10 = arith.constant dense<0.000000e+00> : vector<28x448xf32>
    %9 = tpu.matmul %6, %8, %cst_10 {dimension_numbers = #tpu.dot_dimension_numbers<[1], [0], [0], [1], [0, 0, 1, 1], [], []>} : vector<28x32xbf16>, vector<32x448xbf16>, vector<28x448xf32> -> vector<28x448xf32>
    %c1 = arith.constant 1 : index
    %c0_11 = arith.constant 0 : index
    %10 = vector.load %arg10[%c1, %c0_11] : memref<32x32xf32, #tpu.memory_space<vmem>>, vector<28x32xf32>
    %11 = arith.truncf %10 : vector<28x32xf32> to vector<28x32xbf16>
    %c1_12 = arith.constant 1 : index
    %c0_13 = arith.constant 0 : index
    %c0_14 = arith.constant 0 : index
    %12 = vector.load %arg2[%c1_12, %c0_13, %c0_14] : memref<5x32x448xbf16, #tpu.memory_space<vmem>>, vector<1x32x448xbf16>
    %13 = vector.shape_cast %12 : vector<1x32x448xbf16> to vector<32x448xbf16>
    %cst_15 = arith.constant dense<0.000000e+00> : vector<28x448xf32>
    %14 = tpu.matmul %11, %13, %cst_15 {dimension_numbers = #tpu.dot_dimension_numbers<[1], [0], [0], [1], [0, 0, 1, 1], [], []>} : vector<28x32xbf16>, vector<32x448xbf16>, vector<28x448xf32> -> vector<28x448xf32>
    %15 = arith.addf %9, %14 : vector<28x448xf32>
    %c2_16 = arith.constant 2 : index
    %c0_17 = arith.constant 0 : index
    %16 = vector.load %arg10[%c2_16, %c0_17] : memref<32x32xf32, #tpu.memory_space<vmem>>, vector<28x32xf32>
    %17 = arith.truncf %16 : vector<28x32xf32> to vector<28x32xbf16>
    %c2_18 = arith.constant 2 : index
    %c0_19 = arith.constant 0 : index
    %c0_20 = arith.constant 0 : index
    %18 = vector.load %arg2[%c2_18, %c0_19, %c0_20] : memref<5x32x448xbf16, #tpu.memory_space<vmem>>, vector<1x32x448xbf16>
    %19 = vector.shape_cast %18 : vector<1x32x448xbf16> to vector<32x448xbf16>
    %cst_21 = arith.constant dense<0.000000e+00> : vector<28x448xf32>
    %20 = tpu.matmul %17, %19, %cst_21 {dimension_numbers = #tpu.dot_dimension_numbers<[1], [0], [0], [1], [0, 0, 1, 1], [], []>} : vector<28x32xbf16>, vector<32x448xbf16>, vector<28x448xf32> -> vector<28x448xf32>
    %21 = arith.addf %15, %20 : vector<28x448xf32>
    %c3 = arith.constant 3 : index
    %c0_22 = arith.constant 0 : index
    %22 = vector.load %arg10[%c3, %c0_22] : memref<32x32xf32, #tpu.memory_space<vmem>>, vector<28x32xf32>
    %23 = arith.truncf %22 : vector<28x32xf32> to vector<28x32xbf16>
    %c3_23 = arith.constant 3 : index
    %c0_24 = arith.constant 0 : index
    %c0_25 = arith.constant 0 : index
    %24 = vector.load %arg2[%c3_23, %c0_24, %c0_25] : memref<5x32x448xbf16, #tpu.memory_space<vmem>>, vector<1x32x448xbf16>
    %25 = vector.shape_cast %24 : vector<1x32x448xbf16> to vector<32x448xbf16>
    %cst_26 = arith.constant dense<0.000000e+00> : vector<28x448xf32>
    %26 = tpu.matmul %23, %25, %cst_26 {dimension_numbers = #tpu.dot_dimension_numbers<[1], [0], [0], [1], [0, 0, 1, 1], [], []>} : vector<28x32xbf16>, vector<32x448xbf16>, vector<28x448xf32> -> vector<28x448xf32>
    %27 = arith.addf %21, %26 : vector<28x448xf32>
    %c4 = arith.constant 4 : index
    %c0_27 = arith.constant 0 : index
    %28 = vector.load %arg10[%c4, %c0_27] : memref<32x32xf32, #tpu.memory_space<vmem>>, vector<28x32xf32>
    %29 = arith.truncf %28 : vector<28x32xf32> to vector<28x32xbf16>
    %c4_28 = arith.constant 4 : index
    %c0_29 = arith.constant 0 : index
    %c0_30 = arith.constant 0 : index
    %30 = vector.load %arg2[%c4_28, %c0_29, %c0_30] : memref<5x32x448xbf16, #tpu.memory_space<vmem>>, vector<1x32x448xbf16>
    %31 = vector.shape_cast %30 : vector<1x32x448xbf16> to vector<32x448xbf16>
    %cst_31 = arith.constant dense<0.000000e+00> : vector<28x448xf32>
    %32 = tpu.matmul %29, %31, %cst_31 {dimension_numbers = #tpu.dot_dimension_numbers<[1], [0], [0], [1], [0, 0, 1, 1], [], []>} : vector<28x32xbf16>, vector<32x448xbf16>, vector<28x448xf32> -> vector<28x448xf32>
    %33 = arith.addf %27, %32 : vector<28x448xf32>
    %c0_32 = arith.constant 0 : index
    %c0_33 = arith.constant 0 : index
    %34 = vector.load %arg3[%c0_32, %c0_33] : memref<1x448xf32, #tpu.memory_space<vmem>>, vector<1x448xf32>
    %35 = vector.broadcast %34 : vector<1x448xf32> to vector<28x448xf32>
    %36 = arith.addf %33, %35 : vector<28x448xf32>
    %cst_34 = arith.constant 0.000000e+00 : f32
    %37 = vector.broadcast %cst_34 : f32 to vector<28x448xf32>
    %38 = arith.maximumf %36, %37 : vector<28x448xf32>
    %39 = vector.extract_strided_slice %38 {offsets = [0, 0], sizes = [27, 448], strides = [1, 1]} : vector<28x448xf32> to vector<27x448xf32>
    %40 = vector.extract_strided_slice %38 {offsets = [1, 0], sizes = [27, 448], strides = [1, 1]} : vector<28x448xf32> to vector<27x448xf32>
    %41 = arith.maximumf %39, %40 : vector<27x448xf32>
    %42 = vector.extract_strided_slice %41 {offsets = [0, 0], sizes = [27, 432], strides = [1, 1]} : vector<27x448xf32> to vector<27x432xf32>
    %43 = vector.extract_strided_slice %41 {offsets = [0, 16], sizes = [27, 432], strides = [1, 1]} : vector<27x448xf32> to vector<27x432xf32>
    %44 = arith.maximumf %42, %43 : vector<27x432xf32>
    %c0_35 = arith.constant 0 : index
    %c0_36 = arith.constant 0 : index
    %45 = vector.load %arg4[%c0_35, %c0_36] : memref<14x27xbf16, #tpu.memory_space<vmem>>, vector<14x27xbf16>
    %46 = arith.truncf %44 : vector<27x432xf32> to vector<27x432xbf16>
    %cst_37 = arith.constant dense<0.000000e+00> : vector<14x432xf32>
    %47 = tpu.matmul %45, %46, %cst_37 {dimension_numbers = #tpu.dot_dimension_numbers<[1], [0], [0], [1], [0, 0, 1, 1], [], []>} : vector<14x27xbf16>, vector<27x432xbf16>, vector<14x432xf32> -> vector<14x432xf32>
    %cst_38 = arith.constant 0.000000e+00 : f32
    %48 = vector.broadcast %cst_38 : f32 to vector<18x576xf32>
    %c0_39 = arith.constant 0 : index
    %c0_40 = arith.constant 0 : index
    %49 = vector.load %arg11[%c0_39, %c0_40] : memref<18x576xf32, #tpu.memory_space<vmem>>, vector<18x576xf32>
    tpu.vector_store %arg11[%c0_39, %c0_40], %48 {strides = array<i32>} : memref<18x576xf32, #tpu.memory_space<vmem>>, vector<18x576xf32>,
    %c2_41 = arith.constant 2 : index
    %c64 = arith.constant 64 : index
    %50 = vector.load %arg11[%c2_41, %c64] : memref<18x576xf32, #tpu.memory_space<vmem>>, vector<14x432xf32>
    tpu.vector_store %arg11[%c2_41, %c64], %47 {strides = array<i32>} : memref<18x576xf32, #tpu.memory_space<vmem>>, vector<14x432xf32>,
    %c0_42 = arith.constant 0 : index
    %c0_43 = arith.constant 0 : index
    %51 = vector.load %arg11[%c0_42, %c0_43] : memref<18x576xf32, #tpu.memory_space<vmem>>, vector<14x576xf32>
    %52 = arith.truncf %51 : vector<14x576xf32> to vector<14x576xbf16>
    %c0_44 = arith.constant 0 : index
    %c0_45 = arith.constant 0 : index
    %c0_46 = arith.constant 0 : index
    %53 = vector.load %arg5[%c0_44, %c0_45, %c0_46] : memref<5x576x448xbf16, #tpu.memory_space<vmem>>, vector<1x576x448xbf16>
    %54 = vector.shape_cast %53 : vector<1x576x448xbf16> to vector<576x448xbf16>
    %cst_47 = arith.constant dense<0.000000e+00> : vector<14x448xf32>
    %55 = tpu.matmul %52, %54, %cst_47 {dimension_numbers = #tpu.dot_dimension_numbers<[1], [0], [0], [1], [0, 0, 1, 1], [], []>} : vector<14x576xbf16>, vector<576x448xbf16>, vector<14x448xf32> -> vector<14x448xf32>
    %c1_48 = arith.constant 1 : index
    %c0_49 = arith.constant 0 : index
    %56 = vector.load %arg11[%c1_48, %c0_49] : memref<18x576xf32, #tpu.memory_space<vmem>>, vector<14x576xf32>
    %57 = arith.truncf %56 : vector<14x576xf32> to vector<14x576xbf16>
    %c1_50 = arith.constant 1 : index
    %c0_51 = arith.constant 0 : index
    %c0_52 = arith.constant 0 : index
    %58 = vector.load %arg5[%c1_50, %c0_51, %c0_52] : memref<5x576x448xbf16, #tpu.memory_space<vmem>>, vector<1x576x448xbf16>
    %59 = vector.shape_cast %58 : vector<1x576x448xbf16> to vector<576x448xbf16>
    %cst_53 = arith.constant dense<0.000000e+00> : vector<14x448xf32>
    %60 = tpu.matmul %57, %59, %cst_53 {dimension_numbers = #tpu.dot_dimension_numbers<[1], [0], [0], [1], [0, 0, 1, 1], [], []>} : vector<14x576xbf16>, vector<576x448xbf16>, vector<14x448xf32> -> vector<14x448xf32>
    %61 = arith.addf %55, %60 : vector<14x448xf32>
    %c2_54 = arith.constant 2 : index
    %c0_55 = arith.constant 0 : index
    %62 = vector.load %arg11[%c2_54, %c0_55] : memref<18x576xf32, #tpu.memory_space<vmem>>, vector<14x576xf32>
    %63 = arith.truncf %62 : vector<14x576xf32> to vector<14x576xbf16>
    %c2_56 = arith.constant 2 : index
    %c0_57 = arith.constant 0 : index
    %c0_58 = arith.constant 0 : index
    %64 = vector.load %arg5[%c2_56, %c0_57, %c0_58] : memref<5x576x448xbf16, #tpu.memory_space<vmem>>, vector<1x576x448xbf16>
    %65 = vector.shape_cast %64 : vector<1x576x448xbf16> to vector<576x448xbf16>
    %cst_59 = arith.constant dense<0.000000e+00> : vector<14x448xf32>
    %66 = tpu.matmul %63, %65, %cst_59 {dimension_numbers = #tpu.dot_dimension_numbers<[1], [0], [0], [1], [0, 0, 1, 1], [], []>} : vector<14x576xbf16>, vector<576x448xbf16>, vector<14x448xf32> -> vector<14x448xf32>
    %67 = arith.addf %61, %66 : vector<14x448xf32>
    %c3_60 = arith.constant 3 : index
    %c0_61 = arith.constant 0 : index
    %68 = vector.load %arg11[%c3_60, %c0_61] : memref<18x576xf32, #tpu.memory_space<vmem>>, vector<14x576xf32>
    %69 = arith.truncf %68 : vector<14x576xf32> to vector<14x576xbf16>
    %c3_62 = arith.constant 3 : index
    %c0_63 = arith.constant 0 : index
    %c0_64 = arith.constant 0 : index
    %70 = vector.load %arg5[%c3_62, %c0_63, %c0_64] : memref<5x576x448xbf16, #tpu.memory_space<vmem>>, vector<1x576x448xbf16>
    %71 = vector.shape_cast %70 : vector<1x576x448xbf16> to vector<576x448xbf16>
    %cst_65 = arith.constant dense<0.000000e+00> : vector<14x448xf32>
    %72 = tpu.matmul %69, %71, %cst_65 {dimension_numbers = #tpu.dot_dimension_numbers<[1], [0], [0], [1], [0, 0, 1, 1], [], []>} : vector<14x576xbf16>, vector<576x448xbf16>, vector<14x448xf32> -> vector<14x448xf32>
    %73 = arith.addf %67, %72 : vector<14x448xf32>
    %c4_66 = arith.constant 4 : index
    %c0_67 = arith.constant 0 : index
    %74 = vector.load %arg11[%c4_66, %c0_67] : memref<18x576xf32, #tpu.memory_space<vmem>>, vector<14x576xf32>
    %75 = arith.truncf %74 : vector<14x576xf32> to vector<14x576xbf16>
    %c4_68 = arith.constant 4 : index
    %c0_69 = arith.constant 0 : index
    %c0_70 = arith.constant 0 : index
    %76 = vector.load %arg5[%c4_68, %c0_69, %c0_70] : memref<5x576x448xbf16, #tpu.memory_space<vmem>>, vector<1x576x448xbf16>
    %77 = vector.shape_cast %76 : vector<1x576x448xbf16> to vector<576x448xbf16>
    %cst_71 = arith.constant dense<0.000000e+00> : vector<14x448xf32>
    %78 = tpu.matmul %75, %77, %cst_71 {dimension_numbers = #tpu.dot_dimension_numbers<[1], [0], [0], [1], [0, 0, 1, 1], [], []>} : vector<14x576xbf16>, vector<576x448xbf16>, vector<14x448xf32> -> vector<14x448xf32>
    %79 = arith.addf %73, %78 : vector<14x448xf32>
    %c0_72 = arith.constant 0 : index
    %c0_73 = arith.constant 0 : index
    %80 = vector.load %arg6[%c0_72, %c0_73] : memref<1x448xf32, #tpu.memory_space<vmem>>, vector<1x448xf32>
    %81 = vector.broadcast %80 : vector<1x448xf32> to vector<14x448xf32>
    %82 = arith.addf %79, %81 : vector<14x448xf32>
    %cst_74 = arith.constant 0.000000e+00 : f32
    %83 = vector.broadcast %cst_74 : f32 to vector<14x448xf32>
    %84 = arith.maximumf %82, %83 : vector<14x448xf32>
    %85 = vector.extract_strided_slice %84 {offsets = [0, 0], sizes = [13, 448], strides = [1, 1]} : vector<14x448xf32> to vector<13x448xf32>
    %86 = vector.extract_strided_slice %84 {offsets = [1, 0], sizes = [13, 448], strides = [1, 1]} : vector<14x448xf32> to vector<13x448xf32>
    %87 = arith.maximumf %85, %86 : vector<13x448xf32>
    %88 = vector.extract_strided_slice %87 {offsets = [0, 0], sizes = [13, 416], strides = [1, 1]} : vector<13x448xf32> to vector<13x416xf32>
    %89 = vector.extract_strided_slice %87 {offsets = [0, 32], sizes = [13, 416], strides = [1, 1]} : vector<13x448xf32> to vector<13x416xf32>
    %90 = arith.maximumf %88, %89 : vector<13x416xf32>
    %c0_75 = arith.constant 0 : index
    %c0_76 = arith.constant 0 : index
    %91 = vector.load %arg8[%c0_75, %c0_76] : memref<1x10xf32, #tpu.memory_space<vmem>>, vector<1x10xf32>
    %92 = vector.extract_strided_slice %90 {offsets = [0, 0], sizes = [1, 416], strides = [1, 1]} : vector<13x416xf32> to vector<1x416xf32>
    %93 = arith.truncf %92 : vector<1x416xf32> to vector<1x416xbf16>
    %c0_77 = arith.constant 0 : index
    %c0_78 = arith.constant 0 : index
    %c0_79 = arith.constant 0 : index
    %94 = vector.load %arg7[%c0_77, %c0_78, %c0_79] : memref<7x416x10xbf16, #tpu.memory_space<vmem>>, vector<1x416x10xbf16>
    %95 = vector.shape_cast %94 : vector<1x416x10xbf16> to vector<416x10xbf16>
    %cst_80 = arith.constant dense<0.000000e+00> : vector<1x10xf32>
    %96 = tpu.matmul %93, %95, %cst_80 {dimension_numbers = #tpu.dot_dimension_numbers<[1], [0], [0], [1], [0, 0, 1, 1], [], []>} : vector<1x416xbf16>, vector<416x10xbf16>, vector<1x10xf32> -> vector<1x10xf32>
    %97 = arith.addf %91, %96 : vector<1x10xf32>
    %98 = vector.extract_strided_slice %90 {offsets = [2, 0], sizes = [1, 416], strides = [1, 1]} : vector<13x416xf32> to vector<1x416xf32>
    %99 = arith.truncf %98 : vector<1x416xf32> to vector<1x416xbf16>
    %c1_81 = arith.constant 1 : index
    %c0_82 = arith.constant 0 : index
    %c0_83 = arith.constant 0 : index
    %100 = vector.load %arg7[%c1_81, %c0_82, %c0_83] : memref<7x416x10xbf16, #tpu.memory_space<vmem>>, vector<1x416x10xbf16>
    %101 = vector.shape_cast %100 : vector<1x416x10xbf16> to vector<416x10xbf16>
    %cst_84 = arith.constant dense<0.000000e+00> : vector<1x10xf32>
    %102 = tpu.matmul %99, %101, %cst_84 {dimension_numbers = #tpu.dot_dimension_numbers<[1], [0], [0], [1], [0, 0, 1, 1], [], []>} : vector<1x416xbf16>, vector<416x10xbf16>, vector<1x10xf32> -> vector<1x10xf32>
    %103 = arith.addf %97, %102 : vector<1x10xf32>
    %104 = vector.extract_strided_slice %90 {offsets = [4, 0], sizes = [1, 416], strides = [1, 1]} : vector<13x416xf32> to vector<1x416xf32>
    %105 = arith.truncf %104 : vector<1x416xf32> to vector<1x416xbf16>
    %c2_85 = arith.constant 2 : index
    %c0_86 = arith.constant 0 : index
    %c0_87 = arith.constant 0 : index
    %106 = vector.load %arg7[%c2_85, %c0_86, %c0_87] : memref<7x416x10xbf16, #tpu.memory_space<vmem>>, vector<1x416x10xbf16>
    %107 = vector.shape_cast %106 : vector<1x416x10xbf16> to vector<416x10xbf16>
    %cst_88 = arith.constant dense<0.000000e+00> : vector<1x10xf32>
    %108 = tpu.matmul %105, %107, %cst_88 {dimension_numbers = #tpu.dot_dimension_numbers<[1], [0], [0], [1], [0, 0, 1, 1], [], []>} : vector<1x416xbf16>, vector<416x10xbf16>, vector<1x10xf32> -> vector<1x10xf32>
    %109 = arith.addf %103, %108 : vector<1x10xf32>
    %110 = vector.extract_strided_slice %90 {offsets = [6, 0], sizes = [1, 416], strides = [1, 1]} : vector<13x416xf32> to vector<1x416xf32>
    %111 = arith.truncf %110 : vector<1x416xf32> to vector<1x416xbf16>
    %c3_89 = arith.constant 3 : index
    %c0_90 = arith.constant 0 : index
    %c0_91 = arith.constant 0 : index
    %112 = vector.load %arg7[%c3_89, %c0_90, %c0_91] : memref<7x416x10xbf16, #tpu.memory_space<vmem>>, vector<1x416x10xbf16>
    %113 = vector.shape_cast %112 : vector<1x416x10xbf16> to vector<416x10xbf16>
    %cst_92 = arith.constant dense<0.000000e+00> : vector<1x10xf32>
    %114 = tpu.matmul %111, %113, %cst_92 {dimension_numbers = #tpu.dot_dimension_numbers<[1], [0], [0], [1], [0, 0, 1, 1], [], []>} : vector<1x416xbf16>, vector<416x10xbf16>, vector<1x10xf32> -> vector<1x10xf32>
    %115 = arith.addf %109, %114 : vector<1x10xf32>
    %116 = vector.extract_strided_slice %90 {offsets = [8, 0], sizes = [1, 416], strides = [1, 1]} : vector<13x416xf32> to vector<1x416xf32>
    %117 = arith.truncf %116 : vector<1x416xf32> to vector<1x416xbf16>
    %c4_93 = arith.constant 4 : index
    %c0_94 = arith.constant 0 : index
    %c0_95 = arith.constant 0 : index
    %118 = vector.load %arg7[%c4_93, %c0_94, %c0_95] : memref<7x416x10xbf16, #tpu.memory_space<vmem>>, vector<1x416x10xbf16>
    %119 = vector.shape_cast %118 : vector<1x416x10xbf16> to vector<416x10xbf16>
    %cst_96 = arith.constant dense<0.000000e+00> : vector<1x10xf32>
    %120 = tpu.matmul %117, %119, %cst_96 {dimension_numbers = #tpu.dot_dimension_numbers<[1], [0], [0], [1], [0, 0, 1, 1], [], []>} : vector<1x416xbf16>, vector<416x10xbf16>, vector<1x10xf32> -> vector<1x10xf32>
    %121 = arith.addf %115, %120 : vector<1x10xf32>
    %122 = vector.extract_strided_slice %90 {offsets = [10, 0], sizes = [1, 416], strides = [1, 1]} : vector<13x416xf32> to vector<1x416xf32>
    %123 = arith.truncf %122 : vector<1x416xf32> to vector<1x416xbf16>
    %c5 = arith.constant 5 : index
    %c0_97 = arith.constant 0 : index
    %c0_98 = arith.constant 0 : index
    %124 = vector.load %arg7[%c5, %c0_97, %c0_98] : memref<7x416x10xbf16, #tpu.memory_space<vmem>>, vector<1x416x10xbf16>
    %125 = vector.shape_cast %124 : vector<1x416x10xbf16> to vector<416x10xbf16>
    %cst_99 = arith.constant dense<0.000000e+00> : vector<1x10xf32>
    %126 = tpu.matmul %123, %125, %cst_99 {dimension_numbers = #tpu.dot_dimension_numbers<[1], [0], [0], [1], [0, 0, 1, 1], [], []>} : vector<1x416xbf16>, vector<416x10xbf16>, vector<1x10xf32> -> vector<1x10xf32>
    %127 = arith.addf %121, %126 : vector<1x10xf32>
    %128 = vector.extract_strided_slice %90 {offsets = [12, 0], sizes = [1, 416], strides = [1, 1]} : vector<13x416xf32> to vector<1x416xf32>
    %129 = arith.truncf %128 : vector<1x416xf32> to vector<1x416xbf16>
    %c6 = arith.constant 6 : index
    %c0_100 = arith.constant 0 : index
    %c0_101 = arith.constant 0 : index
    %130 = vector.load %arg7[%c6, %c0_100, %c0_101] : memref<7x416x10xbf16, #tpu.memory_space<vmem>>, vector<1x416x10xbf16>
    %131 = vector.shape_cast %130 : vector<1x416x10xbf16> to vector<416x10xbf16>
    %cst_102 = arith.constant dense<0.000000e+00> : vector<1x10xf32>
    %132 = tpu.matmul %129, %131, %cst_102 {dimension_numbers = #tpu.dot_dimension_numbers<[1], [0], [0], [1], [0, 0, 1, 1], [], []>} : vector<1x416xbf16>, vector<416x10xbf16>, vector<1x10xf32> -> vector<1x10xf32>
    %133 = arith.addf %127, %132 : vector<1x10xf32>
    %c0_103 = arith.constant 0 : index
    %c0_104 = arith.constant 0 : index
    %c0_105 = arith.constant 0 : index
    %134 = vector.load %arg9[%c0_103, %c0_104, %c0_105] : memref<1x1x10xf32, #tpu.memory_space<vmem>>, vector<1x1x10xf32>
    %135 = vector.shape_cast %134 : vector<1x1x10xf32> to vector<1x10xf32>
    %136 = vector.shape_cast %133 : vector<1x10xf32> to vector<1x1x10xf32>
    tpu.vector_store %arg9[%c0_103, %c0_104, %c0_105], %136 {strides = array<i32>} : memref<1x1x10xf32, #tpu.memory_space<vmem>>, vector<1x1x10xf32>,
    return
  }
  func.func @transform_0(%arg0: i32) -> (i32, i32, i32) {
    %c0_i32 = arith.constant 0 : i32
    %c0_i32_0 = arith.constant 0 : i32
    %c0_i32_1 = arith.constant 0 : i32
    return %arg0, %c0_i32, %c0_i32_0 : i32, i32, i32
  }
  func.func @transform_1(%arg0: i32) -> (i32, i32, i32) {
    %c0_i32 = arith.constant 0 : i32
    %c0_i32_0 = arith.constant 0 : i32
    %c0_i32_1 = arith.constant 0 : i32
    %c0_i32_2 = arith.constant 0 : i32
    return %c0_i32, %c0_i32_0, %c0_i32_1 : i32, i32, i32
  }
  func.func @transform_2(%arg0: i32) -> (i32, i32) {
    %c0_i32 = arith.constant 0 : i32
    %c0_i32_0 = arith.constant 0 : i32
    %c0_i32_1 = arith.constant 0 : i32
    return %c0_i32, %c0_i32_0 : i32, i32
  }
  func.func @transform_3(%arg0: i32) -> (i32, i32) {
    %c0_i32 = arith.constant 0 : i32
    %c0_i32_0 = arith.constant 0 : i32
    %c0_i32_1 = arith.constant 0 : i32
    return %c0_i32, %c0_i32_0 : i32, i32
  }
  func.func @transform_4(%arg0: i32) -> (i32, i32, i32) {
    %c0_i32 = arith.constant 0 : i32
    %c0_i32_0 = arith.constant 0 : i32
    %c0_i32_1 = arith.constant 0 : i32
    %c0_i32_2 = arith.constant 0 : i32
    return %c0_i32, %c0_i32_0, %c0_i32_1 : i32, i32, i32
  }
  func.func @transform_5(%arg0: i32) -> (i32, i32) {
    %c0_i32 = arith.constant 0 : i32
    %c0_i32_0 = arith.constant 0 : i32
    %c0_i32_1 = arith.constant 0 : i32
    return %c0_i32, %c0_i32_0 : i32, i32
  }
  func.func @transform_6(%arg0: i32) -> (i32, i32, i32) {
    %c0_i32 = arith.constant 0 : i32
    %c0_i32_0 = arith.constant 0 : i32
    %c0_i32_1 = arith.constant 0 : i32
    %c0_i32_2 = arith.constant 0 : i32
    return %c0_i32, %c0_i32_0, %c0_i32_1 : i32, i32, i32
  }
  func.func @transform_7(%arg0: i32) -> (i32, i32) {
    %c0_i32 = arith.constant 0 : i32
    %c0_i32_0 = arith.constant 0 : i32
    %c0_i32_1 = arith.constant 0 : i32
    return %c0_i32, %c0_i32_0 : i32, i32
  }
  func.func @transform_8(%arg0: i32) -> (i32, i32, i32) {
    %c0_i32 = arith.constant 0 : i32
    %c0_i32_0 = arith.constant 0 : i32
    %c0_i32_1 = arith.constant 0 : i32
    return %arg0, %c0_i32, %c0_i32_0 : i32, i32, i32
  }
}

</mosaic_0001>

<bundles_post_ra>
// kernel: net2_forward.1
= control target key start
LH: loop header
LB: loop body
LE: loop exit
PB: predicated region body
PF: predicated region fallthrough
CT: control target
= control target key end

     0   :  { %13 = vsyncpa [#allocation5], 0  ;;  %s17014_s0 = inlined_call_operand.vmem [shape: f32[2,28,28], index: 0, kind: input, shape index: {}]   ;;  %s17015_s1 = inlined_call_operand.vmem [shape: bf16[5,32,448], index: 1, kind: input, shape index: {}]   ;;  %s17016_s2 = inlined_call_operand.vmem [shape: f32[1,448], index: 2, kind: input, shape index: {}]   ;;  %s17017_s3 = inlined_call_operand.vmem [shape: bf16[14,27], index: 3, kind: input, shape index: {}]   ;;  %s17018_s4 = inlined_call_operand.vmem [shape: bf16[5,576,448], index: 4, kind: input, shape index: {}]   ;;  %s17019_s5 = inlined_call_operand.vmem [shape: f32[1,448], index: 5, kind: input, shape index: {}]   ;;  %s17020_s6 = inlined_call_operand.vmem [shape: bf16[7,416,10], index: 6, kind: input, shape index: {}]   ;;  %s17021_s7 = inlined_call_operand.vmem [shape: f32[1,10], index: 7, kind: input, shape index: {}]   ;;  %s17022_s8 = inlined_call_operand.hbm [shape: f32[2,1,10], index: 8, kind: output, shape index: {}]  }
   0x1   :  { %15 = vsyncpa [#allocation5 + $0x1], 0  ;;  %s13656_s27 = smov 0   ;;  %s13658_s28 = smov 0  }
   0x2   :  { %s13660_s29 = smov 0   ;;  %s13662_s30 = smov 0  }
   0x3 LB: > { %s13677_s9 = sadd.s32 4294967295, %s13601_s30   ;;  %s9830_s10 = sadd.s32 4294967294, %s13601_s30   ;;  %s13601_s30 = sphi %s13662_s30, %s17028_s30   ;;  %s13597_s29 = sphi %s13660_s29, %s17027_s29   ;;  %s13593_s28 = sphi %s13658_s28, %s17026_s28   ;;  %s13589_s27 = sphi %s13656_s27, %s17025_s27  }
   0x4   : > { %s13681_s11 = sadd.s32 1, %s13601_s30   ;;  %s201_s12 = sadd.s32 1, %s13597_s29 }
   0x5   : > { %s198_s13 = ssub.s32 %s13601_s30, %s13681_s11  ;;  %p211_p0 = scmp.ne.s32.totalorder %s13597_s29, %s13593_s28 }
   0x6   : > { %p199_p1 = scmp.eq.s32.totalorder %s198_s13, 0  ;;  %p212_p2 = scmp.eq.s32.totalorder %s13677_s9, 1 }
   0x7   : > { %p217_p3 = scmp.ne.s32.totalorder %s13593_s28, %s13589_s27  ;;  %p218_p4 = scmp.eq.s32.totalorder %s9830_s10, 1 }
   0x8   : > { %s13692_s14 = scalar_select %p199_p1, %s13597_s29, %s201_s12  }
   0x9   : > { %p13694_p5 = por %p212_p2, %p211_p0  ;;  %p13698_p6 = por %p218_p4, %p217_p3 }
   0xa   : > { %p9833_p7 = scmp.ge.s32.totalorder %s13601_s30, 1  ;;  %p265_p8 = scmp.lt.s32.totalorder %s13601_s30, 3 }
   0xc   : > { %p266_p9 = pnand %p9833_p7, %p265_p8 }
   0xd   : > { %p298_p10 = scmp.lt.s32.totalorder (!%p266_p9), %s13677_s9, 1  ;;  %vm304_vm0 = vcmask (!%p266_p9), 261120   ;;  %v13603_v0 = vmov (!%p266_p9), 0.0   ;;  %v12210_v1 = vld [vmem:[%s17015_s1 + $0x44] ss:$16 sps:$4 sm:$0xff] (!%p266_p9)   ;;  %v13604_v3 = vmov (!%p266_p9), 0  }
   0xe   : > { %269 = sbr.rel (%p266_p9) target bundleno = 2428 (0x97c), region = 52  ;;  %307 = vst.msk [vmem:[#allocation2 + $0x10] sm:$0xff] (!%p266_p9), %vm304_vm0, %v13603_v0  ;;  %308 = vst.msk [vmem:[#allocation2 + $0x18] sm:$0xff] (!%p266_p9), %vm304_vm0, %v13603_v0  ;;  %v12212_v2 = vld [vmem:[%s17015_s1 + $0xc] ss:$16 sps:$4 sm:$0xff] (!%p266_p9)   ;;  %442 = vmatprep.mubr.bf16.mxu0 (!%p266_p9), %v13604_v3  ;;  %647 = vmatprep.mubr.bf16.mxu1 (!%p266_p9), %v13604_v3  ;;  %vm329_vm1 = vcmask (!%p266_p9), 244752  }
   0xf   : > { %305 = vst.msk [vmem:[#allocation2] sm:$0xff] (!%p266_p9), %vm304_vm0, %v13603_v0  ;;  %306 = vst.msk [vmem:[#allocation2 + $0x8] sm:$0xff] (!%p266_p9), %vm304_vm0, %v13603_v0  ;;  %410 = vmatprep.subr.bf16.mxu0 (!%p266_p9), %v12210_v1  ;;  %v12214_v4 = vld [vmem:[%s17015_s1 + $0x40] ss:$16 sps:$4 sm:$0xff] (!%p266_p9)   ;;  %v12215_v5 = vld [vmem:[%s17015_s1 + $0x8] ss:$16 sps:$4 sm:$0xff] (!%p266_p9)   ;;  %615 = vmatprep.subr.bf16.mxu1 (!%p266_p9), %v12212_v2 }
  0x10   : > { %1562 = vst [vmem:[#allocation3] sm:$0xff] (!%p266_p9), %v13603_v0  ;;  %1563 = vst [vmem:[#allocation3 + $0x8] sm:$0xff] (!%p266_p9), %v13603_v0  ;;  %v12216_v6 = vld [vmem:[%s17015_s1 + $0x64] ss:$16 sps:$4 sm:$0xff] (!%p266_p9)   ;;  %411 = vmatpush1.bf16.msra.mxu0 (!%p266_p9), %v12214_v4  ;;  %616 = vmatpush1.bf16.msra.mxu1 (!%p266_p9), %v12215_v5  ;;  %v12218_v7 = vld [vmem:[%s17015_s1 + $0x2c] ss:$16 sps:$4 sm:$0xff] (!%p266_p9)  }
  0x11   : > { %1564 = vst [vmem:[#allocation3 + $0x10] sm:$0xff] (!%p266_p9), %v13603_v0  ;;  %1565 = vst [vmem:[#allocation3 + $0x18] sm:$0xff] (!%p266_p9), %v13603_v0  ;;  %v12220_v8 = vld [vmem:[%s17015_s1 + $0x60] ss:$16 sps:$4 sm:$0xff] (!%p266_p9)   ;;  %412 = vmatprep.subr.bf16.mxu0 (!%p266_p9), %v12216_v6  ;;  %v12221_v12 = vld [vmem:[%s17015_s1 + $0x28] ss:$16 sps:$4 sm:$0xff] (!%p266_p9)   ;;  %617 = vmatprep.subr.bf16.mxu1 (!%p266_p9), %v12218_v7 }
  0x12   : > { %1568 = vst [vmem:[#allocation3 + $0x28] sm:$0xff] (!%p266_p9), %v13603_v0  ;;  %1571 = vst [vmem:[#allocation3 + $0x40] sm:$0xff] (!%p266_p9), %v13603_v0  ;;  %v12224_v14 = vld [vmem:[%s17015_s1 + $0x4c] ss:$16 sps:$4 sm:$0xff] (!%p266_p9)   ;;  %vm333_vm2 = vcmask (!%p266_p9), 240656   ;;  %vm1287_vm3 = vcmask (!%p266_p9), 1046528  }
  0x13   : > { %1573 = vst [vmem:[#allocation3 + $0x50] sm:$0x3] (!%p266_p9), %v13603_v0  ;;  %1574 = vst [vmem:[#allocation3 + $0x58] sm:$0x3] (!%p266_p9), %v13603_v0  ;;  %v12227_v15 = vld [vmem:[%s17015_s1 + $0x8c] ss:$16 sps:$4 sm:$0xff] (!%p266_p9)  }
  0x14   : > { %1575 = vst [vmem:[#allocation3 + $0x60] sm:$0x3] (!%p266_p9), %v13603_v0  ;;  %1576 = vst [vmem:[#allocation3 + $0x68] sm:$0x3] (!%p266_p9), %v13603_v0  ;;  %413 = vmatpush1.bf16.msra.mxu0 (!%p266_p9), %v12220_v8  ;;  %618 = vmatpush1.bf16.msra.mxu1 (!%p266_p9), %v12221_v12  ;;  %v12222_v21 = vld [vmem:[%s17015_s1 + $0x48] ss:$16 sps:$4 sm:$0xff] (!%p266_p9)  }
  0x15   : > { %s299_s19 = scalar_select %p298_p10, %s13677_s9, 1  ;;  %463 = vmatprep.subr.bf16.mxu0 %v12224_v14  ;;  %782 = vmatprep.subr.bf16.mxu1 %v12227_v15  ;;  %v12225_v27 = vld [vmem:[%s17015_s1 + $0x88] ss:$16 sps:$4 sm:$0xff]   ;;  %v12230_v28 = vld [vmem:[%s17015_s1 + $0x6c] ss:$16 sps:$4 sm:$0xff]   ;;  %vm1396_vm4 = vcmask 916480  }
  0x16   : > { %v12233_v29 = vld [vmem:[%s17015_s1 + $0xac] ss:$16 sps:$4 sm:$0xff]   ;;  %v12228_v30 = vld [vmem:[%s17015_s1 + $0x68] ss:$16 sps:$4 sm:$0xff]   ;;  %v12236_v32 = vld [vmem:[%s17015_s1 + $0x4] ss:$16 sps:$4 sm:$0xff]  }
  0x17   : > { %s11741_s26 = sshll.u32 %s299_s19, 5  ;;  %s13605_s19 = smov 2   ;;  %v12231_v31 = vld [vmem:[%s17015_s1 + $0xa8] ss:$16 sps:$4 sm:$0xff]   ;;  %v12239_v36 = vld [vmem:[%s17015_s1 + $0xcc] ss:$16 sps:$4 sm:$0xff]  }
  0x18   : > { %s302_s18 = scalar_lea.vmem %s17014_s0, %s11741_s26  ;;  %v12234_v42 = vld [vmem:[%s17015_s1] ss:$16 sps:$4 sm:$0xff]   ;;  %v12237_v43 = vld [vmem:[%s17015_s1 + $0xc8] ss:$16 sps:$4 sm:$0xff]   ;;  %v12242_v44 = vld [vmem:[%s17015_s1 + $0x24] ss:$16 sps:$4 sm:$0xff]  }
  0x19   : > { %v311_v9 = vld [vmem:[%s302_s18 + $0x10] sm:$0xff]  ;;  %v309_v10 = vld [vmem:[%s302_s18] sm:$0xff]  ;;  %v312_v11 = vld [vmem:[%s302_s18 + $0x18] sm:$0xf]  ;;  %s13606_s10 = smov 112   ;;  %vm1460_vm5 = vcmask 1044480  }
  0x1a   : > { %321 = vrot.lane.b32.xlu1 %v311_v9, %s13605_s19  ;;  %317 = vrot.lane.b32.xlu0 %v309_v10, %s13605_s19  ;;  %v310_v13 = vld [vmem:[%s302_s18 + $0x8] sm:$0xff]  ;;  %v12240_v47 = vld [vmem:[%s17015_s1 + $0x20] ss:$16 sps:$4 sm:$0xff]   ;;  %vm1461_vm6 = vcmask 1045504   ;;  %vm1456_vm7 = vcmask 220160   ;;  %vm1566_vm8 = vcmask 523264  }
  0x1b   : > { %v12245_v45 = vld [vmem:[%s17015_s1 + $0xec] ss:$16 sps:$4 sm:$0xff]   ;;  %v12243_v48 = vld [vmem:[%s17015_s1 + $0xe8] ss:$16 sps:$4 sm:$0xff]   ;;  %v12248_v49 = vld [vmem:[%s17015_s1 + $0x84] ss:$16 sps:$4 sm:$0xff]  }
  0x1c   : > { %v12251_v52 = vld [vmem:[%s17015_s1 + $0x10c] ss:$16 sps:$4 sm:$0xff]   ;;  %v12246_v56 = vld [vmem:[%s17015_s1 + $0x80] ss:$16 sps:$4 sm:$0xff]   ;;  %v12249_v57 = vld [vmem:[%s17015_s1 + $0x108] ss:$16 sps:$4 sm:$0xff]  }
  0x1d   : > { %v12254_v58 = vld [vmem:[%s17015_s1 + $0xa4] ss:$16 sps:$4 sm:$0xff]   ;;  %v12257_v59 = vld [vmem:[%s17015_s1 + $0x12c] ss:$16 sps:$4 sm:$0xff]   ;;  %v12252_v61 = vld [vmem:[%s17015_s1 + $0xa0] ss:$16 sps:$4 sm:$0xff]  }
  0x1e   : > { %323 = vrot.lane.b32.xlu1 %v312_v11, %s13605_s19  ;;  %319 = vrot.lane.b32.xlu0 %v310_v13, %s13605_s19  ;;  %v12255_v62 = vld [vmem:[%s17015_s1 + $0x128] ss:$16 sps:$4 sm:$0xff]   ;;  %v12260_v63 = vld [vmem:[%s17015_s1 + $0xc4] ss:$16 sps:$4 sm:$0xff]   ;;  %vm1587_vm9 = vcmask 1041408   ;;  %s13608_s25 = smov 64  }
  0x1f   : > { %v12258_v6 = vld [vmem:[%s17015_s1 + $0xc0] ss:$16 sps:$4 sm:$0xff]   ;;  %v12263_v7 = vld [vmem:[%s17015_s1 + $0xe4] ss:$16 sps:$4 sm:$0xff]   ;;  %vm1630_vm10 = vcmask 1048066   ;;  %vm1636_vm11 = vcmask 1048064  }
  0x20   : > { %v12261_v9 = vld [vmem:[%s17015_s1 + $0xe0] ss:$16 sps:$4 sm:$0xff]   ;;  %v12266_v10 = vld [vmem:[%s17015_s1 + $0x104] ss:$16 sps:$4 sm:$0xff]   ;;  %vm1634_vm12 = vcmask 916482   ;;  %vm1577_vm14 = vcmask 517120  }
  0x21   : > { %v12264_v14 = vld [vmem:[%s17015_s1 + $0x100] ss:$16 sps:$4 sm:$0xff]   ;;  %v12269_v15 = vld [vmem:[%s17015_s1 + $0x124] ss:$16 sps:$4 sm:$0xff]   ;;  %vm5294_vm13 = vsmask.f32 6400 }
  0x22   : > { %s13609_s21 = smov 96   ;;  %vm7635_vm15 = vcmask 785408   ;;  %s11738_s22 = sshll.u32 %s13677_s9, 4 }
  0x23   : > { %s13610_s13 = smov [#allocation4]  }
  0x24   : > { %s13543_s17 = sshll.u32 %s13610_s13, 4  ;;  %s13544_s17 = int_to_ptr.vmem [resolvable:$false] %s13543_s17 }
  0x25   : > { %s13545_s18 = scalar_lea.vmem %s13544_s17, 32 }
  0x8c   : > { %v322_v16 = vpop.permute.xlu1 %321  ;;  %v318_v17 = vpop.permute.xlu0 %317 }
  0x8d   : > { %332 = vst.msk [vmem:[#allocation2 + $0x12] sm:$0xff] %vm329_vm1, %v322_v16  ;;  %330 = vst.msk [vmem:[#allocation2 + $0x2] sm:$0xff] %vm329_vm1, %v318_v17  ;;  %v12267_v16 = vld [vmem:[%s17015_s1 + $0x120] ss:$16 sps:$4 sm:$0xff]   ;;  %v1219_v17 = vlaneseq }
  0x90   : > { %v324_v18 = vpop.permute.xlu1 %323  ;;  %v320_v19 = vpop.permute.xlu0 %319 }
  0x91   : > { %334 = vst.msk [vmem:[#allocation2 + $0x1a] sm:$0xf] %vm333_vm2, %v324_v18 }
  0x92   : > { %331 = vst.msk [vmem:[#allocation2 + $0xa] sm:$0xff] %vm329_vm1, %v320_v19 }
  0x94   : > { %v349_v20 = vld [vmem:[#allocation2 + $0x1] sm:$0xff]  ;;  %v670_v50 = vld [vmem:[#allocation2 + $0x12] sm:$0xff] }
  0x95   : > { %v335_v23 = vld [vmem:[#allocation2] sm:$0xff] }
  0x96   : > { %v668_v41 = vld [vmem:[#allocation2 + $0x2] sm:$0xff] }
  0x98   : > { %v352_v34 = vld [vmem:[#allocation2 + $0x19] sm:$0xf] }
  0x99   : > { %v350_v22 = vld [vmem:[#allocation2 + $0x9] sm:$0xff]  ;;  %v351_v33 = vld [vmem:[#allocation2 + $0x11] sm:$0xff]  ;;  %v671_v51 = vld [vmem:[#allocation2 + $0x1a] sm:$0xf] }
  0x9a   : > { %v336_v24 = vld [vmem:[#allocation2 + $0x8] sm:$0xff]  ;;  %v353_v25 = vpack.c.bf16 %v350_v22, %v349_v20  ;;  %v337_v35 = vld [vmem:[#allocation2 + $0x10] sm:$0xff]  ;;  %v338_v37 = vld [vmem:[#allocation2 + $0x18] sm:$0xf]  ;;  %v354_v38 = vpack.c.bf16 %v352_v34, %v351_v33  ;;  %v673_v53 = vpack.c.bf16 %v671_v51, %v670_v50  ;;  %v13880_v22 = vshrl.u32 %v1219_v17, 7 }
  0x9b   : > { %v13750_v26 = vpack.c.bf16 %v336_v24, %v335_v23  ;;  %v340_v39 = vpack.c.bf16 %v338_v37, %v337_v35  ;;  %v669_v40 = vld [vmem:[#allocation2 + $0xa] sm:$0xff]  ;;  %v853_v0 = vld [vmem:[#allocation2 + $0x13] sm:$0xff]  ;;  %v854_v1 = vld [vmem:[#allocation2 + $0x1b] sm:$0xf] }
  0x9c   : > { %9852 = vmatmul.mubr.msk.bf16.vlgmr.msra.gmra.mrb[0].mxu0 %vm304_vm0, %v353_v25  ;;  %v672_v46 = vpack.c.bf16 %v669_v40, %v668_v41  ;;  %v851_v54 = vld [vmem:[#allocation2 + $0x3] sm:$0xff]  ;;  %v852_v55 = vld [vmem:[#allocation2 + $0xb] sm:$0xff]  ;;  %v856_v2 = vpack.c.bf16 %v854_v1, %v853_v0  ;;  %v1036_v11 = vld [vmem:[#allocation2 + $0x14] sm:$0xff] }
  0x9d   : > { %9866 = vmatmul.mubr.msk.bf16.vlgmr.msra.gmra.mrb[0].mxu1 %vm304_vm0, %v13750_v26  ;;  %464 = vmatpush1.bf16.msra.mxu0 %v12222_v21  ;;  %v855_v60 = vpack.c.bf16 %v852_v55, %v851_v54  ;;  %v1034_v4 = vld [vmem:[#allocation2 + $0x4] sm:$0xff]  ;;  %v1035_v5 = vld [vmem:[#allocation2 + $0xc] sm:$0xff]  ;;  %v1037_v12 = vld [vmem:[#allocation2 + $0x1c] sm:$0xf] }
  0x9e   : > { %452 = vmatprep.mubr.bf16.mxu0 %v13604_v3  ;;  %657 = vmatprep.mubr.bf16.mxu1 %v13604_v3  ;;  %v1038_v8 = vpack.c.bf16 %v1035_v5, %v1034_v4  ;;  %v1039_v13 = vpack.c.bf16 %v1037_v12, %v1036_v11 }
  0x9f   : > { %783 = vmatpush1.bf16.msra.mxu1 %v12225_v27  ;;  %465 = vmatprep.subr.bf16.mxu0 %v12230_v28  ;;  %v1233_v28 = vsub.s32 3, %v13880_v22 }
  0xa0   : > { %784 = vmatprep.subr.bf16.mxu1 %v12233_v29  ;;  %v1217_v29 = vld [vmem:[%s17016_s2] sm:$0xf] }
  0xa1   : > { %466 = vmatpush1.bf16.msra.mxu0 %v12228_v30 }
  0xa2   : > { %562 = vmatprep.subr.bf16.mxu0 %v12236_v32  ;;  %v1234_v32 = vrot.slane %v1217_v29, %v1233_v28 }
  0xa3   : > { %785 = vmatpush1.bf16.msra.mxu1 %v12231_v31 }
  0xa4   : > { %965 = vmatprep.subr.bf16.mxu1 %v12239_v36  ;;  %9853 = vmatmul.mubr.msk.bf16.gmra.mrb[4].mxu0 %vm304_vm0, %v354_v38 }
  0xa5   : > { %9867 = vmatmul.mubr.msk.bf16.gmra.mrb[4].mxu1 %vm304_vm0, %v340_v39  ;;  %495 = vmatprep.mubr.bf16.mxu0 %v13604_v3 }
  0xa6   : > { %814 = vmatprep.mubr.bf16.mxu1 %v13604_v3 }
  0xac   : > { %9854 = vmatmul.mubr.msk.bf16.vlgmr.msra.gmra.mrb[8].mxu0 %vm304_vm0, %v353_v25 }
  0xad   : > { %9886 = vmatmul.mubr.msk.bf16.vlgmr.msra.gmra.mrb[0].mxu1 %vm304_vm0, %v672_v46  ;;  %563 = vmatpush1.bf16.msra.mxu0 %v12234_v42 }
  0xae   : > { %505 = vmatprep.mubr.bf16.mxu0 %v13604_v3  ;;  %824 = vmatprep.mubr.bf16.mxu1 %v13604_v3 }
  0xaf   : > { %966 = vmatpush1.bf16.msra.mxu1 %v12237_v43  ;;  %564 = vmatprep.subr.bf16.mxu0 %v12242_v44 }
  0xb0   : > { %967 = vmatprep.subr.bf16.mxu1 %v12245_v45 }
  0xb1   : > { %565 = vmatpush1.bf16.msra.mxu0 %v12240_v47 }
  0xb2   : > { %729 = vmatprep.subr.bf16.mxu0 %v12248_v49 }
  0xb3   : > { %968 = vmatpush1.bf16.msra.mxu1 %v12243_v48 }
  0xb4   : > { %1148 = vmatprep.subr.bf16.mxu1 %v12251_v52  ;;  %9855 = vmatmul.mubr.msk.bf16.gmra.mrb[12].mxu0 %vm304_vm0, %v354_v38 }
  0xb5   : > { %9887 = vmatmul.mubr.msk.bf16.gmra.mrb[4].mxu1 %vm304_vm0, %v673_v53  ;;  %594 = vmatprep.mubr.bf16.mxu0 %v13604_v3 }
  0xb6   : > { %997 = vmatprep.mubr.bf16.mxu1 %v13604_v3 }
  0xbc   : > { %9864 = vmatmul.mubr.msk.bf16.vlgmr.msra.gmra.mrb[0].mxu0 %vm304_vm0, %v13750_v26  ;;  %v1229_v26 = vsub.s32 2, %v13880_v22 }
  0xbd   : > { %9906 = vmatmul.mubr.msk.bf16.vlgmr.msra.gmra.mrb[0].mxu1 %vm304_vm0, %v855_v60  ;;  %730 = vmatpush1.bf16.msra.mxu0 %v12246_v56 }
  0xbe   : > { %604 = vmatprep.mubr.bf16.mxu0 %v13604_v3  ;;  %1007 = vmatprep.mubr.bf16.mxu1 %v13604_v3  ;;  %v1230_v30 = vrot.slane %v1217_v29, %v1229_v26 }
  0xbf   : > { %1149 = vmatpush1.bf16.msra.mxu1 %v12249_v57  ;;  %731 = vmatprep.subr.bf16.mxu0 %v12254_v58 }
  0xc0   : > { %1150 = vmatprep.subr.bf16.mxu1 %v12257_v59 }
  0xc1   : > { %732 = vmatpush1.bf16.msra.mxu0 %v12252_v61 }
  0xc2   : > { %912 = vmatprep.subr.bf16.mxu0 %v12260_v63 }
  0xc3   : > { %1151 = vmatpush1.bf16.msra.mxu1 %v12255_v62 }
  0xc4   : > { %9865 = vmatmul.mubr.msk.bf16.gmra.mrb[4].mxu0 %vm304_vm0, %v340_v39 }
  0xc5   : > { %9907 = vmatmul.mubr.msk.bf16.gmra.mrb[4].mxu1 %vm304_vm0, %v856_v2  ;;  %761 = vmatprep.mubr.bf16.mxu0 %v13604_v3 }
  0xc6   : > { %1180 = vmatprep.mubr.bf16.mxu1 %v13604_v3 }
  0xcc   : > { %9884 = vmatmul.mubr.msk.bf16.vlgmr.msra.gmra.mrb[0].mxu0 %vm304_vm0, %v672_v46 }
  0xcd   : > { %9926 = vmatmul.mubr.msk.bf16.vlgmr.msra.gmra.mrb[0].mxu1 %vm304_vm0, %v1038_v8  ;;  %913 = vmatpush1.bf16.msra.mxu0 %v12258_v6 }
  0xce   : > { %771 = vmatprep.mubr.bf16.mxu0 %v13604_v3  ;;  %1190 = vmatprep.mubr.bf16.mxu1 %v13604_v3 }
  0xcf   : > { %914 = vmatprep.subr.bf16.mxu0 %v12263_v7 }
  0xd1   : > { %915 = vmatpush1.bf16.msra.mxu0 %v12261_v9 }
  0xd2   : > { %1095 = vmatprep.subr.bf16.mxu0 %v12266_v10 }
  0xd4   : > { %9885 = vmatmul.mubr.msk.bf16.gmra.mrb[4].mxu0 %vm304_vm0, %v673_v53 }
  0xd5   : > { %9927 = vmatmul.mubr.msk.bf16.gmra.mrb[4].mxu1 %vm304_vm0, %v1039_v13  ;;  %944 = vmatprep.mubr.bf16.mxu0 %v13604_v3 }
  0xdc   : > { %9904 = vmatmul.mubr.msk.bf16.vlgmr.msra.gmra.mrb[0].mxu0 %vm304_vm0, %v855_v60 }
  0xdd   : > { %1096 = vmatpush1.bf16.msra.mxu0 %v12264_v14  ;;  %954 = vmatprep.mubr.bf16.mxu0 %v13604_v3 }
  0xde   : > { %1097 = vmatprep.subr.bf16.mxu0 %v12269_v15 }
  0xe1   : > { %1098 = vmatpush1.bf16.msra.mxu0 %v12267_v16 }
  0xe4   : > { %9905 = vmatmul.mubr.msk.bf16.gmra.mrb[4].mxu0 %vm304_vm0, %v856_v2 }
  0xe5   : > { %1127 = vmatprep.mubr.bf16.mxu0 %v13604_v3 }
  0xec   : > { %9924 = vmatmul.mubr.msk.bf16.vlgmr.msra.gmra.mrb[0].mxu0 %vm304_vm0, %v1038_v8 }
  0xed   : > { %1137 = vmatprep.mubr.bf16.mxu0 %v13604_v3 }
  0xf4   : > { %9925 = vmatmul.mubr.msk.bf16.gmra.mrb[4].mxu0 %vm304_vm0, %v1039_v13 }
  0xf5   : > { %1508 = vmatprep.mubr.bf16.mxu0 %v13604_v3 }
 0x17f   : > { %v497_v18 = vpop.f32.mrb[8].mxu0 }
 0x180   : > { %v499_v19 = vpop.f32.mrb[9].mxu0 }
 0x181   : > { %v501_v20 = vpop.f32.mrb[10].mxu0 }
 0x182   : > { %v503_v21 = vpop.f32.mrb[11].mxu0 }
 0x187   : > { %v507_v23 = vpop.f32.mrb[12].mxu0 }
 0x188   : > { %v509_v24 = vpop.f32.mrb[13].mxu0 }
 0x189   : > { %v511_v25 = vpop.f32.mrb[14].mxu0 }
 0x18a   : > { %v513_v27 = vpop.f32.mrb[15].mxu0 }
 0x1a0   : > { %v1182_v31 = vpop.f32.mrb[0].mxu1 }
 0x1a1   : > { %v11896_v33 = vadd.f32 %v1182_v31, %v497_v18  ;;  %v1184_v34 = vpop.f32.mrb[1].mxu1 }
 0x1a2   : > { %v11897_v35 = vadd.f32 %v1184_v34, %v499_v19  ;;  %v1186_v36 = vpop.f32.mrb[2].mxu1 }
 0x1a3   : > { %v1241_v37 = vadd.f32 %v11896_v33, %v1230_v30  ;;  %v11898_v38 = vadd.f32 %v1186_v36, %v501_v20  ;;  %v1188_v39 = vpop.f32.mrb[3].mxu1 }
 0x1a4   : > { %v1242_v40 = vadd.f32 %v11897_v35, %v1234_v32  ;;  %v11899_v41 = vadd.f32 %v1188_v39, %v503_v21  ;;  %v1221_v21 = vsub.s32 0, %v13880_v22 }
 0x1a5   : > { %v1257_v42 = vmax.f32 %v1241_v37, 0.0  ;;  %v1245_v43 = vadd.f32 %v11898_v38, %v1230_v30 }
 0x1a6   : > { %v1258_v44 = vmax.f32 %v1242_v40, 0.0  ;;  %v1246_v45 = vadd.f32 %v11899_v41, %v1234_v32 }
 0x1a7   : > { %v1261_v46 = vmax.f32 %v1245_v43, 0.0  ;;  %v1294_v47 = vrot.slane %v1257_v42, 1 }
 0x1a8   : > { %v1297_v48 = vrot.slane %v1258_v44, 1  ;;  %v1262_v49 = vmax.f32 %v1246_v45, 0.0  ;;  %v1192_v50 = vpop.f32.mrb[4].mxu1 }
 0x1a9   : > { %v1295_v51 = vrot.slane %v1261_v46, 1  ;;  %v11900_v52 = vadd.f32 %v1192_v50, %v507_v23  ;;  %v1194_v53 = vpop.f32.mrb[5].mxu1  ;;  %v1225_v23 = vsub.s32 1, %v13880_v22 }
 0x1aa   : > { %v1298_v54 = vrot.slane %v1262_v49, 1  ;;  %v11901_v55 = vadd.f32 %v1194_v53, %v509_v24  ;;  %v1196_v56 = vpop.f32.mrb[6].mxu1  ;;  %v1222_v24 = vrot.slane %v1217_v29, %v1221_v21 }
 0x1ab   : > { %v1249_v57 = vadd.f32 %v11900_v52, %v1230_v30  ;;  %v11902_v58 = vadd.f32 %v1196_v56, %v511_v25  ;;  %v1198_v59 = vpop.f32.mrb[7].mxu1  ;;  %v1296_v60 = vsel %vm1287_vm3, %v1294_v47, %v1295_v51  ;;  %v1226_v25 = vrot.slane %v1217_v29, %v1225_v23 }
 0x1ac   : > { %v1250_v61 = vadd.f32 %v11901_v55, %v1234_v32  ;;  %v11903_v62 = vadd.f32 %v1198_v59, %v513_v27  ;;  %v13892_v63 = vmax.f32 %v1257_v42, %v1296_v60  ;;  %v1299_v0 = vsel %vm1287_vm3, %v1297_v48, %v1298_v54 }
 0x1ad   : > { %v1265_v1 = vmax.f32 %v1249_v57, 0.0  ;;  %v13895_v2 = vadd.f32 %v11902_v58, %v1230_v30  ;;  %v13897_v4 = vmax.f32 %v1258_v44, %v1299_v0 }
 0x1ae   : > { %v1266_v5 = vmax.f32 %v1250_v61, 0.0  ;;  %v13899_v6 = vadd.f32 %v11903_v62, %v1234_v32 }
 0x1af   : > { %v1304_v7 = vrot.slane %v1265_v1, 1  ;;  %v1269_v8 = vmax.f32 %v13895_v2, 0.0 }
 0x1b0   : > { %v1306_v9 = vrot.slane %v1266_v5, 1  ;;  %v1270_v10 = vmax.f32 %v13899_v6, 0.0 }
 0x1b1   : > { %v13905_v11 = vrot.slane %v1269_v8, 1  ;;  %v1305_v12 = vsel %vm1287_vm3, %v1295_v51, %v1304_v7 }
 0x1b2   : > { %v13910_v13 = vrot.slane %v1270_v10, 1  ;;  %v13912_v14 = vmax.f32 %v1261_v46, %v1305_v12  ;;  %v1307_v15 = vsel %vm1287_vm3, %v1298_v54, %v1306_v9 }
 0x1b3   : > { %v1313_v16 = vsel %vm1287_vm3, %v1304_v7, %v13905_v11  ;;  %v13917_v17 = vmax.f32 %v1262_v49, %v1307_v15 }
 0x1b4   : > { %v13919_v18 = vmax.f32 %v1265_v1, %v1313_v16  ;;  %v1315_v19 = vsel %vm1287_vm3, %v1306_v9, %v13910_v13  ;;  %v13967_v2 = vmax.f32 %v1270_v10, %v13910_v13 }
 0x1b5   : > { %v13923_v20 = vmax.f32 %v1266_v5, %v1315_v19 }
 0x1bf   : > { %v1129_v27 = vpop.f32.mrb[0].mxu0 }
 0x1c0   : > { %v1239_v30 = vadd.f32 %v1222_v24, %v1129_v27  ;;  %v1131_v31 = vpop.f32.mrb[1].mxu0 }
 0x1c1   : > { %v1240_v32 = vadd.f32 %v1226_v25, %v1131_v31  ;;  %v1133_v33 = vpop.f32.mrb[2].mxu0  ;;  %v13954_v31 = vmax.f32 %v1269_v8, %v13905_v11  ;;  %v12185_v11 = vpack.i.bf16 %v13967_v2, %v13923_v20 }
 0x1c2   : > { %v1255_v34 = vmax.f32 %v1239_v30, 0.0  ;;  %v1243_v35 = vadd.f32 %v1222_v24, %v1133_v33  ;;  %v1135_v36 = vpop.f32.mrb[3].mxu0 }
 0x1c3   : > { %v1256_v37 = vmax.f32 %v1240_v32, 0.0  ;;  %v1244_v38 = vadd.f32 %v1226_v25, %v1135_v36 }
 0x1c4   : > { %v1259_v39 = vmax.f32 %v1243_v35, 0.0  ;;  %v1288_v41 = vrot.slane %v1255_v34, 1  ;;  %v12180_v35 = vpack.i.bf16 %v13917_v17, %v13897_v4 }
 0x1c5   : > { %v1260_v40 = vmax.f32 %v1244_v38, 0.0  ;;  %v1291_v43 = vrot.slane %v1256_v37, 1 }
 0x1c6   : > { %v1289_v42 = vrot.slane %v1259_v39, 1 }
 0x1c7   : > { %v1292_v44 = vrot.slane %v1260_v40, 1  ;;  %v1139_v45 = vpop.f32.mrb[4].mxu0 }
 0x1c8   : > { %v1247_v46 = vadd.f32 %v1222_v24, %v1139_v45  ;;  %v1141_v47 = vpop.f32.mrb[5].mxu0  ;;  %v1290_v29 = vsel %vm1287_vm3, %v1288_v41, %v1289_v42 }
 0x1c9   : > { %v1248_v48 = vadd.f32 %v1226_v25, %v1141_v47  ;;  %v1143_v49 = vpop.f32.mrb[6].mxu0  ;;  %v1293_v50 = vsel %vm1287_vm3, %v1291_v43, %v1292_v44  ;;  %v13933_v51 = vmax.f32 %v1255_v34, %v1290_v29 }
 0x1ca   : > { %v1263_v52 = vmax.f32 %v1247_v46, 0.0  ;;  %v1251_v53 = vadd.f32 %v1222_v24, %v1143_v49  ;;  %v1145_v54 = vpop.f32.mrb[7].mxu0  ;;  %v13935_v55 = vmax.f32 %v1256_v37, %v1293_v50 }
 0x1cb   : > { %v1264_v56 = vmax.f32 %v1248_v48, 0.0  ;;  %v1252_v57 = vadd.f32 %v1226_v25, %v1145_v54 }
 0x1cc   : > { %v1300_v58 = vrot.slane %v1263_v52, 1  ;;  %v1267_v59 = vmax.f32 %v1251_v53, 0.0  ;;  %v12150_v60 = vpack.i.bf16 %v13892_v63, %v13935_v55 }
 0x1cd   : > { %v1302_v61 = vrot.slane %v1264_v56, 1  ;;  %v1268_v62 = vmax.f32 %v1252_v57, 0.0 }
 0x1ce   : > { %v1308_v0 = vrot.slane %v1267_v59, 1  ;;  %12151 = vrot.lane.b32.xlu0 %v12150_v60, %s13606_s10  ;;  %v1301_v1 = vsel %vm1287_vm3, %v1289_v42, %v1300_v58 }
 0x1cf   : > { %v1310_v5 = vrot.slane %v1268_v62, 1  ;;  %v1336_v7 = vmax.f32 %v1259_v39, %v1301_v1  ;;  %v1303_v9 = vsel %vm1287_vm3, %v1292_v44, %v1302_v61  ;;  %v13607_v1 = vmov 65535  }
 0x1d0   : > { %v1337_v12 = vmax.f32 %v1260_v40, %v1303_v9  ;;  %v1309_v15 = vsel %vm1287_vm3, %v1300_v58, %v1308_v0  ;;  %v13958_v33 = vmax.f32 %v1267_v59, %v1308_v0 }
 0x1d1   : > { %v13942_v16 = vmax.f32 %v1268_v62, %v1310_v5  ;;  %v12155_v19 = vpack.i.bf16 %v1336_v7, %v13933_v51  ;;  %v1311_v24 = vsel %vm1287_vm3, %v1302_v61, %v1310_v5  ;;  %v13946_v25 = vmax.f32 %v1263_v52, %v1309_v15 }
 0x1d2   : > { %v12160_v27 = vpack.i.bf16 %v13912_v14, %v1337_v12  ;;  %v13949_v30 = vmax.f32 %v1264_v56, %v1311_v24  ;;  %v1462_v5 = vsel %vm1460_vm5, 4294967295, %v13607_v1  ;;  %v12301_v1 = vld [vmem:[%s17018_s4 + $0x520] ss:$16 sps:$4 sm:$0xff]  }
 0x1d3   : > { %12156 = vrot.lane.b32.xlu0 %v12155_v19, %s13606_s10  ;;  %v12165_v32 = vpack.i.bf16 %v13954_v31, %v13942_v16  ;;  %v12175_v8 = vpack.i.bf16 %v13958_v33, %v13946_v25 }
 0x1d4   : > { %12161 = vrot.lane.b32.xlu1 %v12160_v27, %s13606_s10  ;;  %v12170_v34 = vpack.i.bf16 %v13919_v18, %v13949_v30  ;;  %v1463_v27 = vsel %vm1461_vm6, %v1462_v5, 0  ;;  %v12304_v5 = vld [vmem:[%s17018_s4 + $0x528] ss:$16 sps:$4 sm:$0xff]  }
 0x1d7   : > { %12166 = vrot.lane.b32.xlu0 %v12165_v32, %s13606_s10 }
 0x1d8   : > { %12171 = vrot.lane.b32.xlu1 %v12170_v34, %s13606_s10 }
 0x1db   : > { %12181 = vrot.lane.b32.xlu0 %v12180_v35, %s13606_s10 }
 0x1dc   : > { %12176 = vrot.lane.b32.xlu1 %v12175_v8, %s13606_s10 }
 0x1e0   : > { %12186 = vrot.lane.b32.xlu1 %v12185_v11, %s13606_s10  ;;  %s16972_s10 = scalar_lea.hbm %s17022_s8, %s11738_s22 }
 0x240   : > { %v12152_v36 = vpop.permute.xlu0 %12151 }
 0x241   : > { %v12154_v37 = vunpack.i.h.bf16 %v12152_v36  ;;  %v12153_v38 = vunpack.i.l.bf16 %v12152_v36 }
 0x243   : > { %v1398_v40 = vsel %vm1396_vm4, %v12153_v38, %v12154_v37 }
 0x244   : > { %v1426_v29 = vmax.f32 %v13935_v55, %v1398_v40 }
 0x245   : > { %v12157_v39 = vpop.permute.xlu0 %12156 }
 0x246   : > { %v12159_v41 = vunpack.i.h.bf16 %v12157_v39  ;;  %v12158_v6 = vunpack.i.l.bf16 %v12157_v39  ;;  %v12162_v10 = vpop.permute.xlu1 %12161 }
 0x247   : > { %v12164_v13 = vunpack.i.h.bf16 %v12162_v10  ;;  %v12163_v42 = vunpack.i.l.bf16 %v12162_v10 }
 0x248   : > { %v1397_v43 = vsel %vm1396_vm4, %v12158_v6, %v12153_v38 }
 0x249   : > { %v1425_v44 = vmax.f32 %v13933_v51, %v1397_v43  ;;  %v1400_v45 = vsel %vm1396_vm4, %v12159_v41, %v12163_v42  ;;  %v1401_v46 = vsel %vm1396_vm4, %v12163_v42, %v12164_v13  ;;  %v12167_v47 = vpop.permute.xlu0 %12166  ;;  %v12270_v43 = vld [vmem:[%s17017_s3] sm:$0x7f]  }
 0x24a   : > { %v1429_v48 = vmax.f32 %v1336_v7, %v1400_v45  ;;  %v12169_v49 = vunpack.i.h.bf16 %v12167_v47  ;;  %v12168_v50 = vunpack.i.l.bf16 %v12167_v47  ;;  %v12172_v52 = vpop.permute.xlu1 %12171  ;;  %v1430_v53 = vmax.f32 %v1337_v12, %v1401_v46  ;;  %v12274_v45 = vld [vmem:[%s17018_s4 + $0x488] ss:$16 sps:$4 sm:$0xff]   ;;  %v12276_v46 = vld [vmem:[%s17018_s4 + $0x48c] ss:$16 sps:$4 sm:$0xff]   ;;  %v12279_v47 = vld [vmem:[%s17018_s4 + $0x4a4] ss:$16 sps:$4 sm:$0xff]  }
 0x24b   : > { %v12174_v54 = vunpack.i.h.bf16 %v12172_v52  ;;  %v12173_v56 = vunpack.i.l.bf16 %v12172_v52  ;;  %2851 = vmatprep.subr.bf16.mxu1 %v12276_v46  ;;  %v12288_v52 = vld [vmem:[%s17018_s4 + $0x4cc] ss:$16 sps:$4 sm:$0xff]  }
 0x24c   : > { %v1407_v57 = vsel %vm1396_vm4, %v12168_v50, %v12169_v49  ;;  %v1444_v58 = vpack.c.bf16 %v1430_v53, %v1426_v29  ;;  %v1443_v59 = vpack.c.bf16 %v1429_v48, %v1425_v44  ;;  %v12282_v29 = vld [vmem:[%s17018_s4 + $0x4ac] ss:$16 sps:$4 sm:$0xff]   ;;  %v12277_v48 = vld [vmem:[%s17018_s4 + $0x4a0] ss:$16 sps:$4 sm:$0xff]   ;;  %2852 = vmatpush1.bf16.msra.mxu1 %v12274_v45 }
 0x24d   : > { %v1404_v51 = vsel %vm1396_vm4, %v12173_v56, %v12174_v54  ;;  %v12182_v60 = vpop.permute.xlu0 %12181  ;;  %v1438_v61 = vmax.f32 %v13942_v16, %v1407_v57  ;;  %2853 = vmatprep.subr.bf16.mxu1 %v12282_v29  ;;  %v12283_v53 = vld [vmem:[%s17018_s4 + $0x4c0] ss:$16 sps:$4 sm:$0xff]   ;;  %v12294_v57 = vld [vmem:[%s17018_s4 + $0x4ec] ss:$16 sps:$4 sm:$0xff]  }
 0x24e   : > { %v1434_v55 = vmax.f32 %v13949_v30, %v1404_v51  ;;  %v12184_v62 = vunpack.i.h.bf16 %v12182_v60  ;;  %1476 = vmatprep.subr.bf16.mxu0 %v1444_v58  ;;  %v12177_v0 = vpop.permute.xlu1 %12176  ;;  %v12183_v7 = vunpack.i.l.bf16 %v12182_v60  ;;  %v12289_v58 = vld [vmem:[%s17018_s4 + $0x4e0] ss:$16 sps:$4 sm:$0xff]   ;;  %v12297_v51 = vld [vmem:[%s17018_s4 + $0x504] ss:$16 sps:$4 sm:$0xff]   ;;  %v12300_v60 = vld [vmem:[%s17018_s4 + $0x50c] ss:$16 sps:$4 sm:$0xff]  }
 0x24f   : > { %v12179_v9 = vunpack.i.h.bf16 %v12177_v0  ;;  %v12178_v12 = vunpack.i.l.bf16 %v12177_v0  ;;  %1477 = vmatpush1.bf16.msra.mxu0 %v1443_v59  ;;  %v12292_v59 = vld [vmem:[%s17018_s4 + $0x4e8] ss:$16 sps:$4 sm:$0xff]   ;;  %v12306_v0 = vld [vmem:[%s17018_s4 + $0x52c] ss:$16 sps:$4 sm:$0xff]  }
 0x250   : > { %v1402_v15 = vsel %vm1396_vm4, %v12164_v13, %v12184_v62  ;;  %v1432_v16 = vmax.f32 %v13917_v17, %v12184_v62  ;;  %v1448_v35 = vpack.c.bf16 %v1438_v61, %v1434_v55  ;;  %v1399_v8 = vsel %vm1396_vm4, %v12154_v37, %v12183_v7  ;;  %v12295_v61 = vld [vmem:[%s17018_s4 + $0x500] ss:$16 sps:$4 sm:$0xff]   ;;  %v12298_v55 = vld [vmem:[%s17018_s4 + $0x508] ss:$16 sps:$4 sm:$0xff]   ;;  %v12303_v62 = vld [vmem:[%s17018_s4 + $0x524] ss:$16 sps:$4 sm:$0xff]  }
 0x251   : > { %v1406_v19 = vsel %vm1396_vm4, %v12179_v9, %v12168_v50  ;;  %v1403_v24 = vsel %vm1396_vm4, %v12178_v12, %v12173_v56  ;;  %v1428_v11 = vmax.f32 %v13897_v4, %v12183_v7  ;;  %v1431_v39 = vmax.f32 %v13912_v14, %v1402_v15  ;;  %v12285_v50 = vld [vmem:[%s17018_s4 + $0x4c4] ss:$16 sps:$4 sm:$0xff]   ;;  %v12312_v9 = vld [vmem:[%s17018_s4 + $0x54c] ss:$16 sps:$4 sm:$0xff]   ;;  %v12307_v12 = vld [vmem:[%s17018_s4 + $0x540] ss:$16 sps:$4 sm:$0xff]  }
 0x252   : > { %v1437_v30 = vmax.f32 %v13958_v33, %v1406_v19  ;;  %v1433_v32 = vmax.f32 %v13946_v25, %v1403_v24  ;;  %v12187_v34 = vpop.permute.xlu1 %12186  ;;  %v1468_v41 = vand.u32 %v1463_v27, %v1448_v35  ;;  %v1427_v10 = vmax.f32 %v13892_v63, %v1399_v8  ;;  %v12291_v56 = vld [vmem:[%s17018_s4 + $0x4e4] ss:$16 sps:$4 sm:$0xff]   ;;  %v12310_v15 = vld [vmem:[%s17018_s4 + $0x548] ss:$16 sps:$4 sm:$0xff]   ;;  %v12318_v24 = vld [vmem:[%s17018_s4 + $0x56c] ss:$16 sps:$4 sm:$0xff]  }
 0x253   : > { %v12189_v36 = vunpack.i.h.bf16 %v12187_v34  ;;  %v12188_v38 = vunpack.i.l.bf16 %v12187_v34  ;;  %v1446_v14 = vpack.c.bf16 %v1432_v16, %v1428_v11  ;;  %v12309_v7 = vld [vmem:[%s17018_s4 + $0x544] ss:$16 sps:$4 sm:$0xff]   ;;  %v12316_v16 = vld [vmem:[%s17018_s4 + $0x568] ss:$16 sps:$4 sm:$0xff]   ;;  %v12319_v34 = vld [vmem:[%s17018_s4 + $0x580] ss:$16 sps:$4 sm:$0xff]  }
 0x254   : > { %v1447_v40 = vpack.c.bf16 %v1437_v30, %v1433_v32  ;;  %1478 = vmatprep.subr.bf16.mxu0 %v1468_v41  ;;  %v1445_v44 = vpack.c.bf16 %v1431_v39, %v1427_v10  ;;  %v12315_v19 = vld [vmem:[%s17018_s4 + $0x564] ss:$16 sps:$4 sm:$0xff]   ;;  %v12324_v32 = vld [vmem:[%s17018_s4 + $0x58c] ss:$16 sps:$4 sm:$0xff]   ;;  %v12322_v35 = vld [vmem:[%s17018_s4 + $0x588] ss:$16 sps:$4 sm:$0xff]  }
 0x255   : > { %v1408_v6 = vsel %vm1396_vm4, %v12169_v49, %v12189_v36  ;;  %v1440_v17 = vmax.f32 %v13967_v2, %v12189_v36  ;;  %v1405_v33 = vsel %vm1396_vm4, %v12174_v54, %v12188_v38  ;;  %v1436_v25 = vmax.f32 %v13923_v20, %v12188_v38  ;;  %v12280_v49 = vld [vmem:[%s17018_s4 + $0x4a8] ss:$16 sps:$4 sm:$0xff]   ;;  %v12321_v30 = vld [vmem:[%s17018_s4 + $0x584] ss:$16 sps:$4 sm:$0xff]   ;;  %v12330_v11 = vld [vmem:[%s17018_s4 + $0x5ac] ss:$16 sps:$4 sm:$0xff]  }
 0x256   : > { %v1439_v37 = vmax.f32 %v13954_v31, %v1408_v6  ;;  %v1435_v4 = vmax.f32 %v13919_v18, %v1405_v33  ;;  %v1465_v13 = vand.u32 %v1463_v27, %v1447_v40  ;;  %v12271_v18 = vld [vmem:[%s17018_s4 + $0x480] ss:$16 sps:$4 sm:$0xff]   ;;  %v12273_v31 = vld [vmem:[%s17018_s4 + $0x484] ss:$16 sps:$4 sm:$0xff]   ;;  %2854 = vmatpush1.bf16.msra.mxu1 %v12280_v49  ;;  %v12286_v54 = vld [vmem:[%s17018_s4 + $0x4c8] ss:$16 sps:$4 sm:$0xff]  }
 0x257   : > { %v1450_v42 = vpack.c.bf16 %v1440_v17, %v1436_v25  ;;  %2855 = vmatprep.subr.bf16.mxu1 %v12288_v52  ;;  %v12327_v8 = vld [vmem:[%s17018_s4 + $0x5a4] ss:$16 sps:$4 sm:$0xff]   ;;  %v12325_v36 = vld [vmem:[%s17018_s4 + $0x5a0] ss:$16 sps:$4 sm:$0xff]   ;;  %v12328_v38 = vld [vmem:[%s17018_s4 + $0x5a8] ss:$16 sps:$4 sm:$0xff]  }
 0x258   : > { %1479 = vmatpush1.bf16.msra.mxu0 %v1465_v13  ;;  %v1449_v2 = vpack.c.bf16 %v1439_v37, %v1435_v4  ;;  %v12333_v39 = vld [vmem:[%s17018_s4 + $0x5c4] ss:$16 sps:$4 sm:$0xff]   ;;  %v12336_v40 = vld [vmem:[%s17018_s4 + $0x5cc] ss:$16 sps:$4 sm:$0xff]   ;;  %v12331_v41 = vld [vmem:[%s17018_s4 + $0x5c0] ss:$16 sps:$4 sm:$0xff]  }
 0x259   : > { %1519 = vmatprep.subr.bf16.mxu0 %v1446_v14  ;;  %v1474_v20 = vand.u32 %v1463_v27, %v1450_v42  ;;  %v12334_v6 = vld [vmem:[%s17018_s4 + $0x5c8] ss:$16 sps:$4 sm:$0xff]   ;;  %v14136_v17 = vld [vmem:[#allocation3] sm:$0xff]  ;;  %v12342_v37 = vld [vmem:[%s17018_s4 + $0x5ec] ss:$16 sps:$4 sm:$0xff]  }
 0x25a   : > { %v1471_v63 = vand.u32 %v1463_v27, %v1449_v2  ;;  %2856 = vmatpush1.bf16.msra.mxu1 %v12286_v54  ;;  %v12313_v27 = vld [vmem:[%s17018_s4 + $0x560] ss:$16 sps:$4 sm:$0xff]   ;;  %1567 = vst.msk [vmem:[#allocation3 + $0x20] sm:$0xff] %vm1566_vm8, %v14136_v17  ;;  %1572 = vst.msk [vmem:[#allocation3 + $0x48] sm:$0xff] %vm1566_vm8, %v14136_v17  ;;  %v12339_v25 = vld [vmem:[%s17018_s4 + $0x5e4] ss:$16 sps:$4 sm:$0xff]  }
 0x25b   : > { %9929 = vmatmul.mubr.msk.bf16.vlgmr.msra.gmra.mrb[16].mxu0 %vm1456_vm7, %v12270_v43  ;;  %2857 = vmatprep.subr.bf16.mxu1 %v12294_v57  ;;  %v12337_v33 = vld [vmem:[%s17018_s4 + $0x5e0] ss:$16 sps:$4 sm:$0xff]   ;;  %v12340_v10 = vld [vmem:[%s17018_s4 + $0x5e8] ss:$16 sps:$4 sm:$0xff]   ;;  %v12345_v13 = vld [vmem:[%s17018_s4 + $0x604] ss:$16 sps:$4 sm:$0xff]  }
 0x25c   : > { %1520 = vmatpush1.bf16.msra.mxu0 %v1445_v44  ;;  %1551 = vmatprep.mubr.bf16.mxu0 %v13604_v3  ;;  %v12343_v4 = vld [vmem:[%s17018_s4 + $0x600] ss:$16 sps:$4 sm:$0xff]   ;;  %v12346_v42 = vld [vmem:[%s17018_s4 + $0x608] ss:$16 sps:$4 sm:$0xff]   ;;  %v12348_v14 = vld [vmem:[%s17018_s4 + $0x60c] ss:$16 sps:$4 sm:$0xff]  }
 0x25d   : > { %1521 = vmatprep.subr.bf16.mxu0 %v1474_v20  ;;  %v12351_v2 = vld [vmem:[%s17018_s4 + $0x624] ss:$16 sps:$4 sm:$0xff]   ;;  %v12352_v20 = vld [vmem:[%s17018_s4 + $0x628] ss:$16 sps:$4 sm:$0xff]   ;;  %1578 = vst.msk [vmem:[#allocation3 + $0x70] sm:$0x3] %vm1577_vm14, %v14136_v17 }
 0x25e   : > { %2858 = vmatpush1.bf16.msra.mxu1 %v12292_v59  ;;  %v12357_v49 = vld [vmem:[%s17018_s4 + $0x644] ss:$16 sps:$4 sm:$0xff]   ;;  %v12358_v52 = vld [vmem:[%s17018_s4 + $0x648] ss:$16 sps:$4 sm:$0xff]   ;;  %v12361_v59 = vld [vmem:[%s17018_s4 + $0x660] ss:$16 sps:$4 sm:$0xff]  }
 0x25f   : > { %2859 = vmatprep.subr.bf16.mxu1 %v12300_v60  ;;  %v12364_v60 = vld [vmem:[%s17018_s4 + $0x668] ss:$16 sps:$4 sm:$0xff]   ;;  %v12954_v17 = vld [vmem:[%s17018_s4 + $0xe2c] ss:$16 sps:$4 sm:$0xff]  }
 0x260   : > { %1522 = vmatpush1.bf16.msra.mxu0 %v1471_v63  ;;  %v12354_v63 = vld [vmem:[%s17018_s4 + $0x62c] ss:$16 sps:$4 sm:$0xff]  }
 0x261   : > { %2722 = vmatprep.subr.bf16.mxu0 %v12273_v31 }
 0x262   : > { %2860 = vmatpush1.bf16.msra.mxu1 %v12298_v55 }
 0x263   : > { %9930 = vmatmul.mubr.msk.bf16.vlgmr.msra.gmra.mrb[20].mxu0 %vm1456_vm7, %v12270_v43  ;;  %2861 = vmatprep.subr.bf16.mxu1 %v12306_v0  ;;  %v12349_v43 = vld [vmem:[%s17018_s4 + $0x620] ss:$16 sps:$4 sm:$0xff]  }
 0x264   : > { %2723 = vmatpush1.bf16.msra.mxu0 %v12271_v18 }
 0x265   : > { %2724 = vmatprep.subr.bf16.mxu0 %v12279_v47 }
 0x266   : > { %2862 = vmatpush1.bf16.msra.mxu1 %v12304_v5 }
 0x267   : > { %2863 = vmatprep.subr.bf16.mxu1 %v12312_v9  ;;  %v12369_v9 = vld [vmem:[%s17018_s4 + $0x684] ss:$16 sps:$4 sm:$0xff]  }
 0x268   : > { %2725 = vmatpush1.bf16.msra.mxu0 %v12277_v48  ;;  %v12355_v48 = vld [vmem:[%s17018_s4 + $0x640] ss:$16 sps:$4 sm:$0xff]  }
 0x269   : > { %2726 = vmatprep.subr.bf16.mxu0 %v12285_v50 }
 0x26a   : > { %2864 = vmatpush1.bf16.msra.mxu1 %v12310_v15  ;;  %v12372_v15 = vld [vmem:[%s17018_s4 + $0x68c] ss:$16 sps:$4 sm:$0xff]  }
 0x26b   : > { %2865 = vmatprep.subr.bf16.mxu1 %v12318_v24 }
 0x26c   : > { %2727 = vmatpush1.bf16.msra.mxu0 %v12283_v53  ;;  %v12360_v53 = vld [vmem:[%s17018_s4 + $0x64c] ss:$16 sps:$4 sm:$0xff]  }
 0x26d   : > { %2728 = vmatprep.subr.bf16.mxu0 %v12291_v56  ;;  %v12363_v56 = vld [vmem:[%s17018_s4 + $0x664] ss:$16 sps:$4 sm:$0xff]  }
 0x26e   : > { %2866 = vmatpush1.bf16.msra.mxu1 %v12316_v16 }
 0x26f   : > { %2867 = vmatprep.subr.bf16.mxu1 %v12324_v32 }
 0x270   : > { %2729 = vmatpush1.bf16.msra.mxu0 %v12289_v58  ;;  %v12366_v58 = vld [vmem:[%s17018_s4 + $0x66c] ss:$16 sps:$4 sm:$0xff]  }
 0x271   : > { %2730 = vmatprep.subr.bf16.mxu0 %v12297_v51 }
 0x272   : > { %2868 = vmatpush1.bf16.msra.mxu1 %v12322_v35 }
 0x273   : > { %2869 = vmatprep.subr.bf16.mxu1 %v12330_v11 }
 0x274   : > { %2731 = vmatpush1.bf16.msra.mxu0 %v12295_v61 }
 0x275   : > { %2732 = vmatprep.subr.bf16.mxu0 %v12303_v62 }
 0x276   : > { %2870 = vmatpush1.bf16.msra.mxu1 %v12328_v38 }
 0x277   : > { %2871 = vmatprep.subr.bf16.mxu1 %v12336_v40 }
 0x278   : > { %2733 = vmatpush1.bf16.msra.mxu0 %v12301_v1 }
 0x279   : > { %2734 = vmatprep.subr.bf16.mxu0 %v12309_v7 }
 0x27a   : > { %2872 = vmatpush1.bf16.msra.mxu1 %v12334_v6 }
 0x27b   : > { %2873 = vmatprep.subr.bf16.mxu1 %v12342_v37 }
 0x27c   : > { %2735 = vmatpush1.bf16.msra.mxu0 %v12307_v12 }
 0x27d   : > { %2736 = vmatprep.subr.bf16.mxu0 %v12315_v19 }
 0x27e   : > { %2874 = vmatpush1.bf16.msra.mxu1 %v12340_v10 }
 0x27f   : > { %2875 = vmatprep.subr.bf16.mxu1 %v12348_v14 }
 0x280   : > { %2737 = vmatpush1.bf16.msra.mxu0 %v12313_v27 }
 0x281   : > { %2738 = vmatprep.subr.bf16.mxu0 %v12321_v30 }
 0x282   : > { %2876 = vmatpush1.bf16.msra.mxu1 %v12346_v42 }
 0x283   : > { %2877 = vmatprep.subr.bf16.mxu1 %v12354_v63 }
 0x284   : > { %2739 = vmatpush1.bf16.msra.mxu0 %v12319_v34 }
 0x285   : > { %2740 = vmatprep.subr.bf16.mxu0 %v12327_v8 }
 0x286   : > { %2878 = vmatpush1.bf16.msra.mxu1 %v12352_v20 }
 0x287   : > { %2879 = vmatprep.subr.bf16.mxu1 %v12360_v53 }
 0x288   : > { %2741 = vmatpush1.bf16.msra.mxu0 %v12325_v36 }
 0x289   : > { %2742 = vmatprep.subr.bf16.mxu0 %v12333_v39 }
 0x28a   : > { %2880 = vmatpush1.bf16.msra.mxu1 %v12358_v52 }
 0x28b   : > { %2881 = vmatprep.subr.bf16.mxu1 %v12366_v58  ;;  %v12379_v58 = vld [vmem:[%s17018_s4 + $0x6c0] ss:$16 sps:$4 sm:$0xff]  }
 0x28c   : > { %2743 = vmatpush1.bf16.msra.mxu0 %v12331_v41 }
 0x28d   : > { %2744 = vmatprep.subr.bf16.mxu0 %v12339_v25 }
 0x28e   : > { %2882 = vmatpush1.bf16.msra.mxu1 %v12364_v60  ;;  %v12387_v60 = vld [vmem:[%s17018_s4 + $0x6e4] ss:$16 sps:$4 sm:$0xff]  }
 0x28f   : > { %2894 = vmatprep.subr.bf16.mxu1 %v12372_v15  ;;  %v12397_v15 = vld [vmem:[%s17018_s4 + $0x720] ss:$16 sps:$4 sm:$0xff]  }
 0x290   : > { %2745 = vmatpush1.bf16.msra.mxu0 %v12337_v33 }
 0x291   : > { %2746 = vmatprep.subr.bf16.mxu0 %v12345_v13 }
 0x294   : > { %2747 = vmatpush1.bf16.msra.mxu0 %v12343_v4 }
 0x295   : > { %2748 = vmatprep.subr.bf16.mxu0 %v12351_v2 }
 0x298   : > { %2749 = vmatpush1.bf16.msra.mxu0 %v12349_v43 }
 0x299   : > { %2750 = vmatprep.subr.bf16.mxu0 %v12357_v49  ;;  %v12373_v49 = vld [vmem:[%s17018_s4 + $0x6a0] ss:$16 sps:$4 sm:$0xff]  }
 0x29c   : > { %2751 = vmatpush1.bf16.msra.mxu0 %v12355_v48 }
 0x29d   : > { %2752 = vmatprep.subr.bf16.mxu0 %v12363_v56  ;;  %v12384_v56 = vld [vmem:[%s17018_s4 + $0x6cc] ss:$16 sps:$4 sm:$0xff]  }
 0x2a0   : > { %2753 = vmatpush1.bf16.msra.mxu0 %v12361_v59  ;;  %v12382_v59 = vld [vmem:[%s17018_s4 + $0x6c8] ss:$16 sps:$4 sm:$0xff]  }
 0x2a1   : > { %2765 = vmatprep.subr.bf16.mxu0 %v12369_v9  ;;  %v12399_v9 = vld [vmem:[%s17018_s4 + $0x724] ss:$16 sps:$4 sm:$0xff]  }
 0x32e   : > { %v1510_v44 = vpop.f32.mrb[16].mxu0 }
 0x32f   : > { %v1588_v18 = vrot.slane %v1510_v44, 6  ;;  %v1512_v31 = vpop.f32.mrb[17].mxu0 }
 0x330   : > { %v1589_v45 = vrot.slane %v1512_v31, 6  ;;  %v1514_v46 = vpop.f32.mrb[18].mxu0  ;;  %v12370_v31 = vld [vmem:[%s17018_s4 + $0x688] ss:$16 sps:$4 sm:$0xff]  }
 0x331   : > { %1600 = vrot.lane.b32.xlu0 %v1588_v18, %s13608_s25  ;;  %v1592_v47 = vrot.slane %v1514_v46, 6  ;;  %v1516_v29 = vpop.f32.mrb[19].mxu0  ;;  %v12375_v46 = vld [vmem:[%s17018_s4 + $0x6a4] ss:$16 sps:$4 sm:$0xff]  }
 0x332   : > { %1602 = vrot.lane.b32.xlu1 %v1589_v45, %s13608_s25  ;;  %v1594_v50 = vrot.slane %v1516_v29, 6 }
 0x333   : > { %v1593_v54 = vsel %vm1587_vm9, %v1588_v18, %v1592_v47  ;;  %v12367_v18 = vld [vmem:[%s17018_s4 + $0x680] ss:$16 sps:$4 sm:$0xff]   ;;  %v12378_v47 = vld [vmem:[%s17018_s4 + $0x6ac] ss:$16 sps:$4 sm:$0xff]  }
 0x334   : > { %v1595_v57 = vsel %vm1587_vm9, %v1589_v45, %v1594_v50  ;;  %v12376_v50 = vld [vmem:[%s17018_s4 + $0x6a8] ss:$16 sps:$4 sm:$0xff]  }
 0x335   : > { %1608 = vrot.lane.b32.xlu0 %v1593_v54, %s13608_s25  ;;  %v12381_v54 = vld [vmem:[%s17018_s4 + $0x6c4] ss:$16 sps:$4 sm:$0xff]  }
 0x336   : > { %1610 = vrot.lane.b32.xlu1 %v1595_v57, %s13608_s25  ;;  %v1553_v51 = vpop.f32.mrb[20].mxu0 }
 0x337   : > { %v1590_v61 = vrot.slane %v1553_v51, 6  ;;  %v1555_v55 = vpop.f32.mrb[21].mxu0 }
 0x338   : > { %v1591_v62 = vrot.slane %v1555_v55, 6  ;;  %v1557_v0 = vpop.f32.mrb[22].mxu0  ;;  %v12385_v55 = vld [vmem:[%s17018_s4 + $0x6e0] ss:$16 sps:$4 sm:$0xff]  }
 0x339   : > { %1604 = vrot.lane.b32.xlu0 %v1590_v61, %s13608_s25  ;;  %v1596_v1 = vrot.slane %v1557_v0, 6  ;;  %v1559_v5 = vpop.f32.mrb[23].mxu0  ;;  %v12393_v0 = vld [vmem:[%s17018_s4 + $0x704] ss:$16 sps:$4 sm:$0xff]  }
 0x33a   : > { %1606 = vrot.lane.b32.xlu1 %v1591_v62, %s13608_s25  ;;  %v1598_v7 = vrot.slane %v1559_v5, 6  ;;  %v12391_v5 = vld [vmem:[%s17018_s4 + $0x700] ss:$16 sps:$4 sm:$0xff]  }
 0x33b   : > { %v1597_v12 = vsel %vm1587_vm9, %v1590_v61, %v1596_v1  ;;  %v12390_v61 = vld [vmem:[%s17018_s4 + $0x6ec] ss:$16 sps:$4 sm:$0xff]  }
 0x33c   : > { %v1599_v19 = vsel %vm1587_vm9, %v1591_v62, %v1598_v7  ;;  %v12388_v62 = vld [vmem:[%s17018_s4 + $0x6e8] ss:$16 sps:$4 sm:$0xff]   ;;  %v12396_v1 = vld [vmem:[%s17018_s4 + $0x70c] ss:$16 sps:$4 sm:$0xff]  }
 0x33d   : > { %1612 = vrot.lane.b32.xlu0 %v1597_v12, %s13608_s25  ;;  %v12394_v7 = vld [vmem:[%s17018_s4 + $0x708] ss:$16 sps:$4 sm:$0xff]   ;;  %v12402_v12 = vld [vmem:[%s17018_s4 + $0x72c] ss:$16 sps:$4 sm:$0xff]  }
 0x33e   : > { %1614 = vrot.lane.b32.xlu1 %v1599_v19, %s13608_s25  ;;  %v12400_v19 = vld [vmem:[%s17018_s4 + $0x728] ss:$16 sps:$4 sm:$0xff]   ;;  %s296_s25 = sand.u32 1, %s13593_s28  }
 0x33f   : > { %s297_s23 = scalar_lea.vmem [#allocation4], %s296_s25  ;;  %s9763_s9 = scalar_lea.sflag [#allocation5], %s296_s25 }
 0x340   : > { %s9775_s19 = sshll.u32 %s297_s23, 4  ;;  %s16974_s19 = int_to_ptr.vmem [resolvable:$true] %s9775_s19 }
 0x341   : > { %s13539_s12 = scalar_lea.vmem %s16974_s19, 16  ;;  %p13546_p0 = scmp.lt.s32.totalorder %s16974_s19, %s13544_s17 }
 0x342   : > { %p13540_p11 = scmp.ne.s32.totalorder %s16974_s19, %s13539_s12  ;;  %p13547_p1 = scmp.lt.s32.totalorder %s13545_s18, %s13539_s12 }
 0x344   : > { %p13541_p12 = pnand %p13540_p11, %p13694_p5  ;;  %p13548_p2 = por %p13547_p1, %p13546_p0 }
 0x346   : > { %p13542_p13 = pneg %p13541_p12 }
 0x348   : > { %p13549_p3 = pnand %p13548_p2, %p13542_p13 }
 0x3a3   : > { %v1601_v24 = vpop.permute.xlu0 %1600 }
 0x3a4   : > { %1631 = vst.msk [vmem:[#allocation3] sm:$0xfc] %vm1630_vm10, %v1601_v24  ;;  %v1603_v27 = vpop.permute.xlu1 %1602 }
 0x3a5   : > { %v1616_v16 = vsel %vm1566_vm8, %v1601_v24, %v1603_v27  ;;  %v12405_v24 = vld [vmem:[%s17018_s4 + $0x744] ss:$16 sps:$4 sm:$0xff]  }
 0x3a6   : > { %1632 = vst [vmem:[#allocation3 + $0x8] sm:$0xfc] %v1616_v16  ;;  %v12403_v16 = vld [vmem:[%s17018_s4 + $0x740] ss:$16 sps:$4 sm:$0xff]  }
 0x3a7   : > { %v1609_v30 = vpop.permute.xlu0 %1608 }
 0x3a8   : > { %1637 = vst.msk [vmem:[#allocation3 + $0x28] sm:$0xff] %vm1636_vm11, %v1609_v30  ;;  %v1611_v32 = vpop.permute.xlu1 %1610 }
 0x3a9   : > { %v1619_v34 = vsel %vm1566_vm8, %v1609_v30, %v1611_v32  ;;  %v12406_v30 = vld [vmem:[%s17018_s4 + $0x748] ss:$16 sps:$4 sm:$0xff]  }
 0x3aa   : > { %1638 = vst [vmem:[#allocation3 + $0x30] sm:$0xff] %v1619_v34  ;;  %v12414_v34 = vld [vmem:[%s17018_s4 + $0x76c] ss:$16 sps:$4 sm:$0xff]  }
 0x3ab   : > { %v1605_v35 = vpop.permute.xlu0 %1604  ;;  %v1800_v39 = vld [vmem:[#allocation3] sm:$0xfe] }
 0x3ac   : > { %v1617_v8 = vsel %vm1566_vm8, %v1603_v27, %v1605_v35  ;;  %v1607_v11 = vpop.permute.xlu1 %1606  ;;  %v12408_v27 = vld [vmem:[%s17018_s4 + $0x74c] ss:$16 sps:$4 sm:$0xff]  }
 0x3ad   : > { %1633 = vst [vmem:[#allocation3 + $0x10] sm:$0xfc] %v1617_v8  ;;  %v1618_v36 = vsel %vm1566_vm8, %v1605_v35, %v1607_v11  ;;  %v1801_v25 = vld [vmem:[#allocation3 + $0x8] sm:$0xfe]  ;;  %v12409_v35 = vld [vmem:[%s17018_s4 + $0x760] ss:$16 sps:$4 sm:$0xff]  }
 0x3ae   : > { %1635 = vst.msk [vmem:[#allocation3 + $0x18] sm:$0xfc] %vm1634_vm12, %v1618_v36  ;;  %v12412_v8 = vld [vmem:[%s17018_s4 + $0x768] ss:$16 sps:$4 sm:$0xff]   ;;  %v12417_v11 = vld [vmem:[%s17018_s4 + $0x784] ss:$16 sps:$4 sm:$0xff]  }
 0x3af   : > { %v1613_v38 = vpop.permute.xlu0 %1612  ;;  %v1805_v40 = vld [vmem:[#allocation3 + $0x28] sm:$0x7f] }
 0x3b0   : > { %v1620_v41 = vsel %vm1566_vm8, %v1611_v32, %v1613_v38  ;;  %v1810_v6 = vpack.c.bf16 %v1805_v40, %v1800_v39  ;;  %v1615_v33 = vpop.permute.xlu1 %1614  ;;  %v12411_v32 = vld [vmem:[%s17018_s4 + $0x764] ss:$16 sps:$4 sm:$0xff]   ;;  %v12420_v36 = vld [vmem:[%s17018_s4 + $0x78c] ss:$16 sps:$4 sm:$0xff]   ;;  %v12418_v39 = vld [vmem:[%s17018_s4 + $0x788] ss:$16 sps:$4 sm:$0xff]  }
 0x3b1   : > { %1639 = vst [vmem:[#allocation3 + $0x38] sm:$0xff] %v1620_v41  ;;  %v1806_v10 = vld [vmem:[#allocation3 + $0x30] sm:$0x7f]  ;;  %v1621_v37 = vsel %vm1566_vm8, %v1613_v38, %v1615_v33  ;;  %v12426_v41 = vld [vmem:[%s17018_s4 + $0x7ac] ss:$16 sps:$4 sm:$0xff]  }
 0x3b2   : > { %v1811_v4 = vpack.c.bf16 %v1806_v10, %v1801_v25  ;;  %v1963_v13 = vshll.u32 %v1810_v6, 16  ;;  %1640 = vst.msk [vmem:[#allocation3 + $0x40] sm:$0xff] %vm1396_vm4, %v1621_v37  ;;  %v1961_v44 = vshrl.u32 %v1810_v6, 16  ;;  %v12415_v38 = vld [vmem:[%s17018_s4 + $0x780] ss:$16 sps:$4 sm:$0xff]  }
 0x3b3   : > { %v12423_v40 = vld [vmem:[%s17018_s4 + $0x7a4] ss:$16 sps:$4 sm:$0xff]   ;;  %v12421_v6 = vld [vmem:[%s17018_s4 + $0x7a0] ss:$16 sps:$4 sm:$0xff]   ;;  %v12424_v33 = vld [vmem:[%s17018_s4 + $0x7a8] ss:$16 sps:$4 sm:$0xff]  }
 0x3b4   : > { %v1970_v42 = vshll.u32 %v1811_v4, 16  ;;  %v1965_v14 = vrot.slane %v1963_v13, 1  ;;  %v1968_v43 = vshrl.u32 %v1811_v4, 16  ;;  %v12429_v25 = vld [vmem:[%s17018_s4 + $0x7c4] ss:$16 sps:$4 sm:$0xff]  }
 0x3b5   : > { %v1803_v20 = vld [vmem:[#allocation3 + $0x18] sm:$0xfe]  ;;  %v12427_v37 = vld [vmem:[%s17018_s4 + $0x7c0] ss:$16 sps:$4 sm:$0xff]   ;;  %v12435_v13 = vld [vmem:[%s17018_s4 + $0x7e4] ss:$16 sps:$4 sm:$0xff]  }
 0x3b6   : > { %v1972_v2 = vrot.slane %v1970_v42, 1  ;;  %v1966_v45 = vor.u32 %v1965_v14, %v1961_v44  ;;  %v12432_v10 = vld [vmem:[%s17018_s4 + $0x7cc] ss:$16 sps:$4 sm:$0xff]   ;;  %v12430_v4 = vld [vmem:[%s17018_s4 + $0x7c8] ss:$16 sps:$4 sm:$0xff]  }
 0x3b7   : > { %v12438_v42 = vld [vmem:[%s17018_s4 + $0x7ec] ss:$16 sps:$4 sm:$0xff]   ;;  %v12433_v14 = vld [vmem:[%s17018_s4 + $0x7e0] ss:$16 sps:$4 sm:$0xff]  }
 0x3b8   : > { %v1973_v63 = vor.u32 %v1972_v2, %v1968_v43  ;;  %v12436_v43 = vld [vmem:[%s17018_s4 + $0x7e8] ss:$16 sps:$4 sm:$0xff]   ;;  %v12441_v2 = vld [vmem:[%s17018_s4 + $0x804] ss:$16 sps:$4 sm:$0xff]   ;;  %v12444_v44 = vld [vmem:[%s17018_s4 + $0x80c] ss:$16 sps:$4 sm:$0xff]  }
 0x3b9   : > { %v1808_v29 = vld [vmem:[#allocation3 + $0x40] sm:$0x7f] }
 0x3ba   : > { %2754 = vmatprep.mubr.bf16.mxu0 %v1973_v63  ;;  %2883 = vmatprep.mubr.bf16.mxu1 %v1973_v63  ;;  %v1813_v48 = vpack.c.bf16 %v1808_v29, %v1803_v20  ;;  %v12439_v20 = vld [vmem:[%s17018_s4 + $0x800] ss:$16 sps:$4 sm:$0xff]   ;;  %v12442_v63 = vld [vmem:[%s17018_s4 + $0x808] ss:$16 sps:$4 sm:$0xff]  }
 0x3bb   : > { %2755 = vmatmul.mubr.bf16.vlgmr.msra.gmra.mrb[24].mxu0 %v1966_v45  ;;  %2884 = vmatmul.mubr.bf16.vlgmr.msra.gmra.mrb[8].mxu1 %v1966_v45  ;;  %v1807_v45 = vld [vmem:[#allocation3 + $0x38] sm:$0x7f]  ;;  %v1802_v29 = vld [vmem:[#allocation3 + $0x10] sm:$0xfe] }
 0x3bc   : > { %2766 = vmatpush1.bf16.msra.mxu0 %v12367_v18  ;;  %2895 = vmatpush1.bf16.msra.mxu1 %v12370_v31  ;;  %v1982_v52 = vshrl.u32 %v1813_v48, 16  ;;  %v1984_v53 = vshll.u32 %v1813_v48, 16  ;;  %v12447_v18 = vld [vmem:[%s17018_s4 + $0x824] ss:$16 sps:$4 sm:$0xff]   ;;  %v12450_v31 = vld [vmem:[%s17018_s4 + $0x82c] ss:$16 sps:$4 sm:$0xff]  }
 0x3bd   : > { %2767 = vmatprep.subr.bf16.mxu0 %v12375_v46  ;;  %2896 = vmatprep.subr.bf16.mxu1 %v12378_v47  ;;  %v12445_v46 = vld [vmem:[%s17018_s4 + $0x820] ss:$16 sps:$4 sm:$0xff]   ;;  %v12448_v47 = vld [vmem:[%s17018_s4 + $0x828] ss:$16 sps:$4 sm:$0xff]   ;;  %v12453_v48 = vld [vmem:[%s17018_s4 + $0x844] ss:$16 sps:$4 sm:$0xff]  }
 0x3be   : > { %v1986_v57 = vrot.slane %v1984_v53, 1  ;;  %v12454_v53 = vld [vmem:[%s17018_s4 + $0x848] ss:$16 sps:$4 sm:$0xff]  }
 0x3c0   : > { %2768 = vmatpush1.bf16.msra.mxu0 %v12373_v49  ;;  %2897 = vmatpush1.bf16.msra.mxu1 %v12376_v50  ;;  %v1987_v51 = vor.u32 %v1986_v57, %v1982_v52  ;;  %v12456_v49 = vld [vmem:[%s17018_s4 + $0x84c] ss:$16 sps:$4 sm:$0xff]   ;;  %v1812_v50 = vpack.c.bf16 %v1807_v45, %v1802_v29  ;;  %v12451_v52 = vld [vmem:[%s17018_s4 + $0x840] ss:$16 sps:$4 sm:$0xff]  }
 0x3c1   : > { %2769 = vmatprep.subr.bf16.mxu0 %v12381_v54  ;;  %2898 = vmatprep.subr.bf16.mxu1 %v12384_v56  ;;  %v12459_v54 = vld [vmem:[%s17018_s4 + $0x864] ss:$16 sps:$4 sm:$0xff]   ;;  %v12462_v56 = vld [vmem:[%s17018_s4 + $0x86c] ss:$16 sps:$4 sm:$0xff]   ;;  %v12505_v45 = vld [vmem:[%s17018_s4 + $0x60] ss:$16 sps:$4 sm:$0xff]  }
 0x3c2   : > { %2797 = vmatprep.mubr.bf16.mxu0 %v1987_v51  ;;  %2926 = vmatprep.mubr.bf16.mxu1 %v1987_v51  ;;  %v1977_v57 = vshll.u32 %v1812_v50, 16  ;;  %v12516_v29 = vld [vmem:[%s17018_s4 + $0x8c] ss:$16 sps:$4 sm:$0xff]  }
 0x3c4   : > { %2770 = vmatpush1.bf16.msra.mxu0 %v12379_v58  ;;  %2899 = vmatpush1.bf16.msra.mxu1 %v12382_v59  ;;  %v12457_v58 = vld [vmem:[%s17018_s4 + $0x860] ss:$16 sps:$4 sm:$0xff]   ;;  %v12460_v59 = vld [vmem:[%s17018_s4 + $0x868] ss:$16 sps:$4 sm:$0xff]   ;;  %v1979_v51 = vrot.slane %v1977_v57, 1 }
 0x3c5   : > { %2771 = vmatprep.subr.bf16.mxu0 %v12387_v60  ;;  %2900 = vmatprep.subr.bf16.mxu1 %v12390_v61  ;;  %v12465_v60 = vld [vmem:[%s17018_s4 + $0x884] ss:$16 sps:$4 sm:$0xff]   ;;  %v12468_v61 = vld [vmem:[%s17018_s4 + $0x88c] ss:$16 sps:$4 sm:$0xff]  }
 0x3c6   : > { %v12528_v57 = vld [vmem:[%s17018_s4 + $0xcc] ss:$16 sps:$4 sm:$0xff]  }
 0x3c8   : > { %2772 = vmatpush1.bf16.msra.mxu0 %v12385_v55  ;;  %2901 = vmatpush1.bf16.msra.mxu1 %v12388_v62  ;;  %v1975_v55 = vshrl.u32 %v1812_v50, 16  ;;  %v12463_v62 = vld [vmem:[%s17018_s4 + $0x880] ss:$16 sps:$4 sm:$0xff]   ;;  %v12519_v50 = vld [vmem:[%s17018_s4 + $0xa4] ss:$16 sps:$4 sm:$0xff]  }
 0x3c9   : > { %2773 = vmatprep.subr.bf16.mxu0 %v12393_v0  ;;  %2902 = vmatprep.subr.bf16.mxu1 %v12396_v1  ;;  %v12466_v0 = vld [vmem:[%s17018_s4 + $0x888] ss:$16 sps:$4 sm:$0xff]   ;;  %v1804_v1 = vld [vmem:[#allocation3 + $0x20] sm:$0xfe] }
 0x3cc   : > { %2774 = vmatpush1.bf16.msra.mxu0 %v12391_v5  ;;  %2903 = vmatpush1.bf16.msra.mxu1 %v12394_v7  ;;  %v1809_v5 = vld [vmem:[#allocation3 + $0x48] sm:$0x7f]  ;;  %v1980_v7 = vor.u32 %v1979_v51, %v1975_v55  ;;  %v12531_v51 = vld [vmem:[%s17018_s4 + $0xe4] ss:$16 sps:$4 sm:$0xff]  }
 0x3cd   : > { %2775 = vmatprep.subr.bf16.mxu0 %v12399_v9  ;;  %2904 = vmatprep.subr.bf16.mxu1 %v12402_v12  ;;  %v12471_v9 = vld [vmem:[%s17018_s4 + $0x8a4] ss:$16 sps:$4 sm:$0xff]   ;;  %v12474_v12 = vld [vmem:[%s17018_s4 + $0x8ac] ss:$16 sps:$4 sm:$0xff]   ;;  %v12532_v55 = vld [vmem:[%s17018_s4 + $0xe8] ss:$16 sps:$4 sm:$0xff]  }
 0x3d0   : > { %2776 = vmatpush1.bf16.msra.mxu0 %v12397_v15  ;;  %2905 = vmatpush1.bf16.msra.mxu1 %v12400_v19  ;;  %v1814_v15 = vpack.c.bf16 %v1809_v5, %v1804_v1  ;;  %v12469_v19 = vld [vmem:[%s17018_s4 + $0x8a0] ss:$16 sps:$4 sm:$0xff]   ;;  %v12538_v5 = vld [vmem:[%s17018_s4 + $0x108] ss:$16 sps:$4 sm:$0xff]  }
 0x3d1   : > { %2777 = vmatprep.subr.bf16.mxu0 %v12405_v24  ;;  %2906 = vmatprep.subr.bf16.mxu1 %v12408_v27  ;;  %v12472_v24 = vld [vmem:[%s17018_s4 + $0x8a8] ss:$16 sps:$4 sm:$0xff]   ;;  %v12477_v27 = vld [vmem:[%s17018_s4 + $0x8c4] ss:$16 sps:$4 sm:$0xff]   ;;  %v12535_v1 = vld [vmem:[%s17018_s4 + $0x100] ss:$16 sps:$4 sm:$0xff]  }
 0x3d4   : > { %2778 = vmatpush1.bf16.msra.mxu0 %v12403_v16  ;;  %2907 = vmatpush1.bf16.msra.mxu1 %v12406_v30  ;;  %v12480_v16 = vld [vmem:[%s17018_s4 + $0x8cc] ss:$16 sps:$4 sm:$0xff]   ;;  %v1991_v30 = vshll.u32 %v1814_v15, 16 }
 0x3d5   : > { %2779 = vmatprep.subr.bf16.mxu0 %v12411_v32  ;;  %2908 = vmatprep.subr.bf16.mxu1 %v12414_v34  ;;  %v12475_v32 = vld [vmem:[%s17018_s4 + $0x8c0] ss:$16 sps:$4 sm:$0xff]   ;;  %v12478_v34 = vld [vmem:[%s17018_s4 + $0x8c8] ss:$16 sps:$4 sm:$0xff]  }
 0x3d8   : > { %2780 = vmatpush1.bf16.msra.mxu0 %v12409_v35  ;;  %2909 = vmatpush1.bf16.msra.mxu1 %v12412_v8  ;;  %v12483_v35 = vld [vmem:[%s17018_s4 + $0x8e4] ss:$16 sps:$4 sm:$0xff]   ;;  %v12486_v8 = vld [vmem:[%s17018_s4 + $0x8ec] ss:$16 sps:$4 sm:$0xff]  }
 0x3d9   : > { %2781 = vmatprep.subr.bf16.mxu0 %v12417_v11  ;;  %2910 = vmatprep.subr.bf16.mxu1 %v12420_v36  ;;  %v1989_v11 = vshrl.u32 %v1814_v15, 16  ;;  %v1993_v36 = vrot.slane %v1991_v30, 1  ;;  %v12544_v15 = vld [vmem:[%s17018_s4 + $0x128] ss:$16 sps:$4 sm:$0xff]   ;;  %v12555_v30 = vld [vmem:[%s17018_s4 + $0x164] ss:$16 sps:$4 sm:$0xff]  }
 0x3dc   : > { %2782 = vmatpush1.bf16.msra.mxu0 %v12415_v38  ;;  %2911 = vmatpush1.bf16.msra.mxu1 %v12418_v39  ;;  %v12481_v38 = vld [vmem:[%s17018_s4 + $0x8e0] ss:$16 sps:$4 sm:$0xff]   ;;  %v12484_v39 = vld [vmem:[%s17018_s4 + $0x8e8] ss:$16 sps:$4 sm:$0xff]  }
 0x3dd   : > { %2783 = vmatprep.subr.bf16.mxu0 %v12423_v40  ;;  %2912 = vmatprep.subr.bf16.mxu1 %v12426_v41  ;;  %v12489_v40 = vld [vmem:[%s17018_s4 + $0x4] ss:$16 sps:$4 sm:$0xff]   ;;  %v12492_v41 = vld [vmem:[%s17018_s4 + $0xc] ss:$16 sps:$4 sm:$0xff]  }
 0x3e0   : > { %2784 = vmatpush1.bf16.msra.mxu0 %v12421_v6  ;;  %2913 = vmatpush1.bf16.msra.mxu1 %v12424_v33  ;;  %v1994_v6 = vor.u32 %v1993_v36, %v1989_v11  ;;  %v1647_v33 = vld [vmem:[#allocation3 + $0x30] sm:$0x3f]  ;;  %v12564_v11 = vld [vmem:[%s17018_s4 + $0x18c] ss:$16 sps:$4 sm:$0xff]  }
 0x3e1   : > { %2785 = vmatprep.subr.bf16.mxu0 %v12429_v25  ;;  %2914 = vmatprep.subr.bf16.mxu1 %v12432_v10  ;;  %v12487_v25 = vld [vmem:[%s17018_s4] ss:$16 sps:$4 sm:$0xff]   ;;  %v12490_v10 = vld [vmem:[%s17018_s4 + $0x8] ss:$16 sps:$4 sm:$0xff]  }
 0x3e2   : > { %v12559_v36 = vld [vmem:[%s17018_s4 + $0x180] ss:$16 sps:$4 sm:$0xff]  }
 0x3e4   : > { %2786 = vmatpush1.bf16.msra.mxu0 %v12427_v37  ;;  %2915 = vmatpush1.bf16.msra.mxu1 %v12430_v4  ;;  %v1642_v37 = vld [vmem:[#allocation3 + $0x8] sm:$0xff] }
 0x3e5   : > { %2787 = vmatprep.subr.bf16.mxu0 %v12435_v13  ;;  %2916 = vmatprep.subr.bf16.mxu1 %v12438_v42  ;;  %v1652_v4 = vpack.c.bf16 %v1647_v33, %v1642_v37  ;;  %v12495_v13 = vld [vmem:[%s17018_s4 + $0x24] ss:$16 sps:$4 sm:$0xff]   ;;  %v12498_v42 = vld [vmem:[%s17018_s4 + $0x2c] ss:$16 sps:$4 sm:$0xff]   ;;  %v12574_v37 = vld [vmem:[%s17018_s4 + $0x1c8] ss:$16 sps:$4 sm:$0xff]  }
 0x3e6   : > { %v12573_v33 = vld [vmem:[%s17018_s4 + $0x1c4] ss:$16 sps:$4 sm:$0xff]  }
 0x3e8   : > { %2788 = vmatpush1.bf16.msra.mxu0 %v12433_v14  ;;  %2917 = vmatpush1.bf16.msra.mxu1 %v12436_v43  ;;  %v12493_v14 = vld [vmem:[%s17018_s4 + $0x20] ss:$16 sps:$4 sm:$0xff]   ;;  %v12496_v43 = vld [vmem:[%s17018_s4 + $0x28] ss:$16 sps:$4 sm:$0xff]  }
 0x3e9   : > { %2789 = vmatprep.subr.bf16.mxu0 %v12441_v2  ;;  %2918 = vmatprep.subr.bf16.mxu1 %v12444_v44  ;;  %v12501_v2 = vld [vmem:[%s17018_s4 + $0x44] ss:$16 sps:$4 sm:$0xff]   ;;  %v12504_v44 = vld [vmem:[%s17018_s4 + $0x4c] ss:$16 sps:$4 sm:$0xff]  }
 0x3ec   : > { %2790 = vmatpush1.bf16.msra.mxu0 %v12439_v20  ;;  %2919 = vmatpush1.bf16.msra.mxu1 %v12442_v63  ;;  %v12499_v20 = vld [vmem:[%s17018_s4 + $0x40] ss:$16 sps:$4 sm:$0xff]   ;;  %v12502_v63 = vld [vmem:[%s17018_s4 + $0x48] ss:$16 sps:$4 sm:$0xff]  }
 0x3ed   : > { %2791 = vmatprep.subr.bf16.mxu0 %v12447_v18  ;;  %2920 = vmatprep.subr.bf16.mxu1 %v12450_v31  ;;  %v12507_v18 = vld [vmem:[%s17018_s4 + $0x64] ss:$16 sps:$4 sm:$0xff]   ;;  %v12510_v31 = vld [vmem:[%s17018_s4 + $0x6c] ss:$16 sps:$4 sm:$0xff]  }
 0x3f0   : > { %2792 = vmatpush1.bf16.msra.mxu0 %v12445_v46  ;;  %2921 = vmatpush1.bf16.msra.mxu1 %v12448_v47  ;;  %v12508_v46 = vld [vmem:[%s17018_s4 + $0x68] ss:$16 sps:$4 sm:$0xff]   ;;  %v12513_v47 = vld [vmem:[%s17018_s4 + $0x84] ss:$16 sps:$4 sm:$0xff]  }
 0x3f1   : > { %2793 = vmatprep.subr.bf16.mxu0 %v12453_v48  ;;  %2922 = vmatprep.subr.bf16.mxu1 %v12456_v49  ;;  %v12511_v48 = vld [vmem:[%s17018_s4 + $0x80] ss:$16 sps:$4 sm:$0xff]   ;;  %v12514_v49 = vld [vmem:[%s17018_s4 + $0x88] ss:$16 sps:$4 sm:$0xff]  }
 0x3f4   : > { %2794 = vmatpush1.bf16.msra.mxu0 %v12451_v52  ;;  %2923 = vmatpush1.bf16.msra.mxu1 %v12454_v53  ;;  %v12522_v52 = vld [vmem:[%s17018_s4 + $0xac] ss:$16 sps:$4 sm:$0xff]   ;;  %v12517_v53 = vld [vmem:[%s17018_s4 + $0xa0] ss:$16 sps:$4 sm:$0xff]  }
 0x3f5   : > { %2795 = vmatprep.subr.bf16.mxu0 %v12459_v54  ;;  %2924 = vmatprep.subr.bf16.mxu1 %v12462_v56  ;;  %v12520_v54 = vld [vmem:[%s17018_s4 + $0xa8] ss:$16 sps:$4 sm:$0xff]   ;;  %v12525_v56 = vld [vmem:[%s17018_s4 + $0xc4] ss:$16 sps:$4 sm:$0xff]  }
 0x3f8   : > { %2796 = vmatpush1.bf16.msra.mxu0 %v12457_v58  ;;  %2925 = vmatpush1.bf16.msra.mxu1 %v12460_v59  ;;  %v12523_v58 = vld [vmem:[%s17018_s4 + $0xc0] ss:$16 sps:$4 sm:$0xff]   ;;  %v12526_v59 = vld [vmem:[%s17018_s4 + $0xc8] ss:$16 sps:$4 sm:$0xff]  }
 0x3f9   : > { %2808 = vmatprep.subr.bf16.mxu0 %v12465_v60  ;;  %2937 = vmatprep.subr.bf16.mxu1 %v12468_v61  ;;  %v12534_v60 = vld [vmem:[%s17018_s4 + $0xec] ss:$16 sps:$4 sm:$0xff]   ;;  %v12529_v61 = vld [vmem:[%s17018_s4 + $0xe0] ss:$16 sps:$4 sm:$0xff]  }
 0x3fb   : > { %2798 = vmatmul.mubr.bf16.vlgmr.msra.gmra.mrb[24].mxu0 %v1980_v7  ;;  %2927 = vmatmul.mubr.bf16.vlgmr.msra.gmra.mrb[8].mxu1 %v1980_v7  ;;  %v12543_v7 = vld [vmem:[%s17018_s4 + $0x124] ss:$16 sps:$4 sm:$0xff]  }
 0x3fc   : > { %2809 = vmatpush1.bf16.msra.mxu0 %v12463_v62  ;;  %2938 = vmatpush1.bf16.msra.mxu1 %v12466_v0  ;;  %v12537_v62 = vld [vmem:[%s17018_s4 + $0x104] ss:$16 sps:$4 sm:$0xff]   ;;  %v12540_v0 = vld [vmem:[%s17018_s4 + $0x10c] ss:$16 sps:$4 sm:$0xff]  }
 0x3fd   : > { %2810 = vmatprep.subr.bf16.mxu0 %v12471_v9  ;;  %2939 = vmatprep.subr.bf16.mxu1 %v12474_v12  ;;  %v12546_v9 = vld [vmem:[%s17018_s4 + $0x12c] ss:$16 sps:$4 sm:$0xff]   ;;  %v12541_v12 = vld [vmem:[%s17018_s4 + $0x120] ss:$16 sps:$4 sm:$0xff]  }
 0x3fe   : > { %2840 = vmatprep.mubr.bf16.mxu0 %v13604_v3  ;;  %2969 = vmatprep.mubr.bf16.mxu1 %v13604_v3 }
 0x400   : > { %2811 = vmatpush1.bf16.msra.mxu0 %v12469_v19  ;;  %2940 = vmatpush1.bf16.msra.mxu1 %v12472_v24  ;;  %v12549_v19 = vld [vmem:[%s17018_s4 + $0x144] ss:$16 sps:$4 sm:$0xff]   ;;  %v12552_v24 = vld [vmem:[%s17018_s4 + $0x14c] ss:$16 sps:$4 sm:$0xff]  }
 0x401   : > { %2812 = vmatprep.subr.bf16.mxu0 %v12477_v27  ;;  %2941 = vmatprep.subr.bf16.mxu1 %v12480_v16  ;;  %v12547_v27 = vld [vmem:[%s17018_s4 + $0x140] ss:$16 sps:$4 sm:$0xff]   ;;  %v12550_v16 = vld [vmem:[%s17018_s4 + $0x148] ss:$16 sps:$4 sm:$0xff]  }
 0x404   : > { %2813 = vmatpush1.bf16.msra.mxu0 %v12475_v32  ;;  %2942 = vmatpush1.bf16.msra.mxu1 %v12478_v34  ;;  %v12558_v32 = vld [vmem:[%s17018_s4 + $0x16c] ss:$16 sps:$4 sm:$0xff]   ;;  %v12553_v34 = vld [vmem:[%s17018_s4 + $0x160] ss:$16 sps:$4 sm:$0xff]  }
 0x405   : > { %2814 = vmatprep.subr.bf16.mxu0 %v12483_v35  ;;  %2943 = vmatprep.subr.bf16.mxu1 %v12486_v8  ;;  %v12556_v35 = vld [vmem:[%s17018_s4 + $0x168] ss:$16 sps:$4 sm:$0xff]   ;;  %v12561_v8 = vld [vmem:[%s17018_s4 + $0x184] ss:$16 sps:$4 sm:$0xff]  }
 0x408   : > { %2815 = vmatpush1.bf16.msra.mxu0 %v12481_v38  ;;  %2944 = vmatpush1.bf16.msra.mxu1 %v12484_v39  ;;  %v12562_v38 = vld [vmem:[%s17018_s4 + $0x188] ss:$16 sps:$4 sm:$0xff]   ;;  %v12567_v39 = vld [vmem:[%s17018_s4 + $0x1a4] ss:$16 sps:$4 sm:$0xff]  }
 0x409   : > { %3703 = vmatprep.subr.bf16.mxu0 %v12489_v40  ;;  %3832 = vmatprep.subr.bf16.mxu1 %v12492_v41  ;;  %v12570_v40 = vld [vmem:[%s17018_s4 + $0x1ac] ss:$16 sps:$4 sm:$0xff]   ;;  %v12565_v41 = vld [vmem:[%s17018_s4 + $0x1a0] ss:$16 sps:$4 sm:$0xff]  }
 0x40b   : > { %10219 = vmatmul.mubr.msk.bf16.vlgmr.msra.gmra.mrb[24].mxu0 %vm1566_vm8, %v1994_v6  ;;  %10220 = vmatmul.mubr.msk.bf16.vlgmr.msra.gmra.mrb[8].mxu1 %vm1566_vm8, %v1994_v6  ;;  %v12568_v6 = vld [vmem:[%s17018_s4 + $0x1a8] ss:$16 sps:$4 sm:$0xff]  }
 0x40c   : > { %3704 = vmatpush1.bf16.msra.mxu0 %v12487_v25  ;;  %3735 = vmatprep.mubr.bf16.mxu0 %v1652_v4  ;;  %v12576_v25 = vld [vmem:[%s17018_s4 + $0x1cc] ss:$16 sps:$4 sm:$0xff]  }
 0x40d   : > { %3833 = vmatpush1.bf16.msra.mxu1 %v12490_v10  ;;  %3864 = vmatprep.mubr.bf16.mxu1 %v1652_v4  ;;  %v12571_v10 = vld [vmem:[%s17018_s4 + $0x1c0] ss:$16 sps:$4 sm:$0xff]   ;;  %v12579_v4 = vld [vmem:[%s17018_s4 + $0x1e4] ss:$16 sps:$4 sm:$0xff]  }
 0x40e   : > { %3705 = vmatprep.subr.bf16.mxu0 %v12495_v13  ;;  %3834 = vmatprep.subr.bf16.mxu1 %v12498_v42  ;;  %v12582_v13 = vld [vmem:[%s17018_s4 + $0x1ec] ss:$16 sps:$4 sm:$0xff]   ;;  %v12577_v42 = vld [vmem:[%s17018_s4 + $0x1e0] ss:$16 sps:$4 sm:$0xff]  }
 0x410   : > { %3706 = vmatpush1.bf16.msra.mxu0 %v12493_v14  ;;  %v12580_v14 = vld [vmem:[%s17018_s4 + $0x1e8] ss:$16 sps:$4 sm:$0xff]  }
 0x411   : > { %3835 = vmatpush1.bf16.msra.mxu1 %v12496_v43  ;;  %3707 = vmatprep.subr.bf16.mxu0 %v12501_v2  ;;  %v12585_v43 = vld [vmem:[%s17018_s4 + $0x204] ss:$16 sps:$4 sm:$0xff]   ;;  %v1646_v2 = vld [vmem:[#allocation3 + $0x28] sm:$0x3f] }
 0x412   : > { %3836 = vmatprep.subr.bf16.mxu1 %v12504_v44  ;;  %v12588_v44 = vld [vmem:[%s17018_s4 + $0x20c] ss:$16 sps:$4 sm:$0xff]  }
 0x414   : > { %3708 = vmatpush1.bf16.msra.mxu0 %v12499_v20  ;;  %v1641_v20 = vld [vmem:[#allocation3] sm:$0xff] }
 0x415   : > { %3837 = vmatpush1.bf16.msra.mxu1 %v12502_v63  ;;  %3709 = vmatprep.subr.bf16.mxu0 %v12507_v18  ;;  %v12583_v63 = vld [vmem:[%s17018_s4 + $0x200] ss:$16 sps:$4 sm:$0xff]   ;;  %v1644_v18 = vld [vmem:[#allocation3 + $0x18] sm:$0xff] }
 0x416   : > { %3838 = vmatprep.subr.bf16.mxu1 %v12510_v31  ;;  %v1649_v31 = vld [vmem:[#allocation3 + $0x40] sm:$0x3f] }
 0x418   : > { %3710 = vmatpush1.bf16.msra.mxu0 %v12505_v45  ;;  %v1651_v45 = vpack.c.bf16 %v1646_v2, %v1641_v20  ;;  %v12663_v2 = vld [vmem:[%s17018_s4 + $0x3a4] ss:$16 sps:$4 sm:$0xff]   ;;  %v12661_v20 = vld [vmem:[%s17018_s4 + $0x3a0] ss:$16 sps:$4 sm:$0xff]  }
 0x419   : > { %3839 = vmatpush1.bf16.msra.mxu1 %v12508_v46  ;;  %3711 = vmatprep.subr.bf16.mxu0 %v12513_v47  ;;  %v12586_v46 = vld [vmem:[%s17018_s4 + $0x208] ss:$16 sps:$4 sm:$0xff]   ;;  %v12591_v47 = vld [vmem:[%s17018_s4 + $0x224] ss:$16 sps:$4 sm:$0xff]  }
 0x41a   : > { %3840 = vmatprep.subr.bf16.mxu1 %v12516_v29  ;;  %v1654_v29 = vpack.c.bf16 %v1649_v31, %v1644_v18  ;;  %v12669_v18 = vld [vmem:[%s17018_s4 + $0x3c4] ss:$16 sps:$4 sm:$0xff]   ;;  %v12672_v31 = vld [vmem:[%s17018_s4 + $0x3cc] ss:$16 sps:$4 sm:$0xff]  }
 0x41c   : > { %3712 = vmatpush1.bf16.msra.mxu0 %v12511_v48  ;;  %v12594_v48 = vld [vmem:[%s17018_s4 + $0x22c] ss:$16 sps:$4 sm:$0xff]  }
 0x41d   : > { %3841 = vmatpush1.bf16.msra.mxu1 %v12514_v49  ;;  %3713 = vmatprep.subr.bf16.mxu0 %v12519_v50  ;;  %v12589_v49 = vld [vmem:[%s17018_s4 + $0x220] ss:$16 sps:$4 sm:$0xff]   ;;  %v12592_v50 = vld [vmem:[%s17018_s4 + $0x228] ss:$16 sps:$4 sm:$0xff]  }
 0x41e   : > { %3842 = vmatprep.subr.bf16.mxu1 %v12522_v52  ;;  %v12597_v52 = vld [vmem:[%s17018_s4 + $0x244] ss:$16 sps:$4 sm:$0xff]  }
 0x420   : > { %3714 = vmatpush1.bf16.msra.mxu0 %v12517_v53  ;;  %v12600_v53 = vld [vmem:[%s17018_s4 + $0x24c] ss:$16 sps:$4 sm:$0xff]  }
 0x421   : > { %3843 = vmatpush1.bf16.msra.mxu1 %v12520_v54  ;;  %3715 = vmatprep.subr.bf16.mxu0 %v12525_v56  ;;  %v12595_v54 = vld [vmem:[%s17018_s4 + $0x240] ss:$16 sps:$4 sm:$0xff]   ;;  %v12598_v56 = vld [vmem:[%s17018_s4 + $0x248] ss:$16 sps:$4 sm:$0xff]  }
 0x422   : > { %3844 = vmatprep.subr.bf16.mxu1 %v12528_v57  ;;  %v12603_v57 = vld [vmem:[%s17018_s4 + $0x264] ss:$16 sps:$4 sm:$0xff]  }
 0x424   : > { %3716 = vmatpush1.bf16.msra.mxu0 %v12523_v58  ;;  %v12606_v58 = vld [vmem:[%s17018_s4 + $0x26c] ss:$16 sps:$4 sm:$0xff]  }
 0x425   : > { %3845 = vmatpush1.bf16.msra.mxu1 %v12526_v59  ;;  %3717 = vmatprep.subr.bf16.mxu0 %v12531_v51  ;;  %v12601_v59 = vld [vmem:[%s17018_s4 + $0x260] ss:$16 sps:$4 sm:$0xff]   ;;  %v12604_v51 = vld [vmem:[%s17018_s4 + $0x268] ss:$16 sps:$4 sm:$0xff]  }
 0x426   : > { %3846 = vmatprep.subr.bf16.mxu1 %v12534_v60  ;;  %v12609_v60 = vld [vmem:[%s17018_s4 + $0x284] ss:$16 sps:$4 sm:$0xff]  }
 0x428   : > { %3718 = vmatpush1.bf16.msra.mxu0 %v12529_v61  ;;  %v12612_v61 = vld [vmem:[%s17018_s4 + $0x28c] ss:$16 sps:$4 sm:$0xff]  }
 0x429   : > { %3847 = vmatpush1.bf16.msra.mxu1 %v12532_v55  ;;  %3719 = vmatprep.subr.bf16.mxu0 %v12537_v62  ;;  %v12607_v55 = vld [vmem:[%s17018_s4 + $0x280] ss:$16 sps:$4 sm:$0xff]   ;;  %v12610_v62 = vld [vmem:[%s17018_s4 + $0x288] ss:$16 sps:$4 sm:$0xff]  }
 0x42a   : > { %3848 = vmatprep.subr.bf16.mxu1 %v12540_v0  ;;  %v12615_v0 = vld [vmem:[%s17018_s4 + $0x2a4] ss:$16 sps:$4 sm:$0xff]  }
 0x42c   : > { %3720 = vmatpush1.bf16.msra.mxu0 %v12535_v1  ;;  %v12618_v1 = vld [vmem:[%s17018_s4 + $0x2ac] ss:$16 sps:$4 sm:$0xff]  }
 0x42d   : > { %3849 = vmatpush1.bf16.msra.mxu1 %v12538_v5  ;;  %3721 = vmatprep.subr.bf16.mxu0 %v12543_v7  ;;  %v12613_v5 = vld [vmem:[%s17018_s4 + $0x2a0] ss:$16 sps:$4 sm:$0xff]   ;;  %v12616_v7 = vld [vmem:[%s17018_s4 + $0x2a8] ss:$16 sps:$4 sm:$0xff]  }
 0x42e   : > { %3850 = vmatprep.subr.bf16.mxu1 %v12546_v9  ;;  %v12621_v9 = vld [vmem:[%s17018_s4 + $0x2c4] ss:$16 sps:$4 sm:$0xff]  }
 0x430   : > { %3722 = vmatpush1.bf16.msra.mxu0 %v12541_v12  ;;  %v12624_v12 = vld [vmem:[%s17018_s4 + $0x2cc] ss:$16 sps:$4 sm:$0xff]  }
 0x431   : > { %3851 = vmatpush1.bf16.msra.mxu1 %v12544_v15  ;;  %3723 = vmatprep.subr.bf16.mxu0 %v12549_v19  ;;  %v12619_v15 = vld [vmem:[%s17018_s4 + $0x2c0] ss:$16 sps:$4 sm:$0xff]   ;;  %v12622_v19 = vld [vmem:[%s17018_s4 + $0x2c8] ss:$16 sps:$4 sm:$0xff]  }
 0x432   : > { %3852 = vmatprep.subr.bf16.mxu1 %v12552_v24  ;;  %v12627_v24 = vld [vmem:[%s17018_s4 + $0x2e4] ss:$16 sps:$4 sm:$0xff]  }
 0x434   : > { %3724 = vmatpush1.bf16.msra.mxu0 %v12547_v27  ;;  %v12630_v27 = vld [vmem:[%s17018_s4 + $0x2ec] ss:$16 sps:$4 sm:$0xff]  }
 0x435   : > { %3853 = vmatpush1.bf16.msra.mxu1 %v12550_v16  ;;  %3725 = vmatprep.subr.bf16.mxu0 %v12555_v30  ;;  %v12625_v16 = vld [vmem:[%s17018_s4 + $0x2e0] ss:$16 sps:$4 sm:$0xff]   ;;  %v12628_v30 = vld [vmem:[%s17018_s4 + $0x2e8] ss:$16 sps:$4 sm:$0xff]  }
 0x436   : > { %3854 = vmatprep.subr.bf16.mxu1 %v12558_v32  ;;  %v12633_v32 = vld [vmem:[%s17018_s4 + $0x304] ss:$16 sps:$4 sm:$0xff]  }
 0x438   : > { %3726 = vmatpush1.bf16.msra.mxu0 %v12553_v34  ;;  %v12636_v34 = vld [vmem:[%s17018_s4 + $0x30c] ss:$16 sps:$4 sm:$0xff]  }
 0x439   : > { %3855 = vmatpush1.bf16.msra.mxu1 %v12556_v35  ;;  %3727 = vmatprep.subr.bf16.mxu0 %v12561_v8  ;;  %v12631_v35 = vld [vmem:[%s17018_s4 + $0x300] ss:$16 sps:$4 sm:$0xff]   ;;  %v12634_v8 = vld [vmem:[%s17018_s4 + $0x308] ss:$16 sps:$4 sm:$0xff]  }
 0x43a   : > { %3856 = vmatprep.subr.bf16.mxu1 %v12564_v11  ;;  %v12639_v11 = vld [vmem:[%s17018_s4 + $0x324] ss:$16 sps:$4 sm:$0xff]  }
 0x43c   : > { %3728 = vmatpush1.bf16.msra.mxu0 %v12559_v36  ;;  %v12642_v36 = vld [vmem:[%s17018_s4 + $0x32c] ss:$16 sps:$4 sm:$0xff]  }
 0x43d   : > { %3857 = vmatpush1.bf16.msra.mxu1 %v12562_v38  ;;  %3729 = vmatprep.subr.bf16.mxu0 %v12567_v39  ;;  %v12637_v38 = vld [vmem:[%s17018_s4 + $0x320] ss:$16 sps:$4 sm:$0xff]   ;;  %v12640_v39 = vld [vmem:[%s17018_s4 + $0x328] ss:$16 sps:$4 sm:$0xff]  }
 0x43e   : > { %3858 = vmatprep.subr.bf16.mxu1 %v12570_v40  ;;  %v12645_v40 = vld [vmem:[%s17018_s4 + $0x344] ss:$16 sps:$4 sm:$0xff]  }
 0x440   : > { %3730 = vmatpush1.bf16.msra.mxu0 %v12565_v41  ;;  %v12648_v41 = vld [vmem:[%s17018_s4 + $0x34c] ss:$16 sps:$4 sm:$0xff]  }
 0x441   : > { %3859 = vmatpush1.bf16.msra.mxu1 %v12568_v6  ;;  %3731 = vmatprep.subr.bf16.mxu0 %v12573_v33  ;;  %v12643_v6 = vld [vmem:[%s17018_s4 + $0x340] ss:$16 sps:$4 sm:$0xff]   ;;  %v12646_v33 = vld [vmem:[%s17018_s4 + $0x348] ss:$16 sps:$4 sm:$0xff]  }
 0x442   : > { %3860 = vmatprep.subr.bf16.mxu1 %v12576_v25  ;;  %v12651_v25 = vld [vmem:[%s17018_s4 + $0x364] ss:$16 sps:$4 sm:$0xff]  }
 0x444   : > { %3732 = vmatpush1.bf16.msra.mxu0 %v12571_v10  ;;  %v12654_v10 = vld [vmem:[%s17018_s4 + $0x36c] ss:$16 sps:$4 sm:$0xff]  }
 0x445   : > { %3861 = vmatpush1.bf16.msra.mxu1 %v12574_v37  ;;  %3733 = vmatprep.subr.bf16.mxu0 %v12579_v4  ;;  %v12649_v37 = vld [vmem:[%s17018_s4 + $0x360] ss:$16 sps:$4 sm:$0xff]   ;;  %v12652_v4 = vld [vmem:[%s17018_s4 + $0x368] ss:$16 sps:$4 sm:$0xff]  }
 0x446   : > { %3862 = vmatprep.subr.bf16.mxu1 %v12582_v13  ;;  %v12657_v13 = vld [vmem:[%s17018_s4 + $0x384] ss:$16 sps:$4 sm:$0xff]  }
 0x448   : > { %3734 = vmatpush1.bf16.msra.mxu0 %v12577_v42  ;;  %v12660_v42 = vld [vmem:[%s17018_s4 + $0x38c] ss:$16 sps:$4 sm:$0xff]  }
 0x449   : > { %3863 = vmatpush1.bf16.msra.mxu1 %v12580_v14  ;;  %3746 = vmatprep.subr.bf16.mxu0 %v12585_v43  ;;  %v12655_v14 = vld [vmem:[%s17018_s4 + $0x380] ss:$16 sps:$4 sm:$0xff]   ;;  %v12658_v43 = vld [vmem:[%s17018_s4 + $0x388] ss:$16 sps:$4 sm:$0xff]  }
 0x44a   : > { %3875 = vmatprep.subr.bf16.mxu1 %v12588_v44  ;;  %v12666_v44 = vld [vmem:[%s17018_s4 + $0x3ac] ss:$16 sps:$4 sm:$0xff]  }
 0x44b   : > { %3736 = vmatmul.mubr.bf16.vlgmr.msra.gmra.mrb[24].mxu0 %v1651_v45 }
 0x44c   : > { %3865 = vmatmul.mubr.bf16.vlgmr.msra.gmra.mrb[8].mxu1 %v1651_v45  ;;  %3747 = vmatpush1.bf16.msra.mxu0 %v12583_v63  ;;  %v12664_v63 = vld [vmem:[%s17018_s4 + $0x3a8] ss:$16 sps:$4 sm:$0xff]   ;;  %v12667_v45 = vld [vmem:[%s17018_s4 + $0x3c0] ss:$16 sps:$4 sm:$0xff]  }
 0x44d   : > { %3778 = vmatprep.mubr.bf16.mxu0 %v1654_v29  ;;  %3876 = vmatpush1.bf16.msra.mxu1 %v12586_v46  ;;  %v12670_v46 = vld [vmem:[%s17018_s4 + $0x3c8] ss:$16 sps:$4 sm:$0xff]  }
 0x44e   : > { %3907 = vmatprep.mubr.bf16.mxu1 %v1654_v29  ;;  %3748 = vmatprep.subr.bf16.mxu0 %v12591_v47  ;;  %v12675_v47 = vld [vmem:[%s17018_s4 + $0x3e4] ss:$16 sps:$4 sm:$0xff]   ;;  %v12678_v29 = vld [vmem:[%s17018_s4 + $0x3ec] ss:$16 sps:$4 sm:$0xff]  }
 0x44f   : > { %3877 = vmatprep.subr.bf16.mxu1 %v12594_v48  ;;  %v12673_v48 = vld [vmem:[%s17018_s4 + $0x3e0] ss:$16 sps:$4 sm:$0xff]  }
 0x450   : > { %3749 = vmatpush1.bf16.msra.mxu0 %v12589_v49  ;;  %v12676_v49 = vld [vmem:[%s17018_s4 + $0x3e8] ss:$16 sps:$4 sm:$0xff]  }
 0x451   : > { %3878 = vmatpush1.bf16.msra.mxu1 %v12592_v50  ;;  %3750 = vmatprep.subr.bf16.mxu0 %v12597_v52  ;;  %v12681_v50 = vld [vmem:[%s17018_s4 + $0x404] ss:$16 sps:$4 sm:$0xff]   ;;  %v1648_v52 = vld [vmem:[#allocation3 + $0x38] sm:$0x3f] }
 0x452   : > { %3879 = vmatprep.subr.bf16.mxu1 %v12600_v53  ;;  %v12684_v53 = vld [vmem:[%s17018_s4 + $0x40c] ss:$16 sps:$4 sm:$0xff]  }
 0x454   : > { %3751 = vmatpush1.bf16.msra.mxu0 %v12595_v54  ;;  %v1643_v54 = vld [vmem:[#allocation3 + $0x10] sm:$0xff] }
 0x455   : > { %3880 = vmatpush1.bf16.msra.mxu1 %v12598_v56  ;;  %3752 = vmatprep.subr.bf16.mxu0 %v12603_v57  ;;  %v12679_v56 = vld [vmem:[%s17018_s4 + $0x400] ss:$16 sps:$4 sm:$0xff]   ;;  %v1653_v57 = vpack.c.bf16 %v1648_v52, %v1643_v54  ;;  %v12753_v52 = vld [vmem:[%s17018_s4 + $0xa04] ss:$16 sps:$4 sm:$0xff]  }
 0x456   : > { %3881 = vmatprep.subr.bf16.mxu1 %v12606_v58  ;;  %v12682_v58 = vld [vmem:[%s17018_s4 + $0x408] ss:$16 sps:$4 sm:$0xff]   ;;  %v12751_v54 = vld [vmem:[%s17018_s4 + $0xa00] ss:$16 sps:$4 sm:$0xff]  }
 0x458   : > { %3753 = vmatpush1.bf16.msra.mxu0 %v12601_v59  ;;  %v12687_v59 = vld [vmem:[%s17018_s4 + $0x424] ss:$16 sps:$4 sm:$0xff]  }
 0x459   : > { %3882 = vmatpush1.bf16.msra.mxu1 %v12604_v51  ;;  %3754 = vmatprep.subr.bf16.mxu0 %v12609_v60  ;;  %v12690_v51 = vld [vmem:[%s17018_s4 + $0x42c] ss:$16 sps:$4 sm:$0xff]   ;;  %v12685_v60 = vld [vmem:[%s17018_s4 + $0x420] ss:$16 sps:$4 sm:$0xff]  }
 0x45a   : > { %3883 = vmatprep.subr.bf16.mxu1 %v12612_v61  ;;  %v12688_v61 = vld [vmem:[%s17018_s4 + $0x428] ss:$16 sps:$4 sm:$0xff]  }
 0x45c   : > { %3755 = vmatpush1.bf16.msra.mxu0 %v12607_v55  ;;  %v12693_v55 = vld [vmem:[%s17018_s4 + $0x444] ss:$16 sps:$4 sm:$0xff]  }
 0x45d   : > { %3884 = vmatpush1.bf16.msra.mxu1 %v12610_v62  ;;  %3756 = vmatprep.subr.bf16.mxu0 %v12615_v0  ;;  %v12696_v62 = vld [vmem:[%s17018_s4 + $0x44c] ss:$16 sps:$4 sm:$0xff]   ;;  %v12691_v0 = vld [vmem:[%s17018_s4 + $0x440] ss:$16 sps:$4 sm:$0xff]  }
 0x45e   : > { %3885 = vmatprep.subr.bf16.mxu1 %v12618_v1  ;;  %v12694_v1 = vld [vmem:[%s17018_s4 + $0x448] ss:$16 sps:$4 sm:$0xff]  }
 0x460   : > { %3757 = vmatpush1.bf16.msra.mxu0 %v12613_v5  ;;  %v12699_v5 = vld [vmem:[%s17018_s4 + $0x464] ss:$16 sps:$4 sm:$0xff]  }
 0x461   : > { %3886 = vmatpush1.bf16.msra.mxu1 %v12616_v7  ;;  %3758 = vmatprep.subr.bf16.mxu0 %v12621_v9  ;;  %v12702_v7 = vld [vmem:[%s17018_s4 + $0x46c] ss:$16 sps:$4 sm:$0xff]   ;;  %v14893_v9 = vld [vmem:[#allocation3 + $0x30] sm:$0xff] }
 0x462   : > { %3887 = vmatprep.subr.bf16.mxu1 %v12624_v12  ;;  %v12697_v12 = vld [vmem:[%s17018_s4 + $0x460] ss:$16 sps:$4 sm:$0xff]  }
 0x464   : > { %3759 = vmatpush1.bf16.msra.mxu0 %v12619_v15  ;;  %v1645_v15 = vld [vmem:[#allocation3 + $0x20] sm:$0xff] }
 0x465   : > { %3888 = vmatpush1.bf16.msra.mxu1 %v12622_v19  ;;  %3760 = vmatprep.subr.bf16.mxu0 %v12627_v24  ;;  %v1650_v19 = vld [vmem:[#allocation3 + $0x48] sm:$0x3f] }
 0x466   : > { %3889 = vmatprep.subr.bf16.mxu1 %v12630_v27  ;;  %v12700_v24 = vld [vmem:[%s17018_s4 + $0x468] ss:$16 sps:$4 sm:$0xff]   ;;  %v12705_v27 = vld [vmem:[%s17018_s4 + $0x904] ss:$16 sps:$4 sm:$0xff]  }
 0x468   : > { %3761 = vmatpush1.bf16.msra.mxu0 %v12625_v16  ;;  %v12708_v16 = vld [vmem:[%s17018_s4 + $0x90c] ss:$16 sps:$4 sm:$0xff]  }
 0x469   : > { %3890 = vmatpush1.bf16.msra.mxu1 %v12628_v30  ;;  %3762 = vmatprep.subr.bf16.mxu0 %v12633_v32  ;;  %v3962_v30 = vld [vmem:[#allocation3 + $0x8] sm:$0xfc]  ;;  %v1655_v32 = vpack.c.bf16 %v1650_v19, %v1645_v15  ;;  %v12775_v19 = vld [vmem:[%s17018_s4 + $0xa80] ss:$16 sps:$4 sm:$0xff]  }
 0x46a   : > { %3891 = vmatprep.subr.bf16.mxu1 %v12636_v34  ;;  %v3972_v34 = vpack.c.bf16 %v14893_v9, %v3962_v30  ;;  %v12780_v15 = vld [vmem:[%s17018_s4 + $0xa8c] ss:$16 sps:$4 sm:$0xff]   ;;  %v12781_v30 = vld [vmem:[%s17018_s4 + $0xaa0] ss:$16 sps:$4 sm:$0xff]  }
 0x46c   : > { %3763 = vmatpush1.bf16.msra.mxu0 %v12631_v35  ;;  %v12703_v35 = vld [vmem:[%s17018_s4 + $0x900] ss:$16 sps:$4 sm:$0xff]  }
 0x46d   : > { %3892 = vmatpush1.bf16.msra.mxu1 %v12634_v8  ;;  %3764 = vmatprep.subr.bf16.mxu0 %v12639_v11  ;;  %v12706_v8 = vld [vmem:[%s17018_s4 + $0x908] ss:$16 sps:$4 sm:$0xff]   ;;  %v12711_v11 = vld [vmem:[%s17018_s4 + $0x924] ss:$16 sps:$4 sm:$0xff]  }
 0x46e   : > { %3893 = vmatprep.subr.bf16.mxu1 %v12642_v36  ;;  %v4127_v36 = vrot.slane %v3972_v34, 1  ;;  %v12789_v34 = vld [vmem:[%s17018_s4 + $0xac4] ss:$16 sps:$4 sm:$0xff]  }
 0x470   : > { %3765 = vmatpush1.bf16.msra.mxu0 %v12637_v38  ;;  %v12714_v38 = vld [vmem:[%s17018_s4 + $0x92c] ss:$16 sps:$4 sm:$0xff]  }
 0x471   : > { %3894 = vmatpush1.bf16.msra.mxu1 %v12640_v39  ;;  %3766 = vmatprep.subr.bf16.mxu0 %v12645_v40  ;;  %v12709_v39 = vld [vmem:[%s17018_s4 + $0x920] ss:$16 sps:$4 sm:$0xff]   ;;  %v12712_v40 = vld [vmem:[%s17018_s4 + $0x928] ss:$16 sps:$4 sm:$0xff]  }
 0x472   : > { %3895 = vmatprep.subr.bf16.mxu1 %v12648_v41  ;;  %v12717_v41 = vld [vmem:[%s17018_s4 + $0x944] ss:$16 sps:$4 sm:$0xff]  }
 0x474   : > { %3767 = vmatpush1.bf16.msra.mxu0 %v12643_v6  ;;  %v12720_v6 = vld [vmem:[%s17018_s4 + $0x94c] ss:$16 sps:$4 sm:$0xff]  }
 0x475   : > { %3896 = vmatpush1.bf16.msra.mxu1 %v12646_v33  ;;  %3768 = vmatprep.subr.bf16.mxu0 %v12651_v25  ;;  %v12715_v33 = vld [vmem:[%s17018_s4 + $0x940] ss:$16 sps:$4 sm:$0xff]   ;;  %v12718_v25 = vld [vmem:[%s17018_s4 + $0x948] ss:$16 sps:$4 sm:$0xff]  }
 0x476   : > { %3897 = vmatprep.subr.bf16.mxu1 %v12654_v10  ;;  %v12723_v10 = vld [vmem:[%s17018_s4 + $0x964] ss:$16 sps:$4 sm:$0xff]  }
 0x478   : > { %3769 = vmatpush1.bf16.msra.mxu0 %v12649_v37  ;;  %v12726_v37 = vld [vmem:[%s17018_s4 + $0x96c] ss:$16 sps:$4 sm:$0xff]  }
 0x479   : > { %3898 = vmatpush1.bf16.msra.mxu1 %v12652_v4  ;;  %3770 = vmatprep.subr.bf16.mxu0 %v12657_v13  ;;  %v12721_v4 = vld [vmem:[%s17018_s4 + $0x960] ss:$16 sps:$4 sm:$0xff]   ;;  %v12724_v13 = vld [vmem:[%s17018_s4 + $0x968] ss:$16 sps:$4 sm:$0xff]  }
 0x47a   : > { %3899 = vmatprep.subr.bf16.mxu1 %v12660_v42  ;;  %v12729_v42 = vld [vmem:[%s17018_s4 + $0x984] ss:$16 sps:$4 sm:$0xff]  }
 0x47c   : > { %3771 = vmatpush1.bf16.msra.mxu0 %v12655_v14  ;;  %v12732_v14 = vld [vmem:[%s17018_s4 + $0x98c] ss:$16 sps:$4 sm:$0xff]  }
 0x47d   : > { %3900 = vmatpush1.bf16.msra.mxu1 %v12658_v43  ;;  %3772 = vmatprep.subr.bf16.mxu0 %v12663_v2  ;;  %v12727_v43 = vld [vmem:[%s17018_s4 + $0x980] ss:$16 sps:$4 sm:$0xff]   ;;  %v12730_v2 = vld [vmem:[%s17018_s4 + $0x988] ss:$16 sps:$4 sm:$0xff]  }
 0x47e   : > { %3901 = vmatprep.subr.bf16.mxu1 %v12666_v44  ;;  %v12735_v44 = vld [vmem:[%s17018_s4 + $0x9a4] ss:$16 sps:$4 sm:$0xff]  }
 0x480   : > { %3773 = vmatpush1.bf16.msra.mxu0 %v12661_v20  ;;  %v12738_v20 = vld [vmem:[%s17018_s4 + $0x9ac] ss:$16 sps:$4 sm:$0xff]  }
 0x481   : > { %3902 = vmatpush1.bf16.msra.mxu1 %v12664_v63  ;;  %3774 = vmatprep.subr.bf16.mxu0 %v12669_v18  ;;  %v12733_v63 = vld [vmem:[%s17018_s4 + $0x9a0] ss:$16 sps:$4 sm:$0xff]   ;;  %v12736_v18 = vld [vmem:[%s17018_s4 + $0x9a8] ss:$16 sps:$4 sm:$0xff]  }
 0x482   : > { %3903 = vmatprep.subr.bf16.mxu1 %v12672_v31  ;;  %v12741_v31 = vld [vmem:[%s17018_s4 + $0x9c4] ss:$16 sps:$4 sm:$0xff]  }
 0x484   : > { %3775 = vmatpush1.bf16.msra.mxu0 %v12667_v45  ;;  %v12744_v45 = vld [vmem:[%s17018_s4 + $0x9cc] ss:$16 sps:$4 sm:$0xff]  }
 0x485   : > { %3904 = vmatpush1.bf16.msra.mxu1 %v12670_v46  ;;  %3776 = vmatprep.subr.bf16.mxu0 %v12675_v47  ;;  %v12739_v46 = vld [vmem:[%s17018_s4 + $0x9c0] ss:$16 sps:$4 sm:$0xff]   ;;  %v12742_v47 = vld [vmem:[%s17018_s4 + $0x9c8] ss:$16 sps:$4 sm:$0xff]  }
 0x486   : > { %3905 = vmatprep.subr.bf16.mxu1 %v12678_v29  ;;  %v12747_v29 = vld [vmem:[%s17018_s4 + $0x9e4] ss:$16 sps:$4 sm:$0xff]  }
 0x488   : > { %3777 = vmatpush1.bf16.msra.mxu0 %v12673_v48  ;;  %v12750_v48 = vld [vmem:[%s17018_s4 + $0x9ec] ss:$16 sps:$4 sm:$0xff]  }
 0x489   : > { %3906 = vmatpush1.bf16.msra.mxu1 %v12676_v49  ;;  %3789 = vmatprep.subr.bf16.mxu0 %v12681_v50  ;;  %v12745_v49 = vld [vmem:[%s17018_s4 + $0x9e0] ss:$16 sps:$4 sm:$0xff]   ;;  %v12748_v50 = vld [vmem:[%s17018_s4 + $0x9e8] ss:$16 sps:$4 sm:$0xff]  }
 0x48a   : > { %3918 = vmatprep.subr.bf16.mxu1 %v12684_v53  ;;  %v12756_v53 = vld [vmem:[%s17018_s4 + $0xa0c] ss:$16 sps:$4 sm:$0xff]  }
 0x48b   : > { %3779 = vmatmul.mubr.bf16.vlgmr.msra.gmra.mrb[24].mxu0 %v1653_v57 }
 0x48c   : > { %3908 = vmatmul.mubr.bf16.vlgmr.msra.gmra.mrb[8].mxu1 %v1653_v57  ;;  %3790 = vmatpush1.bf16.msra.mxu0 %v12679_v56  ;;  %v12754_v56 = vld [vmem:[%s17018_s4 + $0xa08] ss:$16 sps:$4 sm:$0xff]   ;;  %v12759_v57 = vld [vmem:[%s17018_s4 + $0xa24] ss:$16 sps:$4 sm:$0xff]  }
 0x48d   : > { %3919 = vmatpush1.bf16.msra.mxu1 %v12682_v58  ;;  %3791 = vmatprep.subr.bf16.mxu0 %v12687_v59  ;;  %v12762_v58 = vld [vmem:[%s17018_s4 + $0xa2c] ss:$16 sps:$4 sm:$0xff]   ;;  %v12757_v59 = vld [vmem:[%s17018_s4 + $0xa20] ss:$16 sps:$4 sm:$0xff]  }
 0x48e   : > { %3920 = vmatprep.subr.bf16.mxu1 %v12690_v51  ;;  %3821 = vmatprep.mubr.bf16.mxu0 %v13604_v3  ;;  %v12760_v51 = vld [vmem:[%s17018_s4 + $0xa28] ss:$16 sps:$4 sm:$0xff]  }
 0x48f   : > { %3950 = vmatprep.mubr.bf16.mxu1 %v13604_v3 }
 0x490   : > { %3792 = vmatpush1.bf16.msra.mxu0 %v12685_v60  ;;  %v12765_v60 = vld [vmem:[%s17018_s4 + $0xa44] ss:$16 sps:$4 sm:$0xff]  }
 0x491   : > { %3921 = vmatpush1.bf16.msra.mxu1 %v12688_v61  ;;  %3793 = vmatprep.subr.bf16.mxu0 %v12693_v55  ;;  %v12768_v61 = vld [vmem:[%s17018_s4 + $0xa4c] ss:$16 sps:$4 sm:$0xff]   ;;  %v12763_v55 = vld [vmem:[%s17018_s4 + $0xa40] ss:$16 sps:$4 sm:$0xff]  }
 0x492   : > { %3922 = vmatprep.subr.bf16.mxu1 %v12696_v62  ;;  %v12766_v62 = vld [vmem:[%s17018_s4 + $0xa48] ss:$16 sps:$4 sm:$0xff]  }
 0x494   : > { %3794 = vmatpush1.bf16.msra.mxu0 %v12691_v0  ;;  %v12771_v0 = vld [vmem:[%s17018_s4 + $0xa64] ss:$16 sps:$4 sm:$0xff]  }
 0x495   : > { %3923 = vmatpush1.bf16.msra.mxu1 %v12694_v1  ;;  %3795 = vmatprep.subr.bf16.mxu0 %v12699_v5  ;;  %v12774_v1 = vld [vmem:[%s17018_s4 + $0xa6c] ss:$16 sps:$4 sm:$0xff]   ;;  %v12769_v5 = vld [vmem:[%s17018_s4 + $0xa60] ss:$16 sps:$4 sm:$0xff]  }
 0x496   : > { %3924 = vmatprep.subr.bf16.mxu1 %v12702_v7  ;;  %v12772_v7 = vld [vmem:[%s17018_s4 + $0xa68] ss:$16 sps:$4 sm:$0xff]  }
 0x498   : > { %3796 = vmatpush1.bf16.msra.mxu0 %v12697_v12  ;;  %v12777_v12 = vld [vmem:[%s17018_s4 + $0xa84] ss:$16 sps:$4 sm:$0xff]  }
 0x499   : > { %3925 = vmatpush1.bf16.msra.mxu1 %v12700_v24  ;;  %4858 = vmatprep.subr.bf16.mxu0 %v12705_v27  ;;  %v12778_v24 = vld [vmem:[%s17018_s4 + $0xa88] ss:$16 sps:$4 sm:$0xff]   ;;  %v12783_v27 = vld [vmem:[%s17018_s4 + $0xaa4] ss:$16 sps:$4 sm:$0xff]  }
 0x49a   : > { %4987 = vmatprep.subr.bf16.mxu1 %v12708_v16  ;;  %v12786_v16 = vld [vmem:[%s17018_s4 + $0xaac] ss:$16 sps:$4 sm:$0xff]  }
 0x49b   : > { %10365 = vmatmul.mubr.msk.bf16.vlgmr.msra.gmra.mrb[24].mxu0 %vm1566_vm8, %v1655_v32 }
 0x49c   : > { %10366 = vmatmul.mubr.msk.bf16.vlgmr.msra.gmra.mrb[8].mxu1 %vm1566_vm8, %v1655_v32  ;;  %4859 = vmatpush1.bf16.msra.mxu0 %v12703_v35  ;;  %v12784_v32 = vld [vmem:[%s17018_s4 + $0xaa8] ss:$16 sps:$4 sm:$0xff]   ;;  %v12792_v35 = vld [vmem:[%s17018_s4 + $0xacc] ss:$16 sps:$4 sm:$0xff]  }
 0x49d   : > { %4890 = vmatprep.mubr.bf16.mxu0 %v4127_v36  ;;  %4988 = vmatpush1.bf16.msra.mxu1 %v12706_v8  ;;  %v12787_v8 = vld [vmem:[%s17018_s4 + $0xac0] ss:$16 sps:$4 sm:$0xff]  }
 0x49e   : > { %5019 = vmatprep.mubr.bf16.mxu1 %v4127_v36  ;;  %4860 = vmatprep.subr.bf16.mxu0 %v12711_v11  ;;  %v12790_v11 = vld [vmem:[%s17018_s4 + $0xac8] ss:$16 sps:$4 sm:$0xff]   ;;  %v12795_v36 = vld [vmem:[%s17018_s4 + $0xae4] ss:$16 sps:$4 sm:$0xff]  }
 0x49f   : > { %4989 = vmatprep.subr.bf16.mxu1 %v12714_v38  ;;  %v12798_v38 = vld [vmem:[%s17018_s4 + $0xaec] ss:$16 sps:$4 sm:$0xff]  }
 0x4a0   : > { %4861 = vmatpush1.bf16.msra.mxu0 %v12709_v39  ;;  %v15090_v39 = vld [vmem:[#allocation3 + $0x28] sm:$0xff] }
 0x4a1   : > { %4990 = vmatpush1.bf16.msra.mxu1 %v12712_v40  ;;  %4862 = vmatprep.subr.bf16.mxu0 %v12717_v41  ;;  %v3961_v40 = vld [vmem:[#allocation3] sm:$0xfc] }
 0x4a2   : > { %4991 = vmatprep.subr.bf16.mxu1 %v12720_v6  ;;  %v12793_v41 = vld [vmem:[%s17018_s4 + $0xae0] ss:$16 sps:$4 sm:$0xff]   ;;  %v3964_v6 = vld [vmem:[#allocation3 + $0x18] sm:$0xfc] }
 0x4a4   : > { %4863 = vmatpush1.bf16.msra.mxu0 %v12715_v33  ;;  %v15095_v33 = vld [vmem:[#allocation3 + $0x40] sm:$0xff] }
 0x4a5   : > { %4992 = vmatpush1.bf16.msra.mxu1 %v12718_v25  ;;  %4864 = vmatprep.subr.bf16.mxu0 %v12723_v10  ;;  %v12796_v25 = vld [vmem:[%s17018_s4 + $0xae8] ss:$16 sps:$4 sm:$0xff]   ;;  %v3971_v10 = vpack.c.bf16 %v15090_v39, %v3961_v40  ;;  %v12865_v40 = vld [vmem:[%s17018_s4 + $0xc60] ss:$16 sps:$4 sm:$0xff]  }
 0x4a6   : > { %4993 = vmatprep.subr.bf16.mxu1 %v12726_v37  ;;  %v12801_v37 = vld [vmem:[%s17018_s4 + $0xb04] ss:$16 sps:$4 sm:$0xff]  }
 0x4a8   : > { %4865 = vmatpush1.bf16.msra.mxu0 %v12721_v4  ;;  %v12804_v4 = vld [vmem:[%s17018_s4 + $0xb0c] ss:$16 sps:$4 sm:$0xff]  }
 0x4a9   : > { %4994 = vmatpush1.bf16.msra.mxu1 %v12724_v13  ;;  %4866 = vmatprep.subr.bf16.mxu0 %v12729_v42  ;;  %v3974_v13 = vpack.c.bf16 %v15095_v33, %v3964_v6  ;;  %v12799_v42 = vld [vmem:[%s17018_s4 + $0xb00] ss:$16 sps:$4 sm:$0xff]   ;;  %v12873_v6 = vld [vmem:[%s17018_s4 + $0xc84] ss:$16 sps:$4 sm:$0xff]  }
 0x4aa   : > { %4995 = vmatprep.subr.bf16.mxu1 %v12732_v14  ;;  %v4126_v14 = vrot.slane %v3971_v10, 1  ;;  %v12871_v10 = vld [vmem:[%s17018_s4 + $0xc80] ss:$16 sps:$4 sm:$0xff]  }
 0x4ac   : > { %4867 = vmatpush1.bf16.msra.mxu0 %v12727_v43  ;;  %v12802_v43 = vld [vmem:[%s17018_s4 + $0xb08] ss:$16 sps:$4 sm:$0xff]  }
 0x4ad   : > { %4996 = vmatpush1.bf16.msra.mxu1 %v12730_v2  ;;  %4868 = vmatprep.subr.bf16.mxu0 %v12735_v44  ;;  %v12807_v2 = vld [vmem:[%s17018_s4 + $0xb24] ss:$16 sps:$4 sm:$0xff]   ;;  %v4129_v44 = vrot.slane %v3974_v13, 1  ;;  %v12882_v13 = vld [vmem:[%s17018_s4 + $0xcac] ss:$16 sps:$4 sm:$0xff]  }
 0x4ae   : > { %4997 = vmatprep.subr.bf16.mxu1 %v12738_v20  ;;  %v12810_v20 = vld [vmem:[%s17018_s4 + $0xb2c] ss:$16 sps:$4 sm:$0xff]  }
 0x4b0   : > { %4869 = vmatpush1.bf16.msra.mxu0 %v12733_v63  ;;  %v12805_v63 = vld [vmem:[%s17018_s4 + $0xb20] ss:$16 sps:$4 sm:$0xff]  }
 0x4b1   : > { %4998 = vmatpush1.bf16.msra.mxu1 %v12736_v18  ;;  %4870 = vmatprep.subr.bf16.mxu0 %v12741_v31  ;;  %v12808_v18 = vld [vmem:[%s17018_s4 + $0xb28] ss:$16 sps:$4 sm:$0xff]   ;;  %v12813_v31 = vld [vmem:[%s17018_s4 + $0xb44] ss:$16 sps:$4 sm:$0xff]  }
 0x4b2   : > { %4999 = vmatprep.subr.bf16.mxu1 %v12744_v45  ;;  %v12816_v45 = vld [vmem:[%s17018_s4 + $0xb4c] ss:$16 sps:$4 sm:$0xff]  }
 0x4b4   : > { %4871 = vmatpush1.bf16.msra.mxu0 %v12739_v46  ;;  %v12811_v46 = vld [vmem:[%s17018_s4 + $0xb40] ss:$16 sps:$4 sm:$0xff]  }
 0x4b5   : > { %5000 = vmatpush1.bf16.msra.mxu1 %v12742_v47  ;;  %4872 = vmatprep.subr.bf16.mxu0 %v12747_v29  ;;  %v12814_v47 = vld [vmem:[%s17018_s4 + $0xb48] ss:$16 sps:$4 sm:$0xff]   ;;  %v12819_v29 = vld [vmem:[%s17018_s4 + $0xb64] ss:$16 sps:$4 sm:$0xff]  }
 0x4b6   : > { %5001 = vmatprep.subr.bf16.mxu1 %v12750_v48  ;;  %v12822_v48 = vld [vmem:[%s17018_s4 + $0xb6c] ss:$16 sps:$4 sm:$0xff]  }
 0x4b8   : > { %4873 = vmatpush1.bf16.msra.mxu0 %v12745_v49  ;;  %v12817_v49 = vld [vmem:[%s17018_s4 + $0xb60] ss:$16 sps:$4 sm:$0xff]  }
 0x4b9   : > { %5002 = vmatpush1.bf16.msra.mxu1 %v12748_v50  ;;  %4874 = vmatprep.subr.bf16.mxu0 %v12753_v52  ;;  %v12820_v50 = vld [vmem:[%s17018_s4 + $0xb68] ss:$16 sps:$4 sm:$0xff]   ;;  %v12825_v52 = vld [vmem:[%s17018_s4 + $0xb84] ss:$16 sps:$4 sm:$0xff]  }
 0x4ba   : > { %5003 = vmatprep.subr.bf16.mxu1 %v12756_v53  ;;  %v12828_v53 = vld [vmem:[%s17018_s4 + $0xb8c] ss:$16 sps:$4 sm:$0xff]  }
 0x4bc   : > { %4875 = vmatpush1.bf16.msra.mxu0 %v12751_v54  ;;  %v12823_v54 = vld [vmem:[%s17018_s4 + $0xb80] ss:$16 sps:$4 sm:$0xff]  }
 0x4bd   : > { %5004 = vmatpush1.bf16.msra.mxu1 %v12754_v56  ;;  %4876 = vmatprep.subr.bf16.mxu0 %v12759_v57  ;;  %v12826_v56 = vld [vmem:[%s17018_s4 + $0xb88] ss:$16 sps:$4 sm:$0xff]   ;;  %v12831_v57 = vld [vmem:[%s17018_s4 + $0xba4] ss:$16 sps:$4 sm:$0xff]  }
 0x4be   : > { %5005 = vmatprep.subr.bf16.mxu1 %v12762_v58  ;;  %v12834_v58 = vld [vmem:[%s17018_s4 + $0xbac] ss:$16 sps:$4 sm:$0xff]  }
 0x4c0   : > { %4877 = vmatpush1.bf16.msra.mxu0 %v12757_v59  ;;  %v12829_v59 = vld [vmem:[%s17018_s4 + $0xba0] ss:$16 sps:$4 sm:$0xff]  }
 0x4c1   : > { %5006 = vmatpush1.bf16.msra.mxu1 %v12760_v51  ;;  %4878 = vmatprep.subr.bf16.mxu0 %v12765_v60  ;;  %v12832_v51 = vld [vmem:[%s17018_s4 + $0xba8] ss:$16 sps:$4 sm:$0xff]   ;;  %v12837_v60 = vld [vmem:[%s17018_s4 + $0xbc4] ss:$16 sps:$4 sm:$0xff]  }
 0x4c2   : > { %5007 = vmatprep.subr.bf16.mxu1 %v12768_v61  ;;  %v12840_v61 = vld [vmem:[%s17018_s4 + $0xbcc] ss:$16 sps:$4 sm:$0xff]  }
 0x4c4   : > { %4879 = vmatpush1.bf16.msra.mxu0 %v12763_v55  ;;  %v12835_v55 = vld [vmem:[%s17018_s4 + $0xbc0] ss:$16 sps:$4 sm:$0xff]  }
 0x4c5   : > { %5008 = vmatpush1.bf16.msra.mxu1 %v12766_v62  ;;  %4880 = vmatprep.subr.bf16.mxu0 %v12771_v0  ;;  %v12838_v62 = vld [vmem:[%s17018_s4 + $0xbc8] ss:$16 sps:$4 sm:$0xff]   ;;  %v12843_v0 = vld [vmem:[%s17018_s4 + $0xbe4] ss:$16 sps:$4 sm:$0xff]  }
 0x4c6   : > { %5009 = vmatprep.subr.bf16.mxu1 %v12774_v1  ;;  %v12846_v1 = vld [vmem:[%s17018_s4 + $0xbec] ss:$16 sps:$4 sm:$0xff]  }
 0x4c8   : > { %4881 = vmatpush1.bf16.msra.mxu0 %v12769_v5  ;;  %v12841_v5 = vld [vmem:[%s17018_s4 + $0xbe0] ss:$16 sps:$4 sm:$0xff]  }
 0x4c9   : > { %5010 = vmatpush1.bf16.msra.mxu1 %v12772_v7  ;;  %4882 = vmatprep.subr.bf16.mxu0 %v12777_v12  ;;  %v12844_v7 = vld [vmem:[%s17018_s4 + $0xbe8] ss:$16 sps:$4 sm:$0xff]   ;;  %v12849_v12 = vld [vmem:[%s17018_s4 + $0xc04] ss:$16 sps:$4 sm:$0xff]  }
 0x4ca   : > { %5011 = vmatprep.subr.bf16.mxu1 %v12780_v15  ;;  %v12852_v15 = vld [vmem:[%s17018_s4 + $0xc0c] ss:$16 sps:$4 sm:$0xff]  }
 0x4cc   : > { %4883 = vmatpush1.bf16.msra.mxu0 %v12775_v19  ;;  %v12847_v19 = vld [vmem:[%s17018_s4 + $0xc00] ss:$16 sps:$4 sm:$0xff]  }
 0x4cd   : > { %5012 = vmatpush1.bf16.msra.mxu1 %v12778_v24  ;;  %4884 = vmatprep.subr.bf16.mxu0 %v12783_v27  ;;  %v12850_v24 = vld [vmem:[%s17018_s4 + $0xc08] ss:$16 sps:$4 sm:$0xff]   ;;  %v12855_v27 = vld [vmem:[%s17018_s4 + $0xc24] ss:$16 sps:$4 sm:$0xff]  }
 0x4ce   : > { %5013 = vmatprep.subr.bf16.mxu1 %v12786_v16  ;;  %v12858_v16 = vld [vmem:[%s17018_s4 + $0xc2c] ss:$16 sps:$4 sm:$0xff]  }
 0x4d0   : > { %4885 = vmatpush1.bf16.msra.mxu0 %v12781_v30  ;;  %v12853_v30 = vld [vmem:[%s17018_s4 + $0xc20] ss:$16 sps:$4 sm:$0xff]  }
 0x4d1   : > { %5014 = vmatpush1.bf16.msra.mxu1 %v12784_v32  ;;  %4886 = vmatprep.subr.bf16.mxu0 %v12789_v34  ;;  %v12856_v32 = vld [vmem:[%s17018_s4 + $0xc28] ss:$16 sps:$4 sm:$0xff]   ;;  %v12861_v34 = vld [vmem:[%s17018_s4 + $0xc44] ss:$16 sps:$4 sm:$0xff]  }
 0x4d2   : > { %5015 = vmatprep.subr.bf16.mxu1 %v12792_v35  ;;  %v12864_v35 = vld [vmem:[%s17018_s4 + $0xc4c] ss:$16 sps:$4 sm:$0xff]  }
 0x4d4   : > { %4887 = vmatpush1.bf16.msra.mxu0 %v12787_v8  ;;  %v12859_v8 = vld [vmem:[%s17018_s4 + $0xc40] ss:$16 sps:$4 sm:$0xff]  }
 0x4d5   : > { %5016 = vmatpush1.bf16.msra.mxu1 %v12790_v11  ;;  %4888 = vmatprep.subr.bf16.mxu0 %v12795_v36  ;;  %v12862_v11 = vld [vmem:[%s17018_s4 + $0xc48] ss:$16 sps:$4 sm:$0xff]   ;;  %v12867_v36 = vld [vmem:[%s17018_s4 + $0xc64] ss:$16 sps:$4 sm:$0xff]  }
 0x4d6   : > { %5017 = vmatprep.subr.bf16.mxu1 %v12798_v38  ;;  %v12870_v38 = vld [vmem:[%s17018_s4 + $0xc6c] ss:$16 sps:$4 sm:$0xff]  }
 0x4d8   : > { %4889 = vmatpush1.bf16.msra.mxu0 %v12793_v41  ;;  %v12868_v41 = vld [vmem:[%s17018_s4 + $0xc68] ss:$16 sps:$4 sm:$0xff]  }
 0x4d9   : > { %5018 = vmatpush1.bf16.msra.mxu1 %v12796_v25  ;;  %4901 = vmatprep.subr.bf16.mxu0 %v12801_v37  ;;  %v12876_v25 = vld [vmem:[%s17018_s4 + $0xc8c] ss:$16 sps:$4 sm:$0xff]   ;;  %v12874_v37 = vld [vmem:[%s17018_s4 + $0xc88] ss:$16 sps:$4 sm:$0xff]  }
 0x4da   : > { %5030 = vmatprep.subr.bf16.mxu1 %v12804_v4  ;;  %v12879_v4 = vld [vmem:[%s17018_s4 + $0xca4] ss:$16 sps:$4 sm:$0xff]  }
 0x4db   : > { %4891 = vmatmul.mubr.bf16.vlgmr.msra.gmra.mrb[24].mxu0 %v4126_v14 }
 0x4dc   : > { %5020 = vmatmul.mubr.bf16.vlgmr.msra.gmra.mrb[8].mxu1 %v4126_v14  ;;  %4902 = vmatpush1.bf16.msra.mxu0 %v12799_v42  ;;  %v12877_v42 = vld [vmem:[%s17018_s4 + $0xca0] ss:$16 sps:$4 sm:$0xff]   ;;  %v12880_v14 = vld [vmem:[%s17018_s4 + $0xca8] ss:$16 sps:$4 sm:$0xff]  }
 0x4dd   : > { %4933 = vmatprep.mubr.bf16.mxu0 %v4129_v44  ;;  %5031 = vmatpush1.bf16.msra.mxu1 %v12802_v43  ;;  %v12885_v43 = vld [vmem:[%s17018_s4 + $0xcc4] ss:$16 sps:$4 sm:$0xff]  }
 0x4de   : > { %5062 = vmatprep.mubr.bf16.mxu1 %v4129_v44  ;;  %4903 = vmatprep.subr.bf16.mxu0 %v12807_v2  ;;  %v12888_v2 = vld [vmem:[%s17018_s4 + $0xccc] ss:$16 sps:$4 sm:$0xff]   ;;  %v12883_v44 = vld [vmem:[%s17018_s4 + $0xcc0] ss:$16 sps:$4 sm:$0xff]  }
 0x4df   : > { %5032 = vmatprep.subr.bf16.mxu1 %v12810_v20  ;;  %v12886_v20 = vld [vmem:[%s17018_s4 + $0xcc8] ss:$16 sps:$4 sm:$0xff]  }
 0x4e0   : > { %4904 = vmatpush1.bf16.msra.mxu0 %v12805_v63  ;;  %v12891_v63 = vld [vmem:[%s17018_s4 + $0xce4] ss:$16 sps:$4 sm:$0xff]  }
 0x4e1   : > { %5033 = vmatpush1.bf16.msra.mxu1 %v12808_v18  ;;  %4905 = vmatprep.subr.bf16.mxu0 %v12813_v31  ;;  %v12894_v18 = vld [vmem:[%s17018_s4 + $0xcec] ss:$16 sps:$4 sm:$0xff]  }
 0x4e2   : > { %5034 = vmatprep.subr.bf16.mxu1 %v12816_v45  ;;  %v15288_v31 = vld [vmem:[#allocation3 + $0x38] sm:$0xff]  ;;  %v12889_v45 = vld [vmem:[%s17018_s4 + $0xce0] ss:$16 sps:$4 sm:$0xff]  }
 0x4e4   : > { %4906 = vmatpush1.bf16.msra.mxu0 %v12811_v46  ;;  %v3963_v46 = vld [vmem:[#allocation3 + $0x10] sm:$0xfc] }
 0x4e5   : > { %5035 = vmatpush1.bf16.msra.mxu1 %v12814_v47  ;;  %4907 = vmatprep.subr.bf16.mxu0 %v12819_v29  ;;  %v12892_v47 = vld [vmem:[%s17018_s4 + $0xce8] ss:$16 sps:$4 sm:$0xff]   ;;  %v3973_v29 = vpack.c.bf16 %v15288_v31, %v3963_v46  ;;  %v12943_v46 = vld [vmem:[%s17018_s4 + $0xe00] ss:$16 sps:$4 sm:$0xff]  }
 0x4e6   : > { %5036 = vmatprep.subr.bf16.mxu1 %v12822_v48  ;;  %v12897_v48 = vld [vmem:[%s17018_s4 + $0xd04] ss:$16 sps:$4 sm:$0xff]  }
 0x4e8   : > { %4908 = vmatpush1.bf16.msra.mxu0 %v12817_v49  ;;  %v12900_v49 = vld [vmem:[%s17018_s4 + $0xd0c] ss:$16 sps:$4 sm:$0xff]  }
 0x4e9   : > { %5037 = vmatpush1.bf16.msra.mxu1 %v12820_v50  ;;  %4909 = vmatprep.subr.bf16.mxu0 %v12825_v52  ;;  %v12895_v50 = vld [vmem:[%s17018_s4 + $0xd00] ss:$16 sps:$4 sm:$0xff]   ;;  %v4128_v52 = vrot.slane %v3973_v29, 1  ;;  %v12951_v29 = vld [vmem:[%s17018_s4 + $0xe24] ss:$16 sps:$4 sm:$0xff]  }
 0x4ea   : > { %5038 = vmatprep.subr.bf16.mxu1 %v12828_v53  ;;  %v12898_v53 = vld [vmem:[%s17018_s4 + $0xd08] ss:$16 sps:$4 sm:$0xff]  }
 0x4ec   : > { %4910 = vmatpush1.bf16.msra.mxu0 %v12823_v54  ;;  %v12903_v54 = vld [vmem:[%s17018_s4 + $0xd24] ss:$16 sps:$4 sm:$0xff]  }
 0x4ed   : > { %5039 = vmatpush1.bf16.msra.mxu1 %v12826_v56  ;;  %4911 = vmatprep.subr.bf16.mxu0 %v12831_v57  ;;  %v12906_v56 = vld [vmem:[%s17018_s4 + $0xd2c] ss:$16 sps:$4 sm:$0xff]  }
 0x4ee   : > { %5040 = vmatprep.subr.bf16.mxu1 %v12834_v58  ;;  %v5125_v57 = vld [vmem:[#allocation3 + $0x8] sm:$0xf8] }
 0x4ef   : > { %v5140_v58 = vpack.c.bf16 %v14893_v9, %v5125_v57  ;;  %v12912_v9 = vld [vmem:[%s17018_s4 + $0xd4c] ss:$16 sps:$4 sm:$0xff]  }
 0x4f0   : > { %4912 = vmatpush1.bf16.msra.mxu0 %v12829_v59  ;;  %v12901_v59 = vld [vmem:[%s17018_s4 + $0xd20] ss:$16 sps:$4 sm:$0xff]   ;;  %v12966_v57 = vld [vmem:[%s17018_s4 + $0xe6c] ss:$16 sps:$4 sm:$0xff]  }
 0x4f1   : > { %5041 = vmatpush1.bf16.msra.mxu1 %v12832_v51  ;;  %4913 = vmatprep.subr.bf16.mxu0 %v12837_v60  ;;  %v12904_v51 = vld [vmem:[%s17018_s4 + $0xd28] ss:$16 sps:$4 sm:$0xff]   ;;  %v12909_v60 = vld [vmem:[%s17018_s4 + $0xd44] ss:$16 sps:$4 sm:$0xff]  }
 0x4f2   : > { %5042 = vmatprep.subr.bf16.mxu1 %v12840_v61  ;;  %v5135_v61 = vld [vmem:[#allocation3 + $0x58] sm:$0x1] }
 0x4f4   : > { %4914 = vmatpush1.bf16.msra.mxu0 %v12835_v55  ;;  %v5309_v55 = vshrl.u32 %v5140_v58, 16 }
 0x4f5   : > { %5043 = vmatpush1.bf16.msra.mxu1 %v12838_v62  ;;  %4915 = vmatprep.subr.bf16.mxu0 %v12843_v0  ;;  %v12907_v62 = vld [vmem:[%s17018_s4 + $0xd40] ss:$16 sps:$4 sm:$0xff]  }
 0x4f6   : > { %5044 = vmatprep.subr.bf16.mxu1 %v12846_v1  ;;  %v3965_v0 = vld [vmem:[#allocation3 + $0x20] sm:$0xfc]  ;;  %v15333_v1 = vld [vmem:[#allocation3 + $0x48] sm:$0xff] }
 0x4f8   : > { %4916 = vmatpush1.bf16.msra.mxu0 %v12841_v5  ;;  %v5145_v5 = vpack.c.bf16 %v5135_v61, %v5135_v61  ;;  %v12967_v61 = vld [vmem:[%s17018_s4 + $0xe80] ss:$16 sps:$4 sm:$0xff]  }
 0x4f9   : > { %5045 = vmatpush1.bf16.msra.mxu1 %v12844_v7  ;;  %4917 = vmatprep.subr.bf16.mxu0 %v12849_v12  ;;  %v5312_v7 = vshll.u32 %v5140_v58, 16  ;;  %v12910_v12 = vld [vmem:[%s17018_s4 + $0xd48] ss:$16 sps:$4 sm:$0xff]   ;;  %v12961_v58 = vld [vmem:[%s17018_s4 + $0xe60] ss:$16 sps:$4 sm:$0xff]  }
 0x4fa   : > { %5046 = vmatprep.subr.bf16.mxu1 %v12852_v15  ;;  %v12915_v15 = vld [vmem:[%s17018_s4 + $0xd64] ss:$16 sps:$4 sm:$0xff]  }
 0x4fc   : > { %4918 = vmatpush1.bf16.msra.mxu0 %v12847_v19  ;;  %v12918_v19 = vld [vmem:[%s17018_s4 + $0xd6c] ss:$16 sps:$4 sm:$0xff]  }
 0x4fd   : > { %5047 = vmatpush1.bf16.msra.mxu1 %v12850_v24  ;;  %4919 = vmatprep.subr.bf16.mxu0 %v12855_v27  ;;  %v3975_v24 = vpack.c.bf16 %v15333_v1, %v3965_v0  ;;  %v12913_v27 = vld [vmem:[%s17018_s4 + $0xd60] ss:$16 sps:$4 sm:$0xff]  }
 0x4fe   : > { %5048 = vmatprep.subr.bf16.mxu1 %v12858_v16  ;;  %v5311_v16 = vrot.slane %v5309_v55, 1  ;;  %v12975_v55 = vld [vmem:[%s17018_s4 + $0xea4] ss:$16 sps:$4 sm:$0xff]   ;;  %v12973_v0 = vld [vmem:[%s17018_s4 + $0xea0] ss:$16 sps:$4 sm:$0xff]  }
 0x500   : > { %4920 = vmatpush1.bf16.msra.mxu0 %v12853_v30  ;;  %v5314_v30 = vrot.slane %v5312_v7, 2  ;;  %v12981_v7 = vld [vmem:[%s17018_s4 + $0xec4] ss:$16 sps:$4 sm:$0xff]  }
 0x501   : > { %5049 = vmatpush1.bf16.msra.mxu1 %v12856_v32  ;;  %4921 = vmatprep.subr.bf16.mxu0 %v12861_v34  ;;  %v5317_v32 = vshll.u32 %v5145_v5, 16  ;;  %v12916_v34 = vld [vmem:[%s17018_s4 + $0xd68] ss:$16 sps:$4 sm:$0xff]  }
 0x502   : > { %5050 = vmatprep.subr.bf16.mxu1 %v12864_v35  ;;  %v12921_v35 = vld [vmem:[%s17018_s4 + $0xd84] ss:$16 sps:$4 sm:$0xff]   ;;  %v12976_v5 = vld [vmem:[%s17018_s4 + $0xea8] ss:$16 sps:$4 sm:$0xff]  }
 0x504   : > { %4922 = vmatpush1.bf16.msra.mxu0 %v12859_v8  ;;  %v12924_v8 = vld [vmem:[%s17018_s4 + $0xd8c] ss:$16 sps:$4 sm:$0xff]  }
 0x505   : > { %5051 = vmatpush1.bf16.msra.mxu1 %v12862_v11  ;;  %4923 = vmatprep.subr.bf16.mxu0 %v12867_v36  ;;  %v4130_v11 = vrot.slane %v3975_v24, 1  ;;  %v12919_v36 = vld [vmem:[%s17018_s4 + $0xd80] ss:$16 sps:$4 sm:$0xff]   ;;  %v12987_v24 = vld [vmem:[%s17018_s4 + $0xee4] ss:$16 sps:$4 sm:$0xff]  }
 0x506   : > { %5052 = vmatprep.subr.bf16.mxu1 %v12870_v38  ;;  %v5315_v38 = vor.u32 %v5314_v30, %v5311_v16  ;;  %v12985_v16 = vld [vmem:[%s17018_s4 + $0xee0] ss:$16 sps:$4 sm:$0xff]   ;;  %v12988_v30 = vld [vmem:[%s17018_s4 + $0xee8] ss:$16 sps:$4 sm:$0xff]  }
 0x508   : > { %4924 = vmatpush1.bf16.msra.mxu0 %v12865_v40  ;;  %v5319_v40 = vrot.slane %v5317_v32, 2  ;;  %v12993_v32 = vld [vmem:[%s17018_s4 + $0xf04] ss:$16 sps:$4 sm:$0xff]  }
 0x509   : > { %5053 = vmatpush1.bf16.msra.mxu1 %v12868_v41  ;;  %4925 = vmatprep.subr.bf16.mxu0 %v12873_v6  ;;  %v12922_v41 = vld [vmem:[%s17018_s4 + $0xd88] ss:$16 sps:$4 sm:$0xff]   ;;  %v12927_v6 = vld [vmem:[%s17018_s4 + $0xda4] ss:$16 sps:$4 sm:$0xff]  }
 0x50a   : > { %5054 = vmatprep.subr.bf16.mxu1 %v12876_v25  ;;  %v12930_v25 = vld [vmem:[%s17018_s4 + $0xdac] ss:$16 sps:$4 sm:$0xff]  }
 0x50c   : > { %4926 = vmatpush1.bf16.msra.mxu0 %v12871_v10  ;;  %v5320_v10 = vsel %vm5294_vm13, %v5315_v38, %v5319_v40  ;;  %v5127_v38 = vld [vmem:[#allocation3 + $0x18] sm:$0xf8] }
 0x50d   : > { %5055 = vmatpush1.bf16.msra.mxu1 %v12874_v37  ;;  %4927 = vmatprep.subr.bf16.mxu0 %v12879_v4  ;;  %v12925_v37 = vld [vmem:[%s17018_s4 + $0xda0] ss:$16 sps:$4 sm:$0xff]   ;;  %v12928_v4 = vld [vmem:[%s17018_s4 + $0xda8] ss:$16 sps:$4 sm:$0xff]   ;;  %v13002_v40 = vld [vmem:[%s17018_s4 + $0xf2c] ss:$16 sps:$4 sm:$0xff]  }
 0x50e   : > { %5056 = vmatprep.subr.bf16.mxu1 %v12882_v13  ;;  %v12933_v13 = vld [vmem:[%s17018_s4 + $0xdc4] ss:$16 sps:$4 sm:$0xff]  }
 0x510   : > { %4928 = vmatpush1.bf16.msra.mxu0 %v12877_v42  ;;  %v12936_v42 = vld [vmem:[%s17018_s4 + $0xdcc] ss:$16 sps:$4 sm:$0xff]  }
 0x511   : > { %5057 = vmatpush1.bf16.msra.mxu1 %v12880_v14  ;;  %4929 = vmatprep.subr.bf16.mxu0 %v12885_v43  ;;  %v12931_v14 = vld [vmem:[%s17018_s4 + $0xdc0] ss:$16 sps:$4 sm:$0xff]   ;;  %v12934_v43 = vld [vmem:[%s17018_s4 + $0xdc8] ss:$16 sps:$4 sm:$0xff]  }
 0x512   : > { %5058 = vmatprep.subr.bf16.mxu1 %v12888_v2  ;;  %v12939_v2 = vld [vmem:[%s17018_s4 + $0xde4] ss:$16 sps:$4 sm:$0xff]  }
 0x514   : > { %4930 = vmatpush1.bf16.msra.mxu0 %v12883_v44  ;;  %v12942_v44 = vld [vmem:[%s17018_s4 + $0xdec] ss:$16 sps:$4 sm:$0xff]  }
 0x515   : > { %5059 = vmatpush1.bf16.msra.mxu1 %v12886_v20  ;;  %4931 = vmatprep.subr.bf16.mxu0 %v12891_v63  ;;  %v12937_v20 = vld [vmem:[%s17018_s4 + $0xde0] ss:$16 sps:$4 sm:$0xff]   ;;  %v12940_v63 = vld [vmem:[%s17018_s4 + $0xde8] ss:$16 sps:$4 sm:$0xff]  }
 0x516   : > { %5060 = vmatprep.subr.bf16.mxu1 %v12894_v18  ;;  %v12945_v18 = vld [vmem:[%s17018_s4 + $0xe04] ss:$16 sps:$4 sm:$0xff]  }
 0x518   : > { %4932 = vmatpush1.bf16.msra.mxu0 %v12889_v45  ;;  %v12948_v45 = vld [vmem:[%s17018_s4 + $0xe0c] ss:$16 sps:$4 sm:$0xff]  }
 0x519   : > { %5061 = vmatpush1.bf16.msra.mxu1 %v12892_v47  ;;  %4944 = vmatprep.subr.bf16.mxu0 %v12897_v48  ;;  %v12946_v47 = vld [vmem:[%s17018_s4 + $0xe08] ss:$16 sps:$4 sm:$0xff]   ;;  %v12949_v48 = vld [vmem:[%s17018_s4 + $0xe20] ss:$16 sps:$4 sm:$0xff]  }
 0x51a   : > { %5073 = vmatprep.subr.bf16.mxu1 %v12900_v49  ;;  %v12952_v49 = vld [vmem:[%s17018_s4 + $0xe28] ss:$16 sps:$4 sm:$0xff]  }
 0x51b   : > { %4934 = vmatmul.mubr.bf16.vlgmr.msra.gmra.mrb[24].mxu0 %v4128_v52 }
 0x51c   : > { %5063 = vmatmul.mubr.bf16.vlgmr.msra.gmra.mrb[8].mxu1 %v4128_v52  ;;  %4945 = vmatpush1.bf16.msra.mxu0 %v12895_v50  ;;  %v12957_v50 = vld [vmem:[%s17018_s4 + $0xe44] ss:$16 sps:$4 sm:$0xff]   ;;  %v12960_v52 = vld [vmem:[%s17018_s4 + $0xe4c] ss:$16 sps:$4 sm:$0xff]  }
 0x51d   : > { %5074 = vmatpush1.bf16.msra.mxu1 %v12898_v53  ;;  %4946 = vmatprep.subr.bf16.mxu0 %v12903_v54  ;;  %v12955_v53 = vld [vmem:[%s17018_s4 + $0xe40] ss:$16 sps:$4 sm:$0xff]   ;;  %v12958_v54 = vld [vmem:[%s17018_s4 + $0xe48] ss:$16 sps:$4 sm:$0xff]  }
 0x51e   : > { %5075 = vmatprep.subr.bf16.mxu1 %v12906_v56  ;;  %4976 = vmatprep.mubr.bf16.mxu0 %v13604_v3  ;;  %v12963_v56 = vld [vmem:[%s17018_s4 + $0xe64] ss:$16 sps:$4 sm:$0xff]  }
 0x51f   : > { %5105 = vmatprep.mubr.bf16.mxu1 %v13604_v3 }
 0x520   : > { %4947 = vmatpush1.bf16.msra.mxu0 %v12901_v59  ;;  %v12964_v59 = vld [vmem:[%s17018_s4 + $0xe68] ss:$16 sps:$4 sm:$0xff]  }
 0x521   : > { %5076 = vmatpush1.bf16.msra.mxu1 %v12904_v51  ;;  %4948 = vmatprep.subr.bf16.mxu0 %v12909_v60  ;;  %v12969_v51 = vld [vmem:[%s17018_s4 + $0xe84] ss:$16 sps:$4 sm:$0xff]   ;;  %v12972_v60 = vld [vmem:[%s17018_s4 + $0xe8c] ss:$16 sps:$4 sm:$0xff]  }
 0x522   : > { %5077 = vmatprep.subr.bf16.mxu1 %v12912_v9  ;;  %v12970_v9 = vld [vmem:[%s17018_s4 + $0xe88] ss:$16 sps:$4 sm:$0xff]  }
 0x524   : > { %4949 = vmatpush1.bf16.msra.mxu0 %v12907_v62  ;;  %v12978_v62 = vld [vmem:[%s17018_s4 + $0xeac] ss:$16 sps:$4 sm:$0xff]  }
 0x525   : > { %5078 = vmatpush1.bf16.msra.mxu1 %v12910_v12  ;;  %4950 = vmatprep.subr.bf16.mxu0 %v12915_v15  ;;  %v12984_v12 = vld [vmem:[%s17018_s4 + $0xecc] ss:$16 sps:$4 sm:$0xff]   ;;  %v12979_v15 = vld [vmem:[%s17018_s4 + $0xec0] ss:$16 sps:$4 sm:$0xff]  }
 0x526   : > { %5079 = vmatprep.subr.bf16.mxu1 %v12918_v19  ;;  %v12982_v19 = vld [vmem:[%s17018_s4 + $0xec8] ss:$16 sps:$4 sm:$0xff]  }
 0x528   : > { %4951 = vmatpush1.bf16.msra.mxu0 %v12913_v27  ;;  %v12990_v27 = vld [vmem:[%s17018_s4 + $0xeec] ss:$16 sps:$4 sm:$0xff]  }
 0x529   : > { %5080 = vmatpush1.bf16.msra.mxu1 %v12916_v34  ;;  %6087 = vmatprep.subr.bf16.mxu0 %v12921_v35  ;;  %v12996_v34 = vld [vmem:[%s17018_s4 + $0xf0c] ss:$16 sps:$4 sm:$0xff]   ;;  %v12991_v35 = vld [vmem:[%s17018_s4 + $0xf00] ss:$16 sps:$4 sm:$0xff]  }
 0x52a   : > { %6216 = vmatprep.subr.bf16.mxu1 %v12924_v8  ;;  %v5124_v8 = vld [vmem:[#allocation3] sm:$0xf8] }
 0x52b   : > { %10655 = vmatmul.mubr.msk.bf16.vlgmr.msra.gmra.mrb[24].mxu0 %vm1566_vm8, %v4130_v11 }
 0x52c   : > { %10656 = vmatmul.mubr.msk.bf16.vlgmr.msra.gmra.mrb[8].mxu1 %vm1566_vm8, %v4130_v11  ;;  %6088 = vmatpush1.bf16.msra.mxu0 %v12919_v36  ;;  %v12994_v11 = vld [vmem:[%s17018_s4 + $0xf08] ss:$16 sps:$4 sm:$0xff]   ;;  %v12999_v36 = vld [vmem:[%s17018_s4 + $0xf24] ss:$16 sps:$4 sm:$0xff]  }
 0x52d   : > { %6119 = vmatprep.mubr.bf16.mxu0 %v5320_v10  ;;  %6217 = vmatpush1.bf16.msra.mxu1 %v12922_v41  ;;  %v5139_v41 = vpack.c.bf16 %v15090_v39, %v5124_v8  ;;  %v13008_v39 = vld [vmem:[%s17018_s4 + $0xf4c] ss:$16 sps:$4 sm:$0xff]   ;;  %v13042_v8 = vld [vmem:[%s17018_s4 + $0x1008] ss:$16 sps:$4 sm:$0xff]  }
 0x52e   : > { %6248 = vmatprep.mubr.bf16.mxu1 %v5320_v10  ;;  %6089 = vmatprep.subr.bf16.mxu0 %v12927_v6  ;;  %v5134_v6 = vld [vmem:[#allocation3 + $0x50] sm:$0x1]  ;;  %v5142_v10 = vpack.c.bf16 %v15095_v33, %v5127_v38 }
 0x52f   : > { %6218 = vmatprep.subr.bf16.mxu1 %v12930_v25  ;;  %v12997_v25 = vld [vmem:[%s17018_s4 + $0xf20] ss:$16 sps:$4 sm:$0xff]  }
 0x530   : > { %6090 = vmatpush1.bf16.msra.mxu0 %v12925_v37  ;;  %v13000_v37 = vld [vmem:[%s17018_s4 + $0xf28] ss:$16 sps:$4 sm:$0xff]   ;;  %v13003_v33 = vld [vmem:[%s17018_s4 + $0xf40] ss:$16 sps:$4 sm:$0xff]  }
 0x531   : > { %6219 = vmatpush1.bf16.msra.mxu1 %v12928_v4  ;;  %6091 = vmatprep.subr.bf16.mxu0 %v12933_v13  ;;  %v13005_v4 = vld [vmem:[%s17018_s4 + $0xf44] ss:$16 sps:$4 sm:$0xff]   ;;  %v5137_v13 = vld [vmem:[#allocation3 + $0x68] sm:$0x1]  ;;  %v13045_v38 = vld [vmem:[%s17018_s4 + $0x1020] ss:$16 sps:$4 sm:$0xff]  }
 0x532   : > { %6220 = vmatprep.subr.bf16.mxu1 %v12936_v42  ;;  %v5144_v42 = vpack.c.bf16 %v5134_v6, %v5134_v6  ;;  %v13056_v6 = vld [vmem:[%s17018_s4 + $0x104c] ss:$16 sps:$4 sm:$0xff]  }
 0x534   : > { %6092 = vmatpush1.bf16.msra.mxu0 %v12931_v14  ;;  %v5296_v14 = vshrl.u32 %v5139_v41, 16 }
 0x535   : > { %6221 = vmatpush1.bf16.msra.mxu1 %v12934_v43  ;;  %6093 = vmatprep.subr.bf16.mxu0 %v12939_v2  ;;  %v5299_v43 = vshll.u32 %v5139_v41, 16  ;;  %v5147_v2 = vpack.c.bf16 %v5137_v13, %v5137_v13  ;;  %v13053_v41 = vld [vmem:[%s17018_s4 + $0x1044] ss:$16 sps:$4 sm:$0xff]   ;;  %v13057_v13 = vld [vmem:[%s17018_s4 + $0x1060] ss:$16 sps:$4 sm:$0xff]  }
 0x536   : > { %6222 = vmatprep.subr.bf16.mxu1 %v12942_v44  ;;  %v5335_v44 = vshrl.u32 %v5142_v10, 16 }
 0x538   : > { %6094 = vmatpush1.bf16.msra.mxu0 %v12937_v20  ;;  %v5338_v20 = vshll.u32 %v5142_v10, 16  ;;  %v13054_v10 = vld [vmem:[%s17018_s4 + $0x1048] ss:$16 sps:$4 sm:$0xff]  }
 0x539   : > { %6223 = vmatpush1.bf16.msra.mxu1 %v12940_v63  ;;  %6095 = vmatprep.subr.bf16.mxu0 %v12945_v18  ;;  %v13006_v63 = vld [vmem:[%s17018_s4 + $0xf48] ss:$16 sps:$4 sm:$0xff]   ;;  %v13011_v18 = vld [vmem:[%s17018_s4 + $0xf64] ss:$16 sps:$4 sm:$0xff]  }
 0x53a   : > { %6224 = vmatprep.subr.bf16.mxu1 %v12948_v45  ;;  %v13014_v45 = vld [vmem:[%s17018_s4 + $0xf6c] ss:$16 sps:$4 sm:$0xff]  }
 0x53c   : > { %6096 = vmatpush1.bf16.msra.mxu0 %v12943_v46  ;;  %v5298_v46 = vrot.slane %v5296_v14, 1  ;;  %v13068_v14 = vld [vmem:[%s17018_s4 + $0x108c] ss:$16 sps:$4 sm:$0xff]  }
 0x53d   : > { %6225 = vmatpush1.bf16.msra.mxu1 %v12946_v47  ;;  %6097 = vmatprep.subr.bf16.mxu0 %v12951_v29  ;;  %v5301_v47 = vrot.slane %v5299_v43, 2  ;;  %v5304_v29 = vshll.u32 %v5144_v42, 16  ;;  %v13065_v42 = vld [vmem:[%s17018_s4 + $0x1084] ss:$16 sps:$4 sm:$0xff]   ;;  %v13063_v43 = vld [vmem:[%s17018_s4 + $0x1080] ss:$16 sps:$4 sm:$0xff]  }
 0x53e   : > { %6226 = vmatprep.subr.bf16.mxu1 %v12954_v17  ;;  %v13009_v17 = vld [vmem:[%s17018_s4 + $0xf60] ss:$16 sps:$4 sm:$0xff]  }
 0x540   : > { %6098 = vmatpush1.bf16.msra.mxu0 %v12949_v48  ;;  %v5337_v48 = vrot.slane %v5335_v44, 1  ;;  %v13074_v44 = vld [vmem:[%s17018_s4 + $0x10ac] ss:$16 sps:$4 sm:$0xff]  }
 0x541   : > { %6227 = vmatpush1.bf16.msra.mxu1 %v12952_v49  ;;  %6099 = vmatprep.subr.bf16.mxu0 %v12957_v50  ;;  %v5340_v49 = vrot.slane %v5338_v20, 2  ;;  %v5343_v50 = vshll.u32 %v5147_v2, 16  ;;  %v13071_v2 = vld [vmem:[%s17018_s4 + $0x10a4] ss:$16 sps:$4 sm:$0xff]   ;;  %v13069_v20 = vld [vmem:[%s17018_s4 + $0x10a0] ss:$16 sps:$4 sm:$0xff]  }
 0x542   : > { %6228 = vmatprep.subr.bf16.mxu1 %v12960_v52  ;;  %v13012_v52 = vld [vmem:[%s17018_s4 + $0xf68] ss:$16 sps:$4 sm:$0xff]  }
 0x544   : > { %6100 = vmatpush1.bf16.msra.mxu0 %v12955_v53  ;;  %v13017_v53 = vld [vmem:[%s17018_s4 + $0xf84] ss:$16 sps:$4 sm:$0xff]  }
 0x545   : > { %6229 = vmatpush1.bf16.msra.mxu1 %v12958_v54  ;;  %6101 = vmatprep.subr.bf16.mxu0 %v12963_v56  ;;  %v5302_v54 = vor.u32 %v5301_v47, %v5298_v46  ;;  %v5306_v56 = vrot.slane %v5304_v29, 2  ;;  %v13075_v46 = vld [vmem:[%s17018_s4 + $0x10c0] ss:$16 sps:$4 sm:$0xff]   ;;  %v13078_v47 = vld [vmem:[%s17018_s4 + $0x10c8] ss:$16 sps:$4 sm:$0xff]  }
 0x546   : > { %6230 = vmatprep.subr.bf16.mxu1 %v12966_v57  ;;  %v13020_v57 = vld [vmem:[%s17018_s4 + $0xf8c] ss:$16 sps:$4 sm:$0xff]   ;;  %v13083_v29 = vld [vmem:[%s17018_s4 + $0x10e4] ss:$16 sps:$4 sm:$0xff]  }
 0x548   : > { %6102 = vmatpush1.bf16.msra.mxu0 %v12961_v58  ;;  %v13015_v58 = vld [vmem:[%s17018_s4 + $0xf80] ss:$16 sps:$4 sm:$0xff]  }
 0x549   : > { %6231 = vmatpush1.bf16.msra.mxu1 %v12964_v59  ;;  %6103 = vmatprep.subr.bf16.mxu0 %v12969_v51  ;;  %v5341_v59 = vor.u32 %v5340_v49, %v5337_v48  ;;  %v5345_v51 = vrot.slane %v5343_v50, 2  ;;  %v13081_v48 = vld [vmem:[%s17018_s4 + $0x10e0] ss:$16 sps:$4 sm:$0xff]   ;;  %v13084_v49 = vld [vmem:[%s17018_s4 + $0x10e8] ss:$16 sps:$4 sm:$0xff]  }
 0x54a   : > { %6232 = vmatprep.subr.bf16.mxu1 %v12972_v60  ;;  %v13018_v60 = vld [vmem:[%s17018_s4 + $0xf88] ss:$16 sps:$4 sm:$0xff]   ;;  %v13089_v50 = vld [vmem:[%s17018_s4 + $0x1104] ss:$16 sps:$4 sm:$0xff]  }
 0x54c   : > { %6104 = vmatpush1.bf16.msra.mxu0 %v12967_v61  ;;  %v5307_v61 = vsel %vm5294_vm13, %v5302_v54, %v5306_v56  ;;  %v13090_v54 = vld [vmem:[%s17018_s4 + $0x1108] ss:$16 sps:$4 sm:$0xff]   ;;  %v13095_v56 = vld [vmem:[%s17018_s4 + $0x1124] ss:$16 sps:$4 sm:$0xff]  }
 0x54d   : > { %6233 = vmatpush1.bf16.msra.mxu1 %v12970_v9  ;;  %6105 = vmatprep.subr.bf16.mxu0 %v12975_v55  ;;  %v13023_v9 = vld [vmem:[%s17018_s4 + $0xfa4] ss:$16 sps:$4 sm:$0xff]   ;;  %v13026_v55 = vld [vmem:[%s17018_s4 + $0xfac] ss:$16 sps:$4 sm:$0xff]  }
 0x54e   : > { %6234 = vmatprep.subr.bf16.mxu1 %v12978_v62  ;;  %v5346_v62 = vsel %vm5294_vm13, %v5341_v59, %v5345_v51  ;;  %v5136_v51 = vld [vmem:[#allocation3 + $0x60] sm:$0x1] }
 0x550   : > { %6106 = vmatpush1.bf16.msra.mxu0 %v12973_v0  ;;  %v13021_v0 = vld [vmem:[%s17018_s4 + $0xfa0] ss:$16 sps:$4 sm:$0xff]  }
 0x551   : > { %6235 = vmatpush1.bf16.msra.mxu1 %v12976_v5  ;;  %6107 = vmatprep.subr.bf16.mxu0 %v12981_v7  ;;  %v13024_v5 = vld [vmem:[%s17018_s4 + $0xfa8] ss:$16 sps:$4 sm:$0xff]   ;;  %v13029_v7 = vld [vmem:[%s17018_s4 + $0xfc4] ss:$16 sps:$4 sm:$0xff]  }
 0x552   : > { %6236 = vmatprep.subr.bf16.mxu1 %v12984_v12  ;;  %v13032_v12 = vld [vmem:[%s17018_s4 + $0xfcc] ss:$16 sps:$4 sm:$0xff]  }
 0x554   : > { %6108 = vmatpush1.bf16.msra.mxu0 %v12979_v15  ;;  %v13027_v15 = vld [vmem:[%s17018_s4 + $0xfc0] ss:$16 sps:$4 sm:$0xff]  }
 0x555   : > { %6237 = vmatpush1.bf16.msra.mxu1 %v12982_v19  ;;  %6109 = vmatprep.subr.bf16.mxu0 %v12987_v24  ;;  %v13030_v19 = vld [vmem:[%s17018_s4 + $0xfc8] ss:$16 sps:$4 sm:$0xff]   ;;  %v13035_v24 = vld [vmem:[%s17018_s4 + $0xfe4] ss:$16 sps:$4 sm:$0xff]  }
 0x556   : > { %6238 = vmatprep.subr.bf16.mxu1 %v12990_v27  ;;  %v13038_v27 = vld [vmem:[%s17018_s4 + $0xfec] ss:$16 sps:$4 sm:$0xff]  }
 0x558   : > { %6110 = vmatpush1.bf16.msra.mxu0 %v12985_v16  ;;  %v13033_v16 = vld [vmem:[%s17018_s4 + $0xfe0] ss:$16 sps:$4 sm:$0xff]  }
 0x559   : > { %6239 = vmatpush1.bf16.msra.mxu1 %v12988_v30  ;;  %6111 = vmatprep.subr.bf16.mxu0 %v12993_v32  ;;  %v13036_v30 = vld [vmem:[%s17018_s4 + $0xfe8] ss:$16 sps:$4 sm:$0xff]   ;;  %v13041_v32 = vld [vmem:[%s17018_s4 + $0x1004] ss:$16 sps:$4 sm:$0xff]  }
 0x55a   : > { %6240 = vmatprep.subr.bf16.mxu1 %v12996_v34  ;;  %v13044_v34 = vld [vmem:[%s17018_s4 + $0x100c] ss:$16 sps:$4 sm:$0xff]  }
 0x55c   : > { %6112 = vmatpush1.bf16.msra.mxu0 %v12991_v35  ;;  %v13039_v35 = vld [vmem:[%s17018_s4 + $0x1000] ss:$16 sps:$4 sm:$0xff]  }
 0x55d   : > { %6241 = vmatpush1.bf16.msra.mxu1 %v12994_v11  ;;  %6113 = vmatprep.subr.bf16.mxu0 %v12999_v36  ;;  %v13047_v11 = vld [vmem:[%s17018_s4 + $0x1024] ss:$16 sps:$4 sm:$0xff]   ;;  %v13050_v36 = vld [vmem:[%s17018_s4 + $0x102c] ss:$16 sps:$4 sm:$0xff]  }
 0x55e   : > { %6242 = vmatprep.subr.bf16.mxu1 %v13002_v40  ;;  %v13048_v40 = vld [vmem:[%s17018_s4 + $0x1028] ss:$16 sps:$4 sm:$0xff]  }
 0x560   : > { %6114 = vmatpush1.bf16.msra.mxu0 %v12997_v25  ;;  %v13051_v25 = vld [vmem:[%s17018_s4 + $0x1040] ss:$16 sps:$4 sm:$0xff]  }
 0x561   : > { %6243 = vmatpush1.bf16.msra.mxu1 %v13000_v37  ;;  %6115 = vmatprep.subr.bf16.mxu0 %v13005_v4  ;;  %v13059_v37 = vld [vmem:[%s17018_s4 + $0x1064] ss:$16 sps:$4 sm:$0xff]   ;;  %v13062_v4 = vld [vmem:[%s17018_s4 + $0x106c] ss:$16 sps:$4 sm:$0xff]  }
 0x562   : > { %6244 = vmatprep.subr.bf16.mxu1 %v13008_v39  ;;  %v13060_v39 = vld [vmem:[%s17018_s4 + $0x1068] ss:$16 sps:$4 sm:$0xff]  }
 0x564   : > { %6116 = vmatpush1.bf16.msra.mxu0 %v13003_v33  ;;  %v13066_v33 = vld [vmem:[%s17018_s4 + $0x1088] ss:$16 sps:$4 sm:$0xff]  }
 0x565   : > { %6245 = vmatpush1.bf16.msra.mxu1 %v13006_v63  ;;  %6117 = vmatprep.subr.bf16.mxu0 %v13011_v18  ;;  %v13072_v63 = vld [vmem:[%s17018_s4 + $0x10a8] ss:$16 sps:$4 sm:$0xff]   ;;  %v13077_v18 = vld [vmem:[%s17018_s4 + $0x10c4] ss:$16 sps:$4 sm:$0xff]  }
 0x566   : > { %6246 = vmatprep.subr.bf16.mxu1 %v13014_v45  ;;  %v13080_v45 = vld [vmem:[%s17018_s4 + $0x10cc] ss:$16 sps:$4 sm:$0xff]  }
 0x568   : > { %6118 = vmatpush1.bf16.msra.mxu0 %v13009_v17  ;;  %v13086_v17 = vld [vmem:[%s17018_s4 + $0x10ec] ss:$16 sps:$4 sm:$0xff]  }
 0x569   : > { %6247 = vmatpush1.bf16.msra.mxu1 %v13012_v52  ;;  %6130 = vmatprep.subr.bf16.mxu0 %v13017_v53  ;;  %v13092_v52 = vld [vmem:[%s17018_s4 + $0x110c] ss:$16 sps:$4 sm:$0xff]   ;;  %v13087_v53 = vld [vmem:[%s17018_s4 + $0x1100] ss:$16 sps:$4 sm:$0xff]  }
 0x56a   : > { %6259 = vmatprep.subr.bf16.mxu1 %v13020_v57  ;;  %v5126_v57 = vld [vmem:[#allocation3 + $0x10] sm:$0xf8] }
 0x56b   : > { %6120 = vmatmul.mubr.bf16.vlgmr.msra.gmra.mrb[24].mxu0 %v5307_v61  ;;  %v5141_v59 = vpack.c.bf16 %v15288_v31, %v5126_v57  ;;  %v13104_v31 = vld [vmem:[%s17018_s4 + $0x114c] ss:$16 sps:$4 sm:$0xff]   ;;  %v13135_v57 = vld [vmem:[%s17018_s4 + $0x1200] ss:$16 sps:$4 sm:$0xff]  }
 0x56c   : > { %6249 = vmatmul.mubr.bf16.vlgmr.msra.gmra.mrb[8].mxu1 %v5307_v61  ;;  %6131 = vmatpush1.bf16.msra.mxu0 %v13015_v58  ;;  %v13098_v58 = vld [vmem:[%s17018_s4 + $0x112c] ss:$16 sps:$4 sm:$0xff]   ;;  %v13096_v61 = vld [vmem:[%s17018_s4 + $0x1128] ss:$16 sps:$4 sm:$0xff]  }
 0x56d   : > { %6162 = vmatprep.mubr.bf16.mxu0 %v5346_v62  ;;  %6260 = vmatpush1.bf16.msra.mxu1 %v13018_v60  ;;  %v13093_v60 = vld [vmem:[%s17018_s4 + $0x1120] ss:$16 sps:$4 sm:$0xff]  }
 0x56e   : > { %6291 = vmatprep.mubr.bf16.mxu1 %v5346_v62  ;;  %6132 = vmatprep.subr.bf16.mxu0 %v13023_v9  ;;  %v13101_v9 = vld [vmem:[%s17018_s4 + $0x1144] ss:$16 sps:$4 sm:$0xff]   ;;  %v5322_v62 = vshrl.u32 %v5141_v59, 16 }
 0x56f   : > { %6261 = vmatprep.subr.bf16.mxu1 %v13026_v55  ;;  %v5146_v55 = vpack.c.bf16 %v5136_v51, %v5136_v51  ;;  %v13138_v51 = vld [vmem:[%s17018_s4 + $0x1208] ss:$16 sps:$4 sm:$0xff]  }
 0x570   : > { %6133 = vmatpush1.bf16.msra.mxu0 %v13021_v0  ;;  %v5325_v0 = vshll.u32 %v5141_v59, 16 }
 0x571   : > { %6262 = vmatpush1.bf16.msra.mxu1 %v13024_v5  ;;  %6134 = vmatprep.subr.bf16.mxu0 %v13029_v7  ;;  %v13099_v5 = vld [vmem:[%s17018_s4 + $0x1140] ss:$16 sps:$4 sm:$0xff]   ;;  %v13102_v7 = vld [vmem:[%s17018_s4 + $0x1148] ss:$16 sps:$4 sm:$0xff]  }
 0x572   : > { %6263 = vmatprep.subr.bf16.mxu1 %v13032_v12  ;;  %v13107_v12 = vld [vmem:[%s17018_s4 + $0x1164] ss:$16 sps:$4 sm:$0xff]  }
 0x574   : > { %6135 = vmatpush1.bf16.msra.mxu0 %v13027_v15  ;;  %v13110_v15 = vld [vmem:[%s17018_s4 + $0x116c] ss:$16 sps:$4 sm:$0xff]  }
 0x575   : > { %6264 = vmatpush1.bf16.msra.mxu1 %v13030_v19  ;;  %6136 = vmatprep.subr.bf16.mxu0 %v13035_v24  ;;  %v5324_v19 = vrot.slane %v5322_v62, 1  ;;  %v5327_v24 = vrot.slane %v5325_v0, 2  ;;  %v13149_v62 = vld [vmem:[%s17018_s4 + $0x1244] ss:$16 sps:$4 sm:$0xff]   ;;  %v13152_v0 = vld [vmem:[%s17018_s4 + $0x124c] ss:$16 sps:$4 sm:$0xff]  }
 0x576   : > { %6265 = vmatprep.subr.bf16.mxu1 %v13038_v27  ;;  %v5330_v27 = vshll.u32 %v5146_v55, 16  ;;  %v13144_v55 = vld [vmem:[%s17018_s4 + $0x1228] ss:$16 sps:$4 sm:$0xff]  }
 0x578   : > { %6137 = vmatpush1.bf16.msra.mxu0 %v13033_v16  ;;  %v13105_v16 = vld [vmem:[%s17018_s4 + $0x1160] ss:$16 sps:$4 sm:$0xff]  }
 0x579   : > { %6266 = vmatpush1.bf16.msra.mxu1 %v13036_v30  ;;  %6138 = vmatprep.subr.bf16.mxu0 %v13041_v32  ;;  %v13108_v30 = vld [vmem:[%s17018_s4 + $0x1168] ss:$16 sps:$4 sm:$0xff]   ;;  %v13113_v32 = vld [vmem:[%s17018_s4 + $0x1184] ss:$16 sps:$4 sm:$0xff]  }
 0x57a   : > { %6267 = vmatprep.subr.bf16.mxu1 %v13044_v34  ;;  %v5128_v34 = vld [vmem:[#allocation3 + $0x20] sm:$0xf8] }
 0x57c   : > { %6139 = vmatpush1.bf16.msra.mxu0 %v13039_v35  ;;  %v5328_v35 = vor.u32 %v5327_v24, %v5324_v19  ;;  %v13153_v19 = vld [vmem:[%s17018_s4 + $0x1260] ss:$16 sps:$4 sm:$0xff]   ;;  %v13156_v24 = vld [vmem:[%s17018_s4 + $0x1268] ss:$16 sps:$4 sm:$0xff]  }
 0x57d   : > { %6268 = vmatpush1.bf16.msra.mxu1 %v13042_v8  ;;  %6140 = vmatprep.subr.bf16.mxu0 %v13047_v11  ;;  %v5332_v8 = vrot.slane %v5330_v27, 2  ;;  %v13116_v11 = vld [vmem:[%s17018_s4 + $0x118c] ss:$16 sps:$4 sm:$0xff]   ;;  %v13161_v27 = vld [vmem:[%s17018_s4 + $0x1284] ss:$16 sps:$4 sm:$0xff]  }
 0x57e   : > { %6269 = vmatprep.subr.bf16.mxu1 %v13050_v36  ;;  %v13111_v36 = vld [vmem:[%s17018_s4 + $0x1180] ss:$16 sps:$4 sm:$0xff]  }
 0x580   : > { %6141 = vmatpush1.bf16.msra.mxu0 %v13045_v38  ;;  %v5143_v38 = vpack.c.bf16 %v15333_v1, %v5128_v34  ;;  %v13117_v1 = vld [vmem:[%s17018_s4 + $0x11a0] ss:$16 sps:$4 sm:$0xff]   ;;  %v13167_v34 = vld [vmem:[%s17018_s4 + $0x12a4] ss:$16 sps:$4 sm:$0xff]  }
 0x581   : > { %6270 = vmatpush1.bf16.msra.mxu1 %v13048_v40  ;;  %6142 = vmatprep.subr.bf16.mxu0 %v13053_v41  ;;  %v13114_v40 = vld [vmem:[%s17018_s4 + $0x1188] ss:$16 sps:$4 sm:$0xff]   ;;  %v13119_v41 = vld [vmem:[%s17018_s4 + $0x11a4] ss:$16 sps:$4 sm:$0xff]  }
 0x582   : > { %6271 = vmatprep.subr.bf16.mxu1 %v13056_v6  ;;  %v5138_v6 = vld [vmem:[#allocation3 + $0x70] sm:$0x1] }
 0x584   : > { %6143 = vmatpush1.bf16.msra.mxu0 %v13051_v25  ;;  %v5333_v25 = vsel %vm5294_vm13, %v5328_v35, %v5332_v8  ;;  %v13170_v35 = vld [vmem:[%s17018_s4 + $0x12ac] ss:$16 sps:$4 sm:$0xff]   ;;  %v13165_v8 = vld [vmem:[%s17018_s4 + $0x12a0] ss:$16 sps:$4 sm:$0xff]  }
 0x585   : > { %6272 = vmatpush1.bf16.msra.mxu1 %v13054_v10  ;;  %6144 = vmatprep.subr.bf16.mxu0 %v13059_v37  ;;  %v13122_v10 = vld [vmem:[%s17018_s4 + $0x11ac] ss:$16 sps:$4 sm:$0xff]   ;;  %v5148_v37 = vpack.c.bf16 %v5138_v6, %v5138_v6  ;;  %v13179_v6 = vld [vmem:[%s17018_s4 + $0x12e4] ss:$16 sps:$4 sm:$0xff]  }
 0x586   : > { %6273 = vmatprep.subr.bf16.mxu1 %v13062_v4  ;;  %v5348_v4 = vshrl.u32 %v5143_v38, 16 }
 0x588   : > { %6145 = vmatpush1.bf16.msra.mxu0 %v13057_v13  ;;  %v5351_v13 = vshll.u32 %v5143_v38, 16  ;;  %v13176_v38 = vld [vmem:[%s17018_s4 + $0x12cc] ss:$16 sps:$4 sm:$0xff]  }
 0x589   : > { %6274 = vmatpush1.bf16.msra.mxu1 %v13060_v39  ;;  %6146 = vmatprep.subr.bf16.mxu0 %v13065_v42  ;;  %v13120_v39 = vld [vmem:[%s17018_s4 + $0x11a8] ss:$16 sps:$4 sm:$0xff]   ;;  %v13125_v42 = vld [vmem:[%s17018_s4 + $0x11c4] ss:$16 sps:$4 sm:$0xff]  }
 0x58a   : > { %6275 = vmatprep.subr.bf16.mxu1 %v13068_v14  ;;  %v13128_v14 = vld [vmem:[%s17018_s4 + $0x11cc] ss:$16 sps:$4 sm:$0xff]  }
 0x58c   : > { %6147 = vmatpush1.bf16.msra.mxu0 %v13063_v43  ;;  %v13123_v43 = vld [vmem:[%s17018_s4 + $0x11c0] ss:$16 sps:$4 sm:$0xff]  }
 0x58d   : > { %6276 = vmatpush1.bf16.msra.mxu1 %v13066_v33  ;;  %6148 = vmatprep.subr.bf16.mxu0 %v13071_v2  ;;  %v5350_v33 = vrot.slane %v5348_v4, 1  ;;  %v5353_v2 = vrot.slane %v5351_v13, 2  ;;  %v13188_v4 = vld [vmem:[%s17018_s4 + $0x130c] ss:$16 sps:$4 sm:$0xff]   ;;  %v13183_v13 = vld [vmem:[%s17018_s4 + $0x1300] ss:$16 sps:$4 sm:$0xff]  }
 0x58e   : > { %6277 = vmatprep.subr.bf16.mxu1 %v13074_v44  ;;  %v5356_v44 = vshll.u32 %v5148_v37, 16  ;;  %v13185_v37 = vld [vmem:[%s17018_s4 + $0x1304] ss:$16 sps:$4 sm:$0xff]  }
 0x590   : > { %6149 = vmatpush1.bf16.msra.mxu0 %v13069_v20  ;;  %v13126_v20 = vld [vmem:[%s17018_s4 + $0x11c8] ss:$16 sps:$4 sm:$0xff]  }
 0x591   : > { %6278 = vmatpush1.bf16.msra.mxu1 %v13072_v63  ;;  %6150 = vmatprep.subr.bf16.mxu0 %v13077_v18  ;;  %v13131_v63 = vld [vmem:[%s17018_s4 + $0x11e4] ss:$16 sps:$4 sm:$0xff]   ;;  %v6359_v18 = vld [vmem:[#allocation3 + $0x58] sm:$0x3] }
 0x592   : > { %6279 = vmatprep.subr.bf16.mxu1 %v13080_v45  ;;  %v13134_v45 = vld [vmem:[%s17018_s4 + $0x11ec] ss:$16 sps:$4 sm:$0xff]  }
 0x594   : > { %6151 = vmatpush1.bf16.msra.mxu0 %v13075_v46  ;;  %v6354_v46 = vld [vmem:[#allocation3 + $0x8] sm:$0xf0] }
 0x595   : > { %6280 = vmatpush1.bf16.msra.mxu1 %v13078_v47  ;;  %6152 = vmatprep.subr.bf16.mxu0 %v13083_v29  ;;  %v13129_v47 = vld [vmem:[%s17018_s4 + $0x11e0] ss:$16 sps:$4 sm:$0xff]   ;;  %v5354_v29 = vor.u32 %v5353_v2, %v5350_v33  ;;  %v13192_v33 = vld [vmem:[%s17018_s4 + $0x1328] ss:$16 sps:$4 sm:$0xff]   ;;  %v13197_v2 = vld [vmem:[%s17018_s4 + $0x1344] ss:$16 sps:$4 sm:$0xff]  }
 0x596   : > { %6281 = vmatprep.subr.bf16.mxu1 %v13086_v17  ;;  %v5358_v17 = vrot.slane %v5356_v44, 2  ;;  %v13200_v44 = vld [vmem:[%s17018_s4 + $0x134c] ss:$16 sps:$4 sm:$0xff]  }
 0x598   : > { %6153 = vmatpush1.bf16.msra.mxu0 %v13081_v48  ;;  %v13534_v48 = vld [vmem:[#allocation3 + $0x30] sm:$0xff] }
 0x599   : > { %6282 = vmatpush1.bf16.msra.mxu1 %v13084_v49  ;;  %6154 = vmatprep.subr.bf16.mxu0 %v13089_v50  ;;  %v6364_v49 = vpack.c.bf16 %v13534_v48, %v6354_v46  ;;  %v6369_v50 = vpack.c.bf16 %v6359_v18, %v6359_v18  ;;  %v13203_v18 = vld [vmem:[%s17018_s4 + $0x1364] ss:$16 sps:$4 sm:$0xff]   ;;  %v13201_v46 = vld [vmem:[%s17018_s4 + $0x1360] ss:$16 sps:$4 sm:$0xff]  }
 0x59a   : > { %6283 = vmatprep.subr.bf16.mxu1 %v13092_v52  ;;  %v13132_v52 = vld [vmem:[%s17018_s4 + $0x11e8] ss:$16 sps:$4 sm:$0xff]   ;;  %v13207_v48 = vld [vmem:[%s17018_s4 + $0x1380] ss:$16 sps:$4 sm:$0xff]  }
 0x59b   : > { %v6533_v59 = vrot.slane %v6369_v50, 2  ;;  %v13215_v50 = vld [vmem:[%s17018_s4 + $0x13a4] ss:$16 sps:$4 sm:$0xff]  }
 0x59c   : > { %6155 = vmatpush1.bf16.msra.mxu0 %v13087_v53  ;;  %v13137_v53 = vld [vmem:[%s17018_s4 + $0x1204] ss:$16 sps:$4 sm:$0xff]  }
 0x59d   : > { %6284 = vmatpush1.bf16.msra.mxu1 %v13090_v54  ;;  %6156 = vmatprep.subr.bf16.mxu0 %v13095_v56  ;;  %v13140_v54 = vld [vmem:[%s17018_s4 + $0x120c] ss:$16 sps:$4 sm:$0xff]   ;;  %v5359_v56 = vsel %vm5294_vm13, %v5354_v29, %v5358_v17  ;;  %v13209_v29 = vld [vmem:[%s17018_s4 + $0x1384] ss:$16 sps:$4 sm:$0xff]  }
 0x59e   : > { %6285 = vmatprep.subr.bf16.mxu1 %v13098_v58  ;;  %v6532_v58 = vrot.slane %v6364_v49, 2  ;;  %v13212_v17 = vld [vmem:[%s17018_s4 + $0x138c] ss:$16 sps:$4 sm:$0xff]   ;;  %v13210_v49 = vld [vmem:[%s17018_s4 + $0x1388] ss:$16 sps:$4 sm:$0xff]  }
 0x5a0   : > { %6157 = vmatpush1.bf16.msra.mxu0 %v13093_v60  ;;  %v13143_v60 = vld [vmem:[%s17018_s4 + $0x1224] ss:$16 sps:$4 sm:$0xff]  }
 0x5a1   : > { %6286 = vmatpush1.bf16.msra.mxu1 %v13096_v61  ;;  %6158 = vmatprep.subr.bf16.mxu0 %v13101_v9  ;;  %v13146_v61 = vld [vmem:[%s17018_s4 + $0x122c] ss:$16 sps:$4 sm:$0xff]   ;;  %v6534_v9 = vsel %vm1461_vm6, %v6532_v58, %v6533_v59  ;;  %v6358_v58 = vld [vmem:[#allocation3 + $0x50] sm:$0x3] }
 0x5a2   : > { %6287 = vmatprep.subr.bf16.mxu1 %v13104_v31  ;;  %v13141_v31 = vld [vmem:[%s17018_s4 + $0x1220] ss:$16 sps:$4 sm:$0xff]  }
 0x5a3   : > { %v13219_v59 = vld [vmem:[%s17018_s4 + $0x13c0] ss:$16 sps:$4 sm:$0xff]  }
 0x5a4   : > { %6159 = vmatpush1.bf16.msra.mxu0 %v13099_v5  ;;  %v13147_v5 = vld [vmem:[%s17018_s4 + $0x1240] ss:$16 sps:$4 sm:$0xff]  }
 0x5a5   : > { %6288 = vmatpush1.bf16.msra.mxu1 %v13102_v7  ;;  %6160 = vmatprep.subr.bf16.mxu0 %v13107_v12  ;;  %v13150_v7 = vld [vmem:[%s17018_s4 + $0x1248] ss:$16 sps:$4 sm:$0xff]   ;;  %v13155_v12 = vld [vmem:[%s17018_s4 + $0x1264] ss:$16 sps:$4 sm:$0xff]  }
 0x5a6   : > { %6289 = vmatprep.subr.bf16.mxu1 %v13110_v15  ;;  %v13158_v15 = vld [vmem:[%s17018_s4 + $0x126c] ss:$16 sps:$4 sm:$0xff]  }
 0x5a8   : > { %6161 = vmatpush1.bf16.msra.mxu0 %v13105_v16  ;;  %v13164_v16 = vld [vmem:[%s17018_s4 + $0x128c] ss:$16 sps:$4 sm:$0xff]  }
 0x5a9   : > { %6290 = vmatpush1.bf16.msra.mxu1 %v13108_v30  ;;  %6173 = vmatprep.subr.bf16.mxu0 %v13113_v32  ;;  %v13159_v30 = vld [vmem:[%s17018_s4 + $0x1280] ss:$16 sps:$4 sm:$0xff]   ;;  %v13162_v32 = vld [vmem:[%s17018_s4 + $0x1288] ss:$16 sps:$4 sm:$0xff]  }
 0x5aa   : > { %6302 = vmatprep.subr.bf16.mxu1 %v13116_v11  ;;  %v13168_v11 = vld [vmem:[%s17018_s4 + $0x12a8] ss:$16 sps:$4 sm:$0xff]  }
 0x5ab   : > { %6163 = vmatmul.mubr.bf16.vlgmr.msra.gmra.mrb[24].mxu0 %v5333_v25 }
 0x5ac   : > { %6292 = vmatmul.mubr.bf16.vlgmr.msra.gmra.mrb[8].mxu1 %v5333_v25  ;;  %6174 = vmatpush1.bf16.msra.mxu0 %v13111_v36  ;;  %v13173_v36 = vld [vmem:[%s17018_s4 + $0x12c4] ss:$16 sps:$4 sm:$0xff]   ;;  %v13182_v25 = vld [vmem:[%s17018_s4 + $0x12ec] ss:$16 sps:$4 sm:$0xff]  }
 0x5ad   : > { %6303 = vmatpush1.bf16.msra.mxu1 %v13114_v40  ;;  %6175 = vmatprep.subr.bf16.mxu0 %v13119_v41  ;;  %v13171_v40 = vld [vmem:[%s17018_s4 + $0x12c0] ss:$16 sps:$4 sm:$0xff]   ;;  %v13174_v41 = vld [vmem:[%s17018_s4 + $0x12c8] ss:$16 sps:$4 sm:$0xff]  }
 0x5ae   : > { %6304 = vmatprep.subr.bf16.mxu1 %v13122_v10  ;;  %6205 = vmatprep.mubr.bf16.mxu0 %v13604_v3  ;;  %v13177_v10 = vld [vmem:[%s17018_s4 + $0x12e0] ss:$16 sps:$4 sm:$0xff]  }
 0x5af   : > { %6334 = vmatprep.mubr.bf16.mxu1 %v13604_v3 }
 0x5b0   : > { %6176 = vmatpush1.bf16.msra.mxu0 %v13117_v1  ;;  %v13180_v1 = vld [vmem:[%s17018_s4 + $0x12e8] ss:$16 sps:$4 sm:$0xff]  }
 0x5b1   : > { %6305 = vmatpush1.bf16.msra.mxu1 %v13120_v39  ;;  %6177 = vmatprep.subr.bf16.mxu0 %v13125_v42  ;;  %v13186_v39 = vld [vmem:[%s17018_s4 + $0x1308] ss:$16 sps:$4 sm:$0xff]   ;;  %v13191_v42 = vld [vmem:[%s17018_s4 + $0x1324] ss:$16 sps:$4 sm:$0xff]  }
 0x5b2   : > { %6306 = vmatprep.subr.bf16.mxu1 %v13128_v14  ;;  %v13194_v14 = vld [vmem:[%s17018_s4 + $0x132c] ss:$16 sps:$4 sm:$0xff]  }
 0x5b4   : > { %6178 = vmatpush1.bf16.msra.mxu0 %v13123_v43  ;;  %v13189_v43 = vld [vmem:[%s17018_s4 + $0x1320] ss:$16 sps:$4 sm:$0xff]  }
 0x5b5   : > { %6307 = vmatpush1.bf16.msra.mxu1 %v13126_v20  ;;  %6179 = vmatprep.subr.bf16.mxu0 %v13131_v63  ;;  %v13195_v20 = vld [vmem:[%s17018_s4 + $0x1340] ss:$16 sps:$4 sm:$0xff]   ;;  %v13198_v63 = vld [vmem:[%s17018_s4 + $0x1348] ss:$16 sps:$4 sm:$0xff]  }
 0x5b6   : > { %6308 = vmatprep.subr.bf16.mxu1 %v13134_v45  ;;  %v13206_v45 = vld [vmem:[%s17018_s4 + $0x136c] ss:$16 sps:$4 sm:$0xff]  }
 0x5b8   : > { %6180 = vmatpush1.bf16.msra.mxu0 %v13129_v47  ;;  %v13204_v47 = vld [vmem:[%s17018_s4 + $0x1368] ss:$16 sps:$4 sm:$0xff]  }
 0x5b9   : > { %6309 = vmatpush1.bf16.msra.mxu1 %v13132_v52  ;;  %7271 = vmatprep.subr.bf16.mxu0 %v13137_v53  ;;  %v13218_v52 = vld [vmem:[%s17018_s4 + $0x13ac] ss:$16 sps:$4 sm:$0xff]   ;;  %v13213_v53 = vld [vmem:[%s17018_s4 + $0x13a0] ss:$16 sps:$4 sm:$0xff]  }
 0x5ba   : > { %7400 = vmatprep.subr.bf16.mxu1 %v13140_v54  ;;  %v13216_v54 = vld [vmem:[%s17018_s4 + $0x13a8] ss:$16 sps:$4 sm:$0xff]  }
 0x5bb   : > { %10945 = vmatmul.mubr.msk.bf16.vlgmr.msra.gmra.mrb[24].mxu0 %vm1566_vm8, %v5359_v56 }
 0x5bc   : > { %10946 = vmatmul.mubr.msk.bf16.vlgmr.msra.gmra.mrb[8].mxu1 %vm1566_vm8, %v5359_v56  ;;  %7272 = vmatpush1.bf16.msra.mxu0 %v13135_v57  ;;  %v13221_v56 = vld [vmem:[%s17018_s4 + $0x13c4] ss:$16 sps:$4 sm:$0xff]   ;;  %v13224_v57 = vld [vmem:[%s17018_s4 + $0x13cc] ss:$16 sps:$4 sm:$0xff]  }
 0x5bd   : > { %7303 = vmatprep.mubr.bf16.mxu0 %v6534_v9  ;;  %7401 = vmatpush1.bf16.msra.mxu1 %v13138_v51  ;;  %v6353_v51 = vld [vmem:[#allocation3] sm:$0xf0] }
 0x5be   : > { %7432 = vmatprep.mubr.bf16.mxu1 %v6534_v9  ;;  %7273 = vmatprep.subr.bf16.mxu0 %v13143_v60  ;;  %v6361_v60 = vld [vmem:[#allocation3 + $0x68] sm:$0x3]  ;;  %v13227_v9 = vld [vmem:[%s17018_s4 + $0x13e4] ss:$16 sps:$4 sm:$0xff]  }
 0x5bf   : > { %7402 = vmatprep.subr.bf16.mxu1 %v13146_v61  ;;  %v13222_v61 = vld [vmem:[%s17018_s4 + $0x13c8] ss:$16 sps:$4 sm:$0xff]  }
 0x5c0   : > { %7274 = vmatpush1.bf16.msra.mxu0 %v13141_v31  ;;  %v6356_v31 = vld [vmem:[#allocation3 + $0x18] sm:$0xf0] }
 0x5c1   : > { %7403 = vmatpush1.bf16.msra.mxu1 %v13144_v55  ;;  %7275 = vmatprep.subr.bf16.mxu0 %v13149_v62  ;;  %v13230_v55 = vld [vmem:[%s17018_s4 + $0x13ec] ss:$16 sps:$4 sm:$0xff]  }
 0x5c2   : > { %7404 = vmatprep.subr.bf16.mxu1 %v13152_v0  ;;  %v13535_v62 = vld [vmem:[#allocation3 + $0x28] sm:$0xff] }
 0x5c3   : > { %v6363_v0 = vpack.c.bf16 %v13535_v62, %v6353_v51  ;;  %v13285_v51 = vld [vmem:[%s17018_s4 + $0x1520] ss:$16 sps:$4 sm:$0xff]   ;;  %v13299_v62 = vld [vmem:[%s17018_s4 + $0x1564] ss:$16 sps:$4 sm:$0xff]  }
 0x5c4   : > { %7276 = vmatpush1.bf16.msra.mxu0 %v13147_v5  ;;  %v6368_v5 = vpack.c.bf16 %v6358_v58, %v6358_v58  ;;  %v13287_v58 = vld [vmem:[%s17018_s4 + $0x1524] ss:$16 sps:$4 sm:$0xff]  }
 0x5c5   : > { %7405 = vmatpush1.bf16.msra.mxu1 %v13150_v7  ;;  %7277 = vmatprep.subr.bf16.mxu0 %v13155_v12  ;;  %v13225_v7 = vld [vmem:[%s17018_s4 + $0x13e0] ss:$16 sps:$4 sm:$0xff]  }
 0x5c6   : > { %7406 = vmatprep.subr.bf16.mxu1 %v13158_v15  ;;  %v13536_v12 = vld [vmem:[#allocation3 + $0x40] sm:$0xff] }
 0x5c7   : > { %v6366_v15 = vpack.c.bf16 %v13536_v12, %v6356_v31  ;;  %v13291_v31 = vld [vmem:[%s17018_s4 + $0x1540] ss:$16 sps:$4 sm:$0xff]   ;;  %v13305_v12 = vld [vmem:[%s17018_s4 + $0x1584] ss:$16 sps:$4 sm:$0xff]  }
 0x5c8   : > { %7278 = vmatpush1.bf16.msra.mxu0 %v13153_v19  ;;  %v6371_v19 = vpack.c.bf16 %v6361_v60, %v6361_v60  ;;  %v13288_v60 = vld [vmem:[%s17018_s4 + $0x1528] ss:$16 sps:$4 sm:$0xff]  }
 0x5c9   : > { %7407 = vmatpush1.bf16.msra.mxu1 %v13156_v24  ;;  %7279 = vmatprep.subr.bf16.mxu0 %v13161_v27  ;;  %v13228_v24 = vld [vmem:[%s17018_s4 + $0x13e8] ss:$16 sps:$4 sm:$0xff]   ;;  %v13233_v27 = vld [vmem:[%s17018_s4 + $0x1404] ss:$16 sps:$4 sm:$0xff]  }
 0x5ca   : > { %7408 = vmatprep.subr.bf16.mxu1 %v13164_v16  ;;  %v6529_v16 = vrot.slane %v6363_v0, 2  ;;  %v13302_v0 = vld [vmem:[%s17018_s4 + $0x156c] ss:$16 sps:$4 sm:$0xff]  }
 0x5cc   : > { %7280 = vmatpush1.bf16.msra.mxu0 %v13159_v30  ;;  %v6530_v30 = vrot.slane %v6368_v5, 2  ;;  %v13297_v5 = vld [vmem:[%s17018_s4 + $0x1560] ss:$16 sps:$4 sm:$0xff]  }
 0x5cd   : > { %7409 = vmatpush1.bf16.msra.mxu1 %v13162_v32  ;;  %7281 = vmatprep.subr.bf16.mxu0 %v13167_v34  ;;  %v13236_v32 = vld [vmem:[%s17018_s4 + $0x140c] ss:$16 sps:$4 sm:$0xff]   ;;  %v13231_v34 = vld [vmem:[%s17018_s4 + $0x1400] ss:$16 sps:$4 sm:$0xff]  }
 0x5ce   : > { %7410 = vmatprep.subr.bf16.mxu1 %v13170_v35  ;;  %v6538_v35 = vrot.slane %v6366_v15, 2  ;;  %v13308_v15 = vld [vmem:[%s17018_s4 + $0x158c] ss:$16 sps:$4 sm:$0xff]  }
 0x5d0   : > { %7282 = vmatpush1.bf16.msra.mxu0 %v13165_v8  ;;  %v6539_v8 = vrot.slane %v6371_v19, 2  ;;  %v13303_v19 = vld [vmem:[%s17018_s4 + $0x1580] ss:$16 sps:$4 sm:$0xff]  }
 0x5d1   : > { %7411 = vmatpush1.bf16.msra.mxu1 %v13168_v11  ;;  %7283 = vmatprep.subr.bf16.mxu0 %v13173_v36  ;;  %v13234_v11 = vld [vmem:[%s17018_s4 + $0x1408] ss:$16 sps:$4 sm:$0xff]   ;;  %v6531_v36 = vsel %vm1461_vm6, %v6529_v16, %v6530_v30  ;;  %v13314_v16 = vld [vmem:[%s17018_s4 + $0x15ac] ss:$16 sps:$4 sm:$0xff]   ;;  %v13309_v30 = vld [vmem:[%s17018_s4 + $0x15a0] ss:$16 sps:$4 sm:$0xff]  }
 0x5d2   : > { %7412 = vmatprep.subr.bf16.mxu1 %v13176_v38  ;;  %v13239_v38 = vld [vmem:[%s17018_s4 + $0x1424] ss:$16 sps:$4 sm:$0xff]  }
 0x5d4   : > { %7284 = vmatpush1.bf16.msra.mxu0 %v13171_v40  ;;  %v13242_v40 = vld [vmem:[%s17018_s4 + $0x142c] ss:$16 sps:$4 sm:$0xff]  }
 0x5d5   : > { %7413 = vmatpush1.bf16.msra.mxu1 %v13174_v41  ;;  %7285 = vmatprep.subr.bf16.mxu0 %v13179_v6  ;;  %v6540_v41 = vsel %vm1461_vm6, %v6538_v35, %v6539_v8  ;;  %v13237_v6 = vld [vmem:[%s17018_s4 + $0x1420] ss:$16 sps:$4 sm:$0xff]   ;;  %v13320_v35 = vld [vmem:[%s17018_s4 + $0x15cc] ss:$16 sps:$4 sm:$0xff]  }
 0x5d6   : > { %7414 = vmatprep.subr.bf16.mxu1 %v13182_v25  ;;  %v13240_v25 = vld [vmem:[%s17018_s4 + $0x1428] ss:$16 sps:$4 sm:$0xff]   ;;  %v6360_v8 = vld [vmem:[#allocation3 + $0x60] sm:$0x3] }
 0x5d8   : > { %7286 = vmatpush1.bf16.msra.mxu0 %v13177_v10  ;;  %v13245_v10 = vld [vmem:[%s17018_s4 + $0x1444] ss:$16 sps:$4 sm:$0xff]  }
 0x5d9   : > { %7415 = vmatpush1.bf16.msra.mxu1 %v13180_v1  ;;  %7287 = vmatprep.subr.bf16.mxu0 %v13185_v37  ;;  %v13248_v1 = vld [vmem:[%s17018_s4 + $0x144c] ss:$16 sps:$4 sm:$0xff]   ;;  %v13243_v37 = vld [vmem:[%s17018_s4 + $0x1440] ss:$16 sps:$4 sm:$0xff]  }
 0x5da   : > { %7416 = vmatprep.subr.bf16.mxu1 %v13188_v4  ;;  %v13246_v4 = vld [vmem:[%s17018_s4 + $0x1448] ss:$16 sps:$4 sm:$0xff]  }
 0x5dc   : > { %7288 = vmatpush1.bf16.msra.mxu0 %v13183_v13  ;;  %v13251_v13 = vld [vmem:[%s17018_s4 + $0x1464] ss:$16 sps:$4 sm:$0xff]  }
 0x5dd   : > { %7417 = vmatpush1.bf16.msra.mxu1 %v13186_v39  ;;  %7289 = vmatprep.subr.bf16.mxu0 %v13191_v42  ;;  %v13254_v39 = vld [vmem:[%s17018_s4 + $0x146c] ss:$16 sps:$4 sm:$0xff]   ;;  %v13249_v42 = vld [vmem:[%s17018_s4 + $0x1460] ss:$16 sps:$4 sm:$0xff]  }
 0x5de   : > { %7418 = vmatprep.subr.bf16.mxu1 %v13194_v14  ;;  %v13252_v14 = vld [vmem:[%s17018_s4 + $0x1468] ss:$16 sps:$4 sm:$0xff]  }
 0x5e0   : > { %7290 = vmatpush1.bf16.msra.mxu0 %v13189_v43  ;;  %v13257_v43 = vld [vmem:[%s17018_s4 + $0x1484] ss:$16 sps:$4 sm:$0xff]  }
 0x5e1   : > { %7419 = vmatpush1.bf16.msra.mxu1 %v13192_v33  ;;  %7291 = vmatprep.subr.bf16.mxu0 %v13197_v2  ;;  %v13260_v33 = vld [vmem:[%s17018_s4 + $0x148c] ss:$16 sps:$4 sm:$0xff]   ;;  %v13255_v2 = vld [vmem:[%s17018_s4 + $0x1480] ss:$16 sps:$4 sm:$0xff]  }
 0x5e2   : > { %7420 = vmatprep.subr.bf16.mxu1 %v13200_v44  ;;  %v13258_v44 = vld [vmem:[%s17018_s4 + $0x1488] ss:$16 sps:$4 sm:$0xff]  }
 0x5e4   : > { %7292 = vmatpush1.bf16.msra.mxu0 %v13195_v20  ;;  %v13263_v20 = vld [vmem:[%s17018_s4 + $0x14a4] ss:$16 sps:$4 sm:$0xff]  }
 0x5e5   : > { %7421 = vmatpush1.bf16.msra.mxu1 %v13198_v63  ;;  %7293 = vmatprep.subr.bf16.mxu0 %v13203_v18  ;;  %v13266_v63 = vld [vmem:[%s17018_s4 + $0x14ac] ss:$16 sps:$4 sm:$0xff]   ;;  %v13261_v18 = vld [vmem:[%s17018_s4 + $0x14a0] ss:$16 sps:$4 sm:$0xff]  }
 0x5e6   : > { %7422 = vmatprep.subr.bf16.mxu1 %v13206_v45  ;;  %v13264_v45 = vld [vmem:[%s17018_s4 + $0x14a8] ss:$16 sps:$4 sm:$0xff]  }
 0x5e8   : > { %7294 = vmatpush1.bf16.msra.mxu0 %v13201_v46  ;;  %v13269_v46 = vld [vmem:[%s17018_s4 + $0x14c4] ss:$16 sps:$4 sm:$0xff]  }
 0x5e9   : > { %7423 = vmatpush1.bf16.msra.mxu1 %v13204_v47  ;;  %7295 = vmatprep.subr.bf16.mxu0 %v13209_v29  ;;  %v13272_v47 = vld [vmem:[%s17018_s4 + $0x14cc] ss:$16 sps:$4 sm:$0xff]   ;;  %v13267_v29 = vld [vmem:[%s17018_s4 + $0x14c0] ss:$16 sps:$4 sm:$0xff]  }
 0x5ea   : > { %7424 = vmatprep.subr.bf16.mxu1 %v13212_v17  ;;  %v13270_v17 = vld [vmem:[%s17018_s4 + $0x14c8] ss:$16 sps:$4 sm:$0xff]  }
 0x5ec   : > { %7296 = vmatpush1.bf16.msra.mxu0 %v13207_v48  ;;  %v13275_v48 = vld [vmem:[%s17018_s4 + $0x14e4] ss:$16 sps:$4 sm:$0xff]  }
 0x5ed   : > { %7425 = vmatpush1.bf16.msra.mxu1 %v13210_v49  ;;  %7297 = vmatprep.subr.bf16.mxu0 %v13215_v50  ;;  %v13278_v49 = vld [vmem:[%s17018_s4 + $0x14ec] ss:$16 sps:$4 sm:$0xff]   ;;  %v13273_v50 = vld [vmem:[%s17018_s4 + $0x14e0] ss:$16 sps:$4 sm:$0xff]  }
 0x5ee   : > { %7426 = vmatprep.subr.bf16.mxu1 %v13218_v52  ;;  %v13276_v52 = vld [vmem:[%s17018_s4 + $0x14e8] ss:$16 sps:$4 sm:$0xff]  }
 0x5f0   : > { %7298 = vmatpush1.bf16.msra.mxu0 %v13213_v53  ;;  %v13281_v53 = vld [vmem:[%s17018_s4 + $0x1504] ss:$16 sps:$4 sm:$0xff]  }
 0x5f1   : > { %7427 = vmatpush1.bf16.msra.mxu1 %v13216_v54  ;;  %7299 = vmatprep.subr.bf16.mxu0 %v13221_v56  ;;  %v13284_v54 = vld [vmem:[%s17018_s4 + $0x150c] ss:$16 sps:$4 sm:$0xff]   ;;  %v13279_v56 = vld [vmem:[%s17018_s4 + $0x1500] ss:$16 sps:$4 sm:$0xff]  }
 0x5f2   : > { %7428 = vmatprep.subr.bf16.mxu1 %v13224_v57  ;;  %v13282_v57 = vld [vmem:[%s17018_s4 + $0x1508] ss:$16 sps:$4 sm:$0xff]  }
 0x5f4   : > { %7300 = vmatpush1.bf16.msra.mxu0 %v13219_v59  ;;  %v13290_v59 = vld [vmem:[%s17018_s4 + $0x152c] ss:$16 sps:$4 sm:$0xff]  }
 0x5f5   : > { %7429 = vmatpush1.bf16.msra.mxu1 %v13222_v61  ;;  %7301 = vmatprep.subr.bf16.mxu0 %v13227_v9  ;;  %v13293_v61 = vld [vmem:[%s17018_s4 + $0x1544] ss:$16 sps:$4 sm:$0xff]   ;;  %v13296_v9 = vld [vmem:[%s17018_s4 + $0x154c] ss:$16 sps:$4 sm:$0xff]  }
 0x5f6   : > { %7430 = vmatprep.subr.bf16.mxu1 %v13230_v55  ;;  %v13294_v55 = vld [vmem:[%s17018_s4 + $0x1548] ss:$16 sps:$4 sm:$0xff]  }
 0x5f8   : > { %7302 = vmatpush1.bf16.msra.mxu0 %v13225_v7  ;;  %v13300_v7 = vld [vmem:[%s17018_s4 + $0x1568] ss:$16 sps:$4 sm:$0xff]  }
 0x5f9   : > { %7431 = vmatpush1.bf16.msra.mxu1 %v13228_v24  ;;  %7314 = vmatprep.subr.bf16.mxu0 %v13233_v27  ;;  %v13306_v24 = vld [vmem:[%s17018_s4 + $0x1588] ss:$16 sps:$4 sm:$0xff]   ;;  %v13311_v27 = vld [vmem:[%s17018_s4 + $0x15a4] ss:$16 sps:$4 sm:$0xff]  }
 0x5fa   : > { %7443 = vmatprep.subr.bf16.mxu1 %v13236_v32  ;;  %v13312_v32 = vld [vmem:[%s17018_s4 + $0x15a8] ss:$16 sps:$4 sm:$0xff]  }
 0x5fb   : > { %7304 = vmatmul.mubr.bf16.vlgmr.msra.gmra.mrb[24].mxu0 %v6531_v36 }
 0x5fc   : > { %7433 = vmatmul.mubr.bf16.vlgmr.msra.gmra.mrb[8].mxu1 %v6531_v36  ;;  %7315 = vmatpush1.bf16.msra.mxu0 %v13231_v34  ;;  %v13317_v34 = vld [vmem:[%s17018_s4 + $0x15c4] ss:$16 sps:$4 sm:$0xff]   ;;  %v13318_v36 = vld [vmem:[%s17018_s4 + $0x15c8] ss:$16 sps:$4 sm:$0xff]  }
 0x5fd   : > { %7346 = vmatprep.mubr.bf16.mxu0 %v6540_v41  ;;  %7444 = vmatpush1.bf16.msra.mxu1 %v13234_v11  ;;  %v13315_v11 = vld [vmem:[%s17018_s4 + $0x15c0] ss:$16 sps:$4 sm:$0xff]  }
 0x5fe   : > { %7475 = vmatprep.mubr.bf16.mxu1 %v6540_v41  ;;  %7316 = vmatprep.subr.bf16.mxu0 %v13239_v38  ;;  %v13323_v38 = vld [vmem:[%s17018_s4 + $0x15e4] ss:$16 sps:$4 sm:$0xff]   ;;  %v13326_v41 = vld [vmem:[%s17018_s4 + $0x15ec] ss:$16 sps:$4 sm:$0xff]  }
 0x5ff   : > { %7445 = vmatprep.subr.bf16.mxu1 %v13242_v40  ;;  %v6355_v40 = vld [vmem:[#allocation3 + $0x10] sm:$0xf0] }
 0x600   : > { %7317 = vmatpush1.bf16.msra.mxu0 %v13237_v6  ;;  %v13537_v6 = vld [vmem:[#allocation3 + $0x38] sm:$0xff] }
 0x601   : > { %7446 = vmatpush1.bf16.msra.mxu1 %v13240_v25  ;;  %7318 = vmatprep.subr.bf16.mxu0 %v13245_v10  ;;  %v6365_v25 = vpack.c.bf16 %v13537_v6, %v6355_v40  ;;  %v6370_v10 = vpack.c.bf16 %v6360_v8, %v6360_v8  ;;  %v13371_v8 = vld [vmem:[%s17020_s6 + $0xc0] sm:$0xff]  }
 0x602   : > { %7447 = vmatprep.subr.bf16.mxu1 %v13248_v1  ;;  %v13321_v1 = vld [vmem:[%s17018_s4 + $0x15e0] ss:$16 sps:$4 sm:$0xff]  }
 0x604   : > { %7319 = vmatpush1.bf16.msra.mxu0 %v13243_v37  ;;  %v13324_v37 = vld [vmem:[%s17018_s4 + $0x15e8] ss:$16 sps:$4 sm:$0xff]  }
 0x605   : > { %7448 = vmatpush1.bf16.msra.mxu1 %v13246_v4  ;;  %7320 = vmatprep.subr.bf16.mxu0 %v13251_v13  ;;  %v13329_v4 = vld [vmem:[%s17018_s4 + $0x1604] ss:$16 sps:$4 sm:$0xff]   ;;  %v6535_v13 = vrot.slane %v6365_v25, 2 }
 0x606   : > { %7449 = vmatprep.subr.bf16.mxu1 %v13254_v39  ;;  %v6536_v39 = vrot.slane %v6370_v10, 2 }
 0x608   : > { %7321 = vmatpush1.bf16.msra.mxu0 %v13249_v42  ;;  %v13332_v42 = vld [vmem:[%s17018_s4 + $0x160c] ss:$16 sps:$4 sm:$0xff]  }
 0x609   : > { %7450 = vmatpush1.bf16.msra.mxu1 %v13252_v14  ;;  %7322 = vmatprep.subr.bf16.mxu0 %v13257_v43  ;;  %v13327_v14 = vld [vmem:[%s17018_s4 + $0x1600] ss:$16 sps:$4 sm:$0xff]   ;;  %v13330_v43 = vld [vmem:[%s17018_s4 + $0x1608] ss:$16 sps:$4 sm:$0xff]  }
 0x60a   : > { %7451 = vmatprep.subr.bf16.mxu1 %v13260_v33  ;;  %v13335_v33 = vld [vmem:[%s17018_s4 + $0x1624] ss:$16 sps:$4 sm:$0xff]  }
 0x60c   : > { %7323 = vmatpush1.bf16.msra.mxu0 %v13255_v2  ;;  %v6537_v2 = vsel %vm1461_vm6, %v6535_v13, %v6536_v39 }
 0x60d   : > { %7452 = vmatpush1.bf16.msra.mxu1 %v13258_v44  ;;  %7324 = vmatprep.subr.bf16.mxu0 %v13263_v20  ;;  %v13338_v44 = vld [vmem:[%s17018_s4 + $0x162c] ss:$16 sps:$4 sm:$0xff]   ;;  %v13333_v20 = vld [vmem:[%s17018_s4 + $0x1620] ss:$16 sps:$4 sm:$0xff]  }
 0x60e   : > { %7453 = vmatprep.subr.bf16.mxu1 %v13266_v63  ;;  %v13336_v63 = vld [vmem:[%s17018_s4 + $0x1628] ss:$16 sps:$4 sm:$0xff]  }
 0x610   : > { %7325 = vmatpush1.bf16.msra.mxu0 %v13261_v18  ;;  %v13341_v18 = vld [vmem:[%s17018_s4 + $0x1644] ss:$16 sps:$4 sm:$0xff]  }
 0x611   : > { %7454 = vmatpush1.bf16.msra.mxu1 %v13264_v45  ;;  %7326 = vmatprep.subr.bf16.mxu0 %v13269_v46  ;;  %v6357_v45 = vld [vmem:[#allocation3 + $0x20] sm:$0xf0]  ;;  %v6362_v46 = vld [vmem:[#allocation3 + $0x70] sm:$0x3] }
 0x612   : > { %7455 = vmatprep.subr.bf16.mxu1 %v13272_v47  ;;  %v13344_v47 = vld [vmem:[%s17018_s4 + $0x164c] ss:$16 sps:$4 sm:$0xff]  }
 0x614   : > { %7327 = vmatpush1.bf16.msra.mxu0 %v13267_v29  ;;  %v13339_v29 = vld [vmem:[%s17018_s4 + $0x1640] ss:$16 sps:$4 sm:$0xff]  }
 0x615   : > { %7456 = vmatpush1.bf16.msra.mxu1 %v13270_v17  ;;  %7328 = vmatprep.subr.bf16.mxu0 %v13275_v48  ;;  %v13538_v17 = vld [vmem:[#allocation3 + $0x48] sm:$0xff] }
 0x616   : > { %7457 = vmatprep.subr.bf16.mxu1 %v13278_v49  ;;  %v6367_v48 = vpack.c.bf16 %v13538_v17, %v6357_v45  ;;  %v6372_v49 = vpack.c.bf16 %v6362_v46, %v6362_v46  ;;  %v13372_v17 = vld [vmem:[%s17020_s6 + $0x70] sm:$0xff]  }
 0x618   : > { %7329 = vmatpush1.bf16.msra.mxu0 %v13273_v50  ;;  %v13342_v50 = vld [vmem:[%s17018_s4 + $0x1648] ss:$16 sps:$4 sm:$0xff]  }
 0x619   : > { %7458 = vmatpush1.bf16.msra.mxu1 %v13276_v52  ;;  %7330 = vmatprep.subr.bf16.mxu0 %v13281_v53  ;;  %v13347_v52 = vld [vmem:[%s17018_s4 + $0x1664] ss:$16 sps:$4 sm:$0xff]   ;;  %v13350_v53 = vld [vmem:[%s17018_s4 + $0x166c] ss:$16 sps:$4 sm:$0xff]  }
 0x61a   : > { %7459 = vmatprep.subr.bf16.mxu1 %v13284_v54  ;;  %v13345_v54 = vld [vmem:[%s17018_s4 + $0x1660] ss:$16 sps:$4 sm:$0xff]  }
 0x61c   : > { %7331 = vmatpush1.bf16.msra.mxu0 %v13279_v56  ;;  %v6541_v56 = vrot.slane %v6367_v48, 2  ;;  %v13373_v48 = vld [vmem:[%s17020_s6 + $0x30] sm:$0xff]  }
 0x61d   : > { %7460 = vmatpush1.bf16.msra.mxu1 %v13282_v57  ;;  %7332 = vmatprep.subr.bf16.mxu0 %v13287_v58  ;;  %v6542_v57 = vrot.slane %v6372_v49, 2  ;;  %v13348_v58 = vld [vmem:[%s17018_s4 + $0x1668] ss:$16 sps:$4 sm:$0xff]  }
 0x61e   : > { %7461 = vmatprep.subr.bf16.mxu1 %v13290_v59  ;;  %v13374_v49 = vld [vmem:[%s17020_s6 + $0xc8] sm:$0xff]  }
 0x61f   : > { %v6543_v59 = vsel %vm1461_vm6, %v6541_v56, %v6542_v57 }
 0x620   : > { %7333 = vmatpush1.bf16.msra.mxu0 %v13285_v51  ;;  %v13351_v51 = vld [vmem:[%s17020_s6 + $0x80] sm:$0xff]  }
 0x621   : > { %7462 = vmatpush1.bf16.msra.mxu1 %v13288_v60  ;;  %7334 = vmatprep.subr.bf16.mxu0 %v13293_v61  ;;  %v13353_v60 = vld [vmem:[%s17020_s6 + $0x40] sm:$0xff]  }
 0x622   : > { %7463 = vmatprep.subr.bf16.mxu1 %v13296_v9  ;;  %v13355_v61 = vld [vmem:[%s17020_s6] sm:$0xff]   ;;  %v13356_v9 = vld [vmem:[%s17020_s6 + $0x48] sm:$0xff]  }
 0x624   : > { %7335 = vmatpush1.bf16.msra.mxu0 %v13291_v31  ;;  %v13352_v31 = vld [vmem:[%s17020_s6 + $0x88] sm:$0xff]  }
 0x625   : > { %7464 = vmatpush1.bf16.msra.mxu1 %v13294_v55  ;;  %7336 = vmatprep.subr.bf16.mxu0 %v13299_v62  ;;  %v13358_v55 = vld [vmem:[%s17020_s6 + $0x8] sm:$0xff]   ;;  %v13359_v62 = vld [vmem:[%s17020_s6 + $0x50] sm:$0xff]  }
 0x626   : > { %7465 = vmatprep.subr.bf16.mxu1 %v13302_v0  ;;  %v13354_v0 = vld [vmem:[%s17020_s6 + $0x90] sm:$0xff]  }
 0x628   : > { %7337 = vmatpush1.bf16.msra.mxu0 %v13297_v5  ;;  %v13361_v5 = vld [vmem:[%s17020_s6 + $0x10] sm:$0xff]  }
 0x629   : > { %7466 = vmatpush1.bf16.msra.mxu1 %v13300_v7  ;;  %7338 = vmatprep.subr.bf16.mxu0 %v13305_v12  ;;  %v13362_v7 = vld [vmem:[%s17020_s6 + $0x58] sm:$0xff]  }
 0x62a   : > { %7467 = vmatprep.subr.bf16.mxu1 %v13308_v15  ;;  %v13357_v12 = vld [vmem:[%s17020_s6 + $0x98] sm:$0xff]  }
 0x62b   : > { %v13364_v15 = vld [vmem:[%s17020_s6 + $0x18] sm:$0xff]  }
 0x62c   : > { %7339 = vmatpush1.bf16.msra.mxu0 %v13303_v19  ;;  %v13365_v19 = vld [vmem:[%s17020_s6 + $0x60] sm:$0xff]  }
 0x62d   : > { %7468 = vmatpush1.bf16.msra.mxu1 %v13306_v24  ;;  %7340 = vmatprep.subr.bf16.mxu0 %v13311_v27  ;;  %v13360_v24 = vld [vmem:[%s17020_s6 + $0xa0] sm:$0xff]  }
 0x62e   : > { %7469 = vmatprep.subr.bf16.mxu1 %v13314_v16  ;;  %v13367_v27 = vld [vmem:[%s17020_s6 + $0x20] sm:$0xff]   ;;  %v13368_v16 = vld [vmem:[%s17020_s6 + $0x68] sm:$0xff]  }
 0x630   : > { %7341 = vmatpush1.bf16.msra.mxu0 %v13309_v30  ;;  %v13363_v30 = vld [vmem:[%s17020_s6 + $0xa8] sm:$0xff]  }
 0x631   : > { %7470 = vmatpush1.bf16.msra.mxu1 %v13312_v32  ;;  %7342 = vmatprep.subr.bf16.mxu0 %v13317_v34  ;;  %v13370_v32 = vld [vmem:[%s17020_s6 + $0x28] sm:$0xff]   ;;  %v13366_v34 = vld [vmem:[%s17020_s6 + $0xb0] sm:$0xff]  }
 0x632   : > { %7471 = vmatprep.subr.bf16.mxu1 %v13320_v35  ;;  %v13369_v35 = vld [vmem:[%s17020_s6 + $0xb8] sm:$0xff]  }
 0x634   : > { %7343 = vmatpush1.bf16.msra.mxu0 %v13315_v11  ;;  %v7537_v11 = vld [vmem:[%s17019_s5] sm:$0xf] }
 0x635   : > { %7472 = vmatpush1.bf16.msra.mxu1 %v13318_v36  ;;  %7344 = vmatprep.subr.bf16.mxu0 %v13323_v38  ;;  %v7542_v36 = vrot.slane %v7537_v11, %v1221_v21  ;;  %v7550_v38 = vrot.slane %v7537_v11, %v1229_v26  ;;  %v7546_v40 = vrot.slane %v7537_v11, %v1225_v23 }
 0x636   : > { %7473 = vmatprep.subr.bf16.mxu1 %v13326_v41  ;;  %v7554_v41 = vrot.slane %v7537_v11, %v1233_v28 }
 0x638   : > { %7345 = vmatpush1.bf16.msra.mxu0 %v13321_v1 }
 0x639   : > { %7474 = vmatpush1.bf16.msra.mxu1 %v13324_v37  ;;  %7357 = vmatprep.subr.bf16.mxu0 %v13329_v4 }
 0x63a   : > { %7486 = vmatprep.subr.bf16.mxu1 %v13332_v42 }
 0x63b   : > { %7347 = vmatmul.mubr.bf16.vlgmr.msra.gmra.mrb[24].mxu0 %v6537_v2 }
 0x63c   : > { %7476 = vmatmul.mubr.bf16.vlgmr.msra.gmra.mrb[8].mxu1 %v6537_v2  ;;  %7358 = vmatpush1.bf16.msra.mxu0 %v13327_v14 }
 0x63d   : > { %7487 = vmatpush1.bf16.msra.mxu1 %v13330_v43  ;;  %7359 = vmatprep.subr.bf16.mxu0 %v13335_v33 }
 0x63e   : > { %7488 = vmatprep.subr.bf16.mxu1 %v13338_v44  ;;  %7389 = vmatprep.mubr.bf16.mxu0 %v13604_v3 }
 0x63f   : > { %7518 = vmatprep.mubr.bf16.mxu1 %v13604_v3 }
 0x640   : > { %7360 = vmatpush1.bf16.msra.mxu0 %v13333_v20 }
 0x641   : > { %7489 = vmatpush1.bf16.msra.mxu1 %v13336_v63  ;;  %7361 = vmatprep.subr.bf16.mxu0 %v13341_v18 }
 0x642   : > { %7490 = vmatprep.subr.bf16.mxu1 %v13344_v47 }
 0x644   : > { %7362 = vmatpush1.bf16.msra.mxu0 %v13339_v29 }
 0x645   : > { %7491 = vmatpush1.bf16.msra.mxu1 %v13342_v50  ;;  %7363 = vmatprep.subr.bf16.mxu0 %v13347_v52 }
 0x646   : > { %7492 = vmatprep.subr.bf16.mxu1 %v13350_v53 }
 0x648   : > { %7364 = vmatpush1.bf16.msra.mxu0 %v13345_v54 }
 0x649   : > { %7493 = vmatpush1.bf16.msra.mxu1 %v13348_v58  ;;  %11742 = vmatprep.subr.bf16.mxu0 %v13353_v60 }
 0x64a   : > { %7914 = vmatprep.subr.bf16.mxu1 %v13604_v3 }
 0x64b   : > { %11235 = vmatmul.mubr.msk.bf16.vlgmr.msra.gmra.mrb[24].mxu0 %vm1566_vm8, %v6543_v59 }
 0x64c   : > { %11236 = vmatmul.mubr.msk.bf16.vlgmr.msra.gmra.mrb[8].mxu1 %vm1566_vm8, %v6543_v59  ;;  %11743 = vmatpush3.bf16.msra.mxu0 %v13355_v61 }
 0x64d   : > { %7915 = vmatpush1.bf16.msra.mxu1 %v13351_v51  ;;  %11744 = vmatprep.subr.bf16.mxu0 %v13356_v9 }
 0x64e   : > { %7916 = vmatprep.subr.bf16.mxu1 %v13604_v3 }
 0x650   : > { %11745 = vmatpush3.bf16.msra.mxu0 %v13358_v55 }
 0x651   : > { %7917 = vmatpush1.bf16.msra.mxu1 %v13352_v31  ;;  %11746 = vmatprep.subr.bf16.mxu0 %v13359_v62  ;;  %v13375_v62 = vld [vmem:[%s17020_s6 + $0x78] sm:$0xff]  }
 0x652   : > { %7918 = vmatprep.subr.bf16.mxu1 %v13604_v3 }
 0x654   : > { %11747 = vmatpush3.bf16.msra.mxu0 %v13361_v5 }
 0x655   : > { %7919 = vmatpush1.bf16.msra.mxu1 %v13354_v0  ;;  %11748 = vmatprep.subr.bf16.mxu0 %v13362_v7  ;;  %v13376_v7 = vld [vmem:[%s17020_s6 + $0x38] sm:$0xff]  }
 0x656   : > { %7920 = vmatprep.subr.bf16.mxu1 %v13604_v3 }
 0x658   : > { %11749 = vmatpush3.bf16.msra.mxu0 %v13364_v15 }
 0x659   : > { %7921 = vmatpush1.bf16.msra.mxu1 %v13357_v12  ;;  %11750 = vmatprep.subr.bf16.mxu0 %v13365_v19  ;;  %v13377_v12 = vld [vmem:[%s17020_s6 + $0x110] sm:$0xff]  }
 0x65a   : > { %7922 = vmatprep.subr.bf16.mxu1 %v13604_v3 }
 0x65c   : > { %11751 = vmatpush3.bf16.msra.mxu0 %v13367_v27 }
 0x65d   : > { %7923 = vmatpush1.bf16.msra.mxu1 %v13360_v24  ;;  %11752 = vmatprep.subr.bf16.mxu0 %v13368_v16 }
 0x65e   : > { %7924 = vmatprep.subr.bf16.mxu1 %v13604_v3 }
 0x660   : > { %11753 = vmatpush3.bf16.msra.mxu0 %v13370_v32 }
 0x661   : > { %7925 = vmatpush1.bf16.msra.mxu1 %v13363_v30  ;;  %11754 = vmatprep.subr.bf16.mxu0 %v13372_v17  ;;  %v13394_v17 = vld [vmem:[%s17020_s6 + $0xf8] sm:$0xff]  }
 0x662   : > { %7926 = vmatprep.subr.bf16.mxu1 %v13604_v3 }
 0x664   : > { %11755 = vmatpush3.bf16.msra.mxu0 %v13373_v48  ;;  %v13395_v48 = vld [vmem:[%s17020_s6 + $0x140] sm:$0xff]  }
 0x665   : > { %7927 = vmatpush1.bf16.msra.mxu1 %v13366_v34  ;;  %11756 = vmatprep.subr.bf16.mxu0 %v13375_v62 }
 0x666   : > { %7928 = vmatprep.subr.bf16.mxu1 %v13604_v3 }
 0x668   : > { %11757 = vmatpush3.bf16.msra.mxu0 %v13376_v7  ;;  %v13409_v7 = vld [vmem:[%s17020_s6 + $0x1b0] sm:$0xff]  }
 0x669   : > { %7929 = vmatpush1.bf16.msra.mxu1 %v13369_v35  ;;  %11764 = vmatprep.subr.bf16.mxu0 %v13377_v12 }
 0x66a   : > { %7930 = vmatprep.subr.bf16.mxu1 %v13604_v3 }
 0x66d   : > { %7931 = vmatpush1.bf16.msra.mxu1 %v13371_v8 }
 0x66e   : > { %7932 = vmatprep.subr.bf16.mxu1 %v13604_v3 }
 0x671   : > { %7933 = vmatpush1.bf16.msra.mxu1 %v13374_v49  ;;  %v13396_v49 = vld [vmem:[%s17020_s6 + $0x180] sm:$0xff]  }
 0x672   : > { %8218 = vmatprep.subr.bf16.mxu1 %v13604_v3 }
 0x71e   : > { %v7391_v6 = vpop.f32.mrb[24].mxu0 }
 0x71f   : > { %v7559_v25 = vadd.f32 %v7542_v36, %v7391_v6  ;;  %v7520_v10 = vpop.f32.mrb[8].mxu1  ;;  %v7393_v1 = vpop.f32.mrb[25].mxu0 }
 0x720   : > { %v7561_v37 = vadd.f32 %v7550_v38, %v7520_v10  ;;  %v7560_v4 = vadd.f32 %v7546_v40, %v7393_v1  ;;  %v7522_v13 = vpop.f32.mrb[9].mxu1  ;;  %v7395_v39 = vpop.f32.mrb[26].mxu0 }
 0x721   : > { %v7567_v42 = vmax.f32 %v7559_v25, 0.0  ;;  %v7562_v14 = vadd.f32 %v7554_v41, %v7522_v13  ;;  %v7563_v21 = vadd.f32 %v7542_v36, %v7395_v39  ;;  %v7524_v43 = vpop.f32.mrb[10].mxu1  ;;  %v7397_v33 = vpop.f32.mrb[27].mxu0 }
 0x722   : > { %v7569_v26 = vmax.f32 %v7561_v37, 0.0  ;;  %v7568_v2 = vmax.f32 %v7560_v4, 0.0  ;;  %v7565_v44 = vadd.f32 %v7550_v38, %v7524_v43  ;;  %v7564_v23 = vadd.f32 %v7546_v40, %v7397_v33  ;;  %v7526_v20 = vpop.f32.mrb[11].mxu1  ;;  %v13378_v4 = vld [vmem:[%s17020_s6 + $0x150] sm:$0xff]   ;;  %v13380_v33 = vld [vmem:[%s17020_s6 + $0x118] sm:$0xff]  }
 0x723   : > { %v7570_v22 = vmax.f32 %v7562_v14, 0.0  ;;  %v7571_v28 = vmax.f32 %v7563_v21, 0.0  ;;  %v7566_v63 = vadd.f32 %v7554_v41, %v7526_v20  ;;  %v7583_v46 = vrot.slane %v7567_v42, 1  ;;  %v13379_v14 = vld [vmem:[%s17020_s6 + $0xd0] sm:$0xff]   ;;  %v13385_v20 = vld [vmem:[%s17020_s6 + $0xe0] sm:$0xff]  }
 0x724   : > { %v7573_v18 = vmax.f32 %v7565_v44, 0.0  ;;  %v7572_v45 = vmax.f32 %v7564_v23, 0.0  ;;  %v7589_v50 = vrot.slane %v7569_v26, 1  ;;  %v7586_v52 = vrot.slane %v7568_v2, 1  ;;  %v13383_v44 = vld [vmem:[%s17020_s6 + $0x120] sm:$0xff]  }
 0x725   : > { %v7584_v47 = vrot.slane %v7571_v28, 1  ;;  %v7574_v29 = vmax.f32 %v7566_v63, 0.0  ;;  %v7592_v56 = vrot.slane %v7570_v22, 1  ;;  %v13384_v23 = vld [vmem:[%s17020_s6 + $0x160] sm:$0xff]   ;;  %v13388_v63 = vld [vmem:[%s17020_s6 + $0xe8] sm:$0xff]  }
 0x726   : > { %v7590_v53 = vrot.slane %v7573_v18, 1  ;;  %v7587_v54 = vrot.slane %v7572_v45, 1 }
 0x727   : > { %v7593_v57 = vrot.slane %v7574_v29, 1  ;;  %v7585_v58 = vsel %vm1287_vm3, %v7583_v46, %v7584_v47  ;;  %v16341_v0 = vmax.f32 %v7571_v28, %v7584_v47  ;;  %v13387_v28 = vld [vmem:[%s17020_s6 + $0x168] sm:$0xff]   ;;  %v13391_v46 = vld [vmem:[%s17020_s6 + $0xf0] sm:$0xff]   ;;  %v13392_v47 = vld [vmem:[%s17020_s6 + $0x138] sm:$0xff]  }
 0x728   : > { %v7591_v59 = vsel %vm1287_vm3, %v7589_v50, %v7590_v53  ;;  %v7588_v51 = vsel %vm1287_vm3, %v7586_v52, %v7587_v54  ;;  %v7603_v9 = vmax.f32 %v7567_v42, %v7585_v58  ;;  %v16343_v5 = vmax.f32 %v7573_v18, %v7590_v53  ;;  %v13389_v18 = vld [vmem:[%s17020_s6 + $0x130] sm:$0xff]   ;;  %v13397_v50 = vld [vmem:[%s17020_s6 + $0x100] sm:$0xff]   ;;  %v13398_v52 = vld [vmem:[%s17020_s6 + $0x148] sm:$0xff]  }
 0x729   : > { %v7594_v60 = vsel %vm1287_vm3, %v7592_v56, %v7593_v57  ;;  %v7605_v61 = vmax.f32 %v7569_v26, %v7591_v59  ;;  %v7604_v55 = vmax.f32 %v7568_v2, %v7588_v51  ;;  %v16351_v15 = vmax.f32 %v7572_v45, %v7587_v54  ;;  %v13381_v26 = vld [vmem:[%s17020_s6 + $0x158] sm:$0xff]   ;;  %v13390_v45 = vld [vmem:[%s17020_s6 + $0x170] sm:$0xff]   ;;  %v13399_v53 = vld [vmem:[%s17020_s6 + $0x188] sm:$0xff]  }
 0x72a   : > { %v7606_v31 = vmax.f32 %v7570_v22, %v7594_v60  ;;  %v16353_v19 = vmax.f32 %v7574_v29, %v7593_v57  ;;  %v13382_v2 = vld [vmem:[%s17020_s6 + $0xd8] sm:$0xff]   ;;  %v13386_v22 = vld [vmem:[%s17020_s6 + $0x128] sm:$0xff]   ;;  %v13402_v56 = vld [vmem:[%s17020_s6 + $0x1e0] sm:$0xff]  }
 0x72b   : > { %v12195_v27 = vpack.i.bf16 %v7603_v9, %v7604_v55  ;;  %v12205_v30 = vpack.i.bf16 %v16341_v0, %v16351_v15  ;;  %v13393_v29 = vld [vmem:[%s17020_s6 + $0x178] sm:$0xff]   ;;  %v13400_v54 = vld [vmem:[%s17020_s6 + $0x108] sm:$0xff]   ;;  %v13401_v57 = vld [vmem:[%s17020_s6 + $0x190] sm:$0xff]  }
 0x72c   : > { %v12190_v24 = vpack.i.bf16 %v7606_v31, %v7605_v61  ;;  %v12200_v16 = vpack.i.bf16 %v16353_v19, %v16343_v5  ;;  %v13403_v58 = vld [vmem:[%s17020_s6 + $0x1a0] sm:$0xff]   ;;  %v13405_v51 = vld [vmem:[%s17020_s6 + $0x1e8] sm:$0xff]  }
 0x72d   : > { %12196 = vrot.lane.b32.xlu1 %v12195_v27, %s13609_s21  ;;  %v13411_v27 = vld [vmem:[%s17020_s6 + $0x228] sm:$0xff]  }
 0x72e   : > { %12191 = vrot.lane.b32.xlu0 %v12190_v24, %s13609_s21  ;;  %v13410_v24 = vld [vmem:[%s17020_s6 + $0x1f8] sm:$0xff]  }
 0x731   : > { %12206 = vrot.lane.b32.xlu1 %v12205_v30, %s13609_s21  ;;  %v13413_v30 = vld [vmem:[%s17020_s6 + $0x200] sm:$0xff]  }
 0x732   : > { %12201 = vrot.lane.b32.xlu0 %v12200_v16, %s13609_s21  ;;  %v13412_v16 = vld [vmem:[%s17020_s6 + $0x1b8] sm:$0xff]  }
 0x79f   : > { %v12197_v34 = vpop.permute.xlu1 %12196 }
 0x7a0   : > { %v12192_v32 = vpop.permute.xlu0 %12191  ;;  %v12199_v11 = vunpack.i.h.bf16 %v12197_v34  ;;  %v12198_v36 = vunpack.i.l.bf16 %v12197_v34  ;;  %v13415_v34 = vld [vmem:[%s17020_s6 + $0x1c0] sm:$0xff]  }
 0x7a1   : > { %v12194_v35 = vunpack.i.h.bf16 %v12192_v32  ;;  %v12193_v8 = vunpack.i.l.bf16 %v12192_v32  ;;  %v13414_v32 = vld [vmem:[%s17020_s6 + $0x230] sm:$0xff]  }
 0x7a2   : > { %v7636_v41 = vsel %vm7635_vm15, %v12199_v11, %v12198_v36  ;;  %v13418_v11 = vld [vmem:[%s17020_s6 + $0x1c8] sm:$0xff]  }
 0x7a3   : > { %v7653_v38 = vmax.f32 %v7606_v31, %v12194_v35  ;;  %v7638_v40 = vsel %vm7635_vm15, %v12193_v8, %v12194_v35  ;;  %v7637_v6 = vsel %vm7635_vm15, %v12198_v36, %v12193_v8  ;;  %v7650_v10 = vmax.f32 %v7603_v9, %v7636_v41  ;;  %v13406_v9 = vld [vmem:[%s17020_s6 + $0x1a8] sm:$0xff]   ;;  %v13407_v31 = vld [vmem:[%s17020_s6 + $0x1f0] sm:$0xff]   ;;  %v13417_v8 = vld [vmem:[%s17020_s6 + $0x238] sm:$0xff]  }
 0x7a4   : > { %v7652_v25 = vmax.f32 %v7605_v61, %v7638_v40  ;;  %v7651_v1 = vmax.f32 %v7604_v55, %v7637_v6  ;;  %v13404_v61 = vld [vmem:[%s17020_s6 + $0x198] sm:$0xff]   ;;  %v13408_v55 = vld [vmem:[%s17020_s6 + $0x220] sm:$0xff]   ;;  %v13416_v35 = vld [vmem:[%s17020_s6 + $0x208] sm:$0xff]  }
 0x7a5   : > { %v16362_v37 = vpack.c.bf16 %v7653_v38, %v7653_v38  ;;  %v16371_v42 = vpack.c.bf16 %v7650_v10, %v7650_v10  ;;  %v13419_v36 = vld [vmem:[%s17020_s6 + $0x210] sm:$0xff]   ;;  %v13420_v38 = vld [vmem:[%s17020_s6 + $0x240] sm:$0xff]   ;;  %v13422_v41 = vld [vmem:[%s17020_s6 + $0x218] sm:$0xff]  }
 0x7a6   : > { %v16367_v13 = vpack.c.bf16 %v7651_v1, %v7651_v1  ;;  %v16369_v39 = vpack.c.bf16 %v7652_v25, %v7652_v25  ;;  %v13421_v40 = vld [vmem:[%s17020_s6 + $0x1d0] sm:$0xff]   ;;  %v13423_v6 = vld [vmem:[%s17020_s6 + $0x248] sm:$0xff]   ;;  %v13424_v25 = vld [vmem:[%s17020_s6 + $0x1d8] sm:$0xff]  }
 0x7a7   : > { %11263 = vmatprep.mubr.msk.bf16.mxu1 %vm304_vm0, %v16362_v37  ;;  %v8015_v21 = vrot.slane %v16362_v37, 1  ;;  %v8012_v59 = vrot.slane %v16371_v42, 1  ;;  %v8315_v12 = vrot.slane %v16362_v37, 2  ;;  %v13426_v10 = vld [vmem:[%s17020_s6 + $0x2b0] sm:$0xff]  }
 0x7a8   : > { %7906 = vmatprep.mubr.bf16.mxu0 %v16367_v13  ;;  %7947 = vmatmul.mubr.bf16.vlgmr.msra.gmra.mrb[12].mxu1 %v16369_v39  ;;  %v8013_v43 = vrot.slane %v16367_v13, 1  ;;  %v8313_v60 = vrot.slane %v16367_v13, 2  ;;  %v8014_v62 = vrot.slane %v16369_v39, 1  ;;  %v13425_v1 = vld [vmem:[%s17020_s6 + $0x250] sm:$0xff]  }
 0x7a9   : > { %8219 = vmatpush1.bf16.msra.mxu1 %v13378_v4  ;;  %7907 = vmatmul.mubr.bf16.vlgmr.msra.gmra.mrb[28].mxu0 %v16371_v42  ;;  %v13427_v4 = vld [vmem:[%s17020_s6 + $0x270] sm:$0xff]  }
 0x7aa   : > { %11765 = vmatpush3.bf16.msra.mxu0 %v13379_v14  ;;  %11342 = vmatprep.mubr.msk.bf16.mxu1 %vm304_vm0, %v8015_v21  ;;  %v8312_v14 = vrot.slane %v16371_v42, 2  ;;  %v13429_v21 = vld [vmem:[%s17020_s6 + $0x2b8] sm:$0xff]  }
 0x7ab   : > { %8210 = vmatprep.mubr.bf16.mxu0 %v8013_v43  ;;  %8220 = vmatprep.subr.bf16.mxu1 %v13604_v3  ;;  %v8613_v43 = vrot.slane %v16367_v13, 3  ;;  %v13431_v13 = vld [vmem:[%s17020_s6 + $0x260] sm:$0xff]  }
 0x7ac   : > { %11766 = vmatprep.subr.bf16.mxu0 %v13380_v33  ;;  %v13428_v33 = vld [vmem:[%s17020_s6 + $0x258] sm:$0xff]  }
 0x7ad   : > { %8221 = vmatpush1.bf16.msra.mxu1 %v13381_v26  ;;  %v13430_v26 = vld [vmem:[%s17020_s6 + $0x278] sm:$0xff]  }
 0x7ae   : > { %11767 = vmatpush3.bf16.msra.mxu0 %v13382_v2  ;;  %8222 = vmatprep.subr.bf16.mxu1 %v13604_v3  ;;  %v13432_v2 = vld [vmem:[%s17020_s6 + $0x2c0] sm:$0xff]  }
 0x7af   : > { %11768 = vmatprep.subr.bf16.mxu0 %v13383_v44  ;;  %v13433_v44 = vld [vmem:[%s17020_s6 + $0x280] sm:$0xff]  }
 0x7b1   : > { %8223 = vmatpush1.bf16.msra.mxu1 %v13384_v23  ;;  %v13435_v23 = vld [vmem:[%s17020_s6 + $0x2c8] sm:$0xff]  }
 0x7b2   : > { %11769 = vmatpush3.bf16.msra.mxu0 %v13385_v20  ;;  %8224 = vmatprep.subr.bf16.mxu1 %v13604_v3  ;;  %v13434_v20 = vld [vmem:[%s17020_s6 + $0x268] sm:$0xff]  }
 0x7b3   : > { %11770 = vmatprep.subr.bf16.mxu0 %v13386_v22  ;;  %v13436_v22 = vld [vmem:[%s17020_s6 + $0x288] sm:$0xff]  }
 0x7b5   : > { %8225 = vmatpush1.bf16.msra.mxu1 %v13387_v28  ;;  %v13437_v28 = vld [vmem:[%s17020_s6 + $0x2d0] sm:$0xff]  }
 0x7b6   : > { %11771 = vmatpush3.bf16.msra.mxu0 %v13388_v63  ;;  %8226 = vmatprep.subr.bf16.mxu1 %v13604_v3  ;;  %v13438_v63 = vld [vmem:[%s17020_s6 + $0x2f0] sm:$0xff]  }
 0x7b7   : > { %11772 = vmatprep.subr.bf16.mxu0 %v13389_v18  ;;  %v8314_v18 = vrot.slane %v16369_v39, 2 }
 0x7b9   : > { %8227 = vmatpush1.bf16.msra.mxu1 %v13390_v45  ;;  %v13439_v45 = vld [vmem:[%s17020_s6 + $0x290] sm:$0xff]  }
 0x7ba   : > { %11773 = vmatpush3.bf16.msra.mxu0 %v13391_v46  ;;  %8228 = vmatprep.subr.bf16.mxu1 %v13604_v3  ;;  %v8615_v46 = vrot.slane %v16362_v37, 3  ;;  %v13442_v37 = vld [vmem:[%s17020_s6 + $0x298] sm:$0xff]  }
 0x7bb   : > { %11774 = vmatprep.subr.bf16.mxu0 %v13392_v47  ;;  %v13440_v47 = vld [vmem:[%s17020_s6 + $0x2d8] sm:$0xff]  }
 0x7bd   : > { %8229 = vmatpush1.bf16.msra.mxu1 %v13393_v29  ;;  %v13441_v29 = vld [vmem:[%s17020_s6 + $0x2f8] sm:$0xff]  }
 0x7be   : > { %11775 = vmatpush3.bf16.msra.mxu0 %v13394_v17  ;;  %8230 = vmatprep.subr.bf16.mxu1 %v13604_v3  ;;  %v16600_v17 = vpop.permute.xlu0 %12201 }
 0x7bf   : > { %11776 = vmatprep.subr.bf16.mxu0 %v13395_v48  ;;  %v16602_v48 = vpop.permute.xlu1 %12206 }
 0x7c1   : > { %8231 = vmatpush1.bf16.msra.mxu1 %v13396_v49  ;;  %v13443_v49 = vld [vmem:[%s17020_s6 + $0x2e0] sm:$0xff]  }
 0x7c2   : > { %11777 = vmatpush3.bf16.msra.mxu0 %v13397_v50  ;;  %8232 = vmatprep.subr.bf16.mxu1 %v13604_v3  ;;  %v12203_v50 = vunpack.i.l.bf16 %v16600_v17 }
 0x7c3   : > { %11778 = vmatprep.subr.bf16.mxu0 %v13398_v52  ;;  %v12208_v52 = vunpack.i.l.bf16 %v16602_v48 }
 0x7c5   : > { %8233 = vmatpush1.bf16.msra.mxu1 %v13399_v53  ;;  %v13444_v53 = vld [vmem:[%s17020_s6 + $0x300] sm:$0xff]  }
 0x7c6   : > { %11779 = vmatpush3.bf16.msra.mxu0 %v13400_v54  ;;  %8234 = vmatprep.subr.bf16.mxu1 %v13604_v3  ;;  %v13445_v54 = vld [vmem:[%s17020_s6 + $0x2a0] sm:$0xff]  }
 0x7c7   : > { %11786 = vmatprep.subr.bf16.mxu0 %v13402_v56  ;;  %v13446_v56 = vld [vmem:[%s17020_s6 + $0x2e8] sm:$0xff]  }
 0x7c9   : > { %8211 = vmatmul.mubr.bf16.vlgmr.msra.gmra.mrb[32].mxu0 %v8012_v59  ;;  %8235 = vmatpush1.bf16.msra.mxu1 %v13401_v57  ;;  %v7640_v57 = vsel %vm7635_vm15, %v12208_v52, %v12203_v50  ;;  %v13448_v59 = vld [vmem:[%s17020_s6 + $0x2a8] sm:$0xff]  }
 0x7ca   : > { %11787 = vmatpush3.bf16.msra.mxu0 %v13403_v58  ;;  %8510 = vmatprep.mubr.bf16.mxu0 %v8313_v60  ;;  %v13447_v58 = vld [vmem:[%s17020_s6 + $0x308] sm:$0xff]   ;;  %v7655_v60 = vmax.f32 %v16351_v15, %v7640_v57 }
 0x7cb   : > { %8236 = vmatprep.subr.bf16.mxu1 %v13604_v3  ;;  %11788 = vmatprep.subr.bf16.mxu0 %v13405_v51  ;;  %v13450_v51 = vld [vmem:[%s17020_s6 + $0x380] sm:$0xff]  }
 0x7cc   : > { %v16650_v15 = vpack.c.bf16 %v7655_v60, %v7655_v60  ;;  %v13497_v60 = vld [vmem:[%s17020_s6 + $0x490] sm:$0xff]  }
 0x7cd   : > { %8237 = vmatpush1.bf16.msra.mxu1 %v13404_v61  ;;  %v13449_v61 = vld [vmem:[%s17020_s6 + $0x310] sm:$0xff]  }
 0x7ce   : > { %11789 = vmatpush3.bf16.msra.mxu0 %v13406_v9  ;;  %8518 = vmatprep.subr.bf16.mxu1 %v13604_v3  ;;  %v13451_v9 = vld [vmem:[%s17020_s6 + $0x340] sm:$0xff]  }
 0x7cf   : > { %11790 = vmatprep.subr.bf16.mxu0 %v13407_v31  ;;  %v8612_v31 = vrot.slane %v16371_v42, 3  ;;  %v13454_v42 = vld [vmem:[%s17020_s6 + $0x348] sm:$0xff]  }
 0x7d0   : > { %8251 = vmatmul.mubr.bf16.vlgmr.msra.gmra.mrb[12].mxu1 %v8014_v62  ;;  %v13452_v62 = vld [vmem:[%s17020_s6 + $0x318] sm:$0xff]  }
 0x7d1   : > { %8519 = vmatpush1.bf16.msra.mxu1 %v13408_v55  ;;  %11421 = vmatprep.mubr.msk.bf16.mxu1 %vm304_vm0, %v8315_v12  ;;  %v13453_v55 = vld [vmem:[%s17020_s6 + $0x388] sm:$0xff]   ;;  %v13455_v12 = vld [vmem:[%s17020_s6 + $0x320] sm:$0xff]  }
 0x7d2   : > { %11791 = vmatpush3.bf16.msra.mxu0 %v13409_v7  ;;  %8520 = vmatprep.subr.bf16.mxu1 %v13604_v3  ;;  %v13456_v7 = vld [vmem:[%s17020_s6 + $0x390] sm:$0xff]  }
 0x7d3   : > { %11792 = vmatprep.subr.bf16.mxu0 %v13410_v24  ;;  %v13457_v24 = vld [vmem:[%s17020_s6 + $0x350] sm:$0xff]  }
 0x7d5   : > { %8521 = vmatpush1.bf16.msra.mxu1 %v13411_v27  ;;  %v13459_v27 = vld [vmem:[%s17020_s6 + $0x398] sm:$0xff]  }
 0x7d6   : > { %11793 = vmatpush3.bf16.msra.mxu0 %v13412_v16  ;;  %8522 = vmatprep.subr.bf16.mxu1 %v13604_v3  ;;  %v13458_v16 = vld [vmem:[%s17020_s6 + $0x328] sm:$0xff]  }
 0x7d7   : > { %11794 = vmatprep.subr.bf16.mxu0 %v13413_v30  ;;  %v13460_v30 = vld [vmem:[%s17020_s6 + $0x358] sm:$0xff]  }
 0x7d9   : > { %8523 = vmatpush1.bf16.msra.mxu1 %v13414_v32  ;;  %v13462_v32 = vld [vmem:[%s17020_s6 + $0x3a0] sm:$0xff]  }
 0x7da   : > { %11795 = vmatpush3.bf16.msra.mxu0 %v13415_v34  ;;  %8524 = vmatprep.subr.bf16.mxu1 %v13604_v3  ;;  %v13461_v34 = vld [vmem:[%s17020_s6 + $0x330] sm:$0xff]  }
 0x7db   : > { %11796 = vmatprep.subr.bf16.mxu0 %v13416_v35  ;;  %v13463_v35 = vld [vmem:[%s17020_s6 + $0x360] sm:$0xff]  }
 0x7dd   : > { %8525 = vmatpush1.bf16.msra.mxu1 %v13417_v8  ;;  %v12204_v8 = vunpack.i.h.bf16 %v16600_v17  ;;  %v13496_v17 = vld [vmem:[%s17020_s6 + $0x448] sm:$0xff]  }
 0x7de   : > { %11797 = vmatpush3.bf16.msra.mxu0 %v13418_v11  ;;  %8526 = vmatprep.subr.bf16.mxu1 %v13604_v3  ;;  %v13465_v11 = vld [vmem:[%s17020_s6 + $0x3a8] sm:$0xff]  }
 0x7df   : > { %11798 = vmatprep.subr.bf16.mxu0 %v13419_v36  ;;  %v13464_v36 = vld [vmem:[%s17020_s6 + $0x338] sm:$0xff]   ;;  %v7641_v57 = vsel %vm7635_vm15, %v12203_v50, %v12204_v8  ;;  %v13498_v50 = vld [vmem:[%s17020_s6 + $0x520] sm:$0xff]  }
 0x7e1   : > { %8527 = vmatpush1.bf16.msra.mxu1 %v13420_v38  ;;  %v13466_v38 = vld [vmem:[%s17020_s6 + $0x368] sm:$0xff]  }
 0x7e2   : > { %11799 = vmatpush3.bf16.msra.mxu0 %v13421_v40  ;;  %8528 = vmatprep.subr.bf16.mxu1 %v13604_v3  ;;  %v7657_v40 = vmax.f32 %v16353_v19, %v12204_v8  ;;  %v13469_v19 = vld [vmem:[%s17020_s6 + $0x370] sm:$0xff]   ;;  %v13513_v8 = vld [vmem:[%s17020_s6 + $0x548] sm:$0xff]  }
 0x7e3   : > { %11800 = vmatprep.subr.bf16.mxu0 %v13422_v41  ;;  %v13467_v41 = vld [vmem:[%s17020_s6 + $0x3b0] sm:$0xff]  }
 0x7e5   : > { %8529 = vmatpush1.bf16.msra.mxu1 %v13423_v6  ;;  %v12209_v6 = vunpack.i.h.bf16 %v16602_v48  ;;  %v13487_v48 = vld [vmem:[%s17020_s6 + $0x430] sm:$0xff]  }
 0x7e6   : > { %11801 = vmatpush3.bf16.msra.mxu0 %v13424_v25  ;;  %8530 = vmatprep.subr.bf16.mxu1 %v13604_v3  ;;  %v13468_v25 = vld [vmem:[%s17020_s6 + $0x3c0] sm:$0xff]  }
 0x7e7   : > { %11808 = vmatprep.subr.bf16.mxu0 %v13426_v10  ;;  %v8614_v10 = vrot.slane %v16369_v39, 3  ;;  %v13471_v39 = vld [vmem:[%s17020_s6 + $0x3c8] sm:$0xff]  }
 0x7e9   : > { %8511 = vmatmul.mubr.bf16.vlgmr.msra.gmra.mrb[36].mxu0 %v8312_v14  ;;  %8531 = vmatpush1.bf16.msra.mxu1 %v13425_v1  ;;  %v16716_v1 = vpack.c.bf16 %v7657_v40, %v7657_v40  ;;  %v7639_v14 = vsel %vm7635_vm15, %v12209_v6, %v12208_v52  ;;  %v13490_v52 = vld [vmem:[%s17020_s6 + $0x438] sm:$0xff]   ;;  %v13515_v40 = vld [vmem:[%s17020_s6 + $0x4c0] sm:$0xff]  }
 0x7ea   : > { %11809 = vmatpush3.bf16.msra.mxu0 %v13427_v4  ;;  %8810 = vmatprep.mubr.bf16.mxu0 %v8613_v43  ;;  %v13470_v4 = vld [vmem:[%s17020_s6 + $0x3b8] sm:$0xff]   ;;  %v7654_v43 = vmax.f32 %v16341_v0, %v7639_v14 }
 0x7eb   : > { %8532 = vmatprep.subr.bf16.mxu1 %v13604_v3  ;;  %11810 = vmatprep.subr.bf16.mxu0 %v13429_v21  ;;  %v13472_v21 = vld [vmem:[%s17020_s6 + $0x378] sm:$0xff]  }
 0x7ec   : > { %v13477_v0 = vld [vmem:[%s17020_s6 + $0x458] sm:$0xff]  }
 0x7ed   : > { %8533 = vmatpush1.bf16.msra.mxu1 %v13428_v33  ;;  %v13474_v33 = vld [vmem:[%s17020_s6 + $0x450] sm:$0xff]   ;;  %v13519_v6 = vld [vmem:[%s17020_s6 + $0x558] sm:$0xff]  }
 0x7ee   : > { %11811 = vmatpush3.bf16.msra.mxu0 %v13430_v26  ;;  %8534 = vmatprep.subr.bf16.mxu1 %v13604_v3  ;;  %v13473_v26 = vld [vmem:[%s17020_s6 + $0x3d0] sm:$0xff]   ;;  %v13522_v14 = vld [vmem:[%s17020_s6 + $0x4d8] sm:$0xff]  }
 0x7ef   : > { %11812 = vmatprep.subr.bf16.mxu0 %v13432_v2  ;;  %v13475_v2 = vld [vmem:[%s17020_s6 + $0x410] sm:$0xff]  }
 0x7f1   : > { %8535 = vmatpush1.bf16.msra.mxu1 %v13431_v13  ;;  %v16744_v13 = vpack.c.bf16 %v7654_v43, %v7654_v43  ;;  %v9516_v43 = vrot.slane %v16716_v1, 2 }
 0x7f2   : > { %11813 = vmatpush3.bf16.msra.mxu0 %v13433_v44  ;;  %8536 = vmatprep.subr.bf16.mxu1 %v13604_v3  ;;  %v9214_v44 = vrot.slane %v16650_v15, 1 }
 0x7f3   : > { %11814 = vmatprep.subr.bf16.mxu0 %v13435_v23  ;;  %v13476_v23 = vld [vmem:[%s17020_s6 + $0x3d8] sm:$0xff]  }
 0x7f5   : > { %8537 = vmatpush1.bf16.msra.mxu1 %v13434_v20  ;;  %v13478_v20 = vld [vmem:[%s17020_s6 + $0x418] sm:$0xff]  }
 0x7f6   : > { %11815 = vmatpush3.bf16.msra.mxu0 %v13436_v22  ;;  %8818 = vmatprep.subr.bf16.mxu1 %v13604_v3  ;;  %v13480_v22 = vld [vmem:[%s17020_s6 + $0x460] sm:$0xff]  }
 0x7f7   : > { %11816 = vmatprep.subr.bf16.mxu0 %v13437_v28  ;;  %v13479_v28 = vld [vmem:[%s17020_s6 + $0x3e0] sm:$0xff]  }
 0x7f8   : > { %8551 = vmatmul.mubr.bf16.vlgmr.msra.gmra.mrb[12].mxu1 %v8314_v18  ;;  %v13483_v18 = vld [vmem:[%s17020_s6 + $0x468] sm:$0xff]  }
 0x7f9   : > { %8819 = vmatpush1.bf16.msra.mxu1 %v13438_v63  ;;  %11500 = vmatprep.mubr.msk.bf16.mxu1 %vm304_vm0, %v8615_v46  ;;  %v13481_v63 = vld [vmem:[%s17020_s6 + $0x420] sm:$0xff]   ;;  %v13484_v46 = vld [vmem:[%s17020_s6 + $0x428] sm:$0xff]  }
 0x7fa   : > { %11817 = vmatpush3.bf16.msra.mxu0 %v13439_v45  ;;  %8820 = vmatprep.subr.bf16.mxu1 %v13604_v3  ;;  %v13482_v45 = vld [vmem:[%s17020_s6 + $0x3e8] sm:$0xff]  }
 0x7fb   : > { %11818 = vmatprep.subr.bf16.mxu0 %v13440_v47  ;;  %v13486_v47 = vld [vmem:[%s17020_s6 + $0x470] sm:$0xff]  }
 0x7fd   : > { %8821 = vmatpush1.bf16.msra.mxu1 %v13441_v29  ;;  %v13485_v29 = vld [vmem:[%s17020_s6 + $0x3f0] sm:$0xff]  }
 0x7fe   : > { %11819 = vmatpush3.bf16.msra.mxu0 %v13442_v37  ;;  %8822 = vmatprep.subr.bf16.mxu1 %v13604_v3  ;;  %v13489_v37 = vld [vmem:[%s17020_s6 + $0x478] sm:$0xff]  }
 0x7ff   : > { %11820 = vmatprep.subr.bf16.mxu0 %v13443_v49  ;;  %v13488_v49 = vld [vmem:[%s17020_s6 + $0x3f8] sm:$0xff]  }
 0x801   : > { %8823 = vmatpush1.bf16.msra.mxu1 %v13444_v53  ;;  %v13492_v53 = vld [vmem:[%s17020_s6 + $0x480] sm:$0xff]  }
 0x802   : > { %11821 = vmatpush3.bf16.msra.mxu0 %v13445_v54  ;;  %8824 = vmatprep.subr.bf16.mxu1 %v13604_v3  ;;  %v13491_v54 = vld [vmem:[%s17020_s6 + $0x400] sm:$0xff]  }
 0x803   : > { %11822 = vmatprep.subr.bf16.mxu0 %v13446_v56  ;;  %v13493_v56 = vld [vmem:[%s17020_s6 + $0x440] sm:$0xff]  }
 0x805   : > { %8825 = vmatpush1.bf16.msra.mxu1 %v13447_v58  ;;  %v13495_v58 = vld [vmem:[%s17020_s6 + $0x488] sm:$0xff]  }
 0x806   : > { %11823 = vmatpush3.bf16.msra.mxu0 %v13448_v59  ;;  %8826 = vmatprep.subr.bf16.mxu1 %v13604_v3  ;;  %v13494_v59 = vld [vmem:[%s17020_s6 + $0x408] sm:$0xff]  }
 0x807   : > { %11830 = vmatprep.subr.bf16.mxu0 %v13450_v51  ;;  %v7656_v51 = vmax.f32 %v16343_v5, %v7641_v57  ;;  %v13499_v5 = vld [vmem:[%s17020_s6 + $0x4e0] sm:$0xff]  }
 0x809   : > { %8811 = vmatmul.mubr.bf16.vlgmr.msra.gmra.mrb[40].mxu0 %v8612_v31  ;;  %8827 = vmatpush1.bf16.msra.mxu1 %v13449_v61  ;;  %v16830_v61 = vpack.c.bf16 %v7656_v51, %v7656_v51  ;;  %v9216_v31 = vrot.slane %v16716_v1, 1 }
 0x80a   : > { %11831 = vmatpush3.bf16.msra.mxu0 %v13451_v9  ;;  %9107 = vmatprep.mubr.bf16.mxu0 %v16650_v15  ;;  %v9213_v9 = vrot.slane %v16744_v13, 1 }
 0x80b   : > { %8828 = vmatprep.subr.bf16.mxu1 %v13604_v3  ;;  %11832 = vmatprep.subr.bf16.mxu0 %v13453_v55  ;;  %v13501_v55 = vld [vmem:[%s17020_s6 + $0x528] sm:$0xff]  }
 0x80d   : > { %8829 = vmatpush1.bf16.msra.mxu1 %v13452_v62  ;;  %v9514_v62 = vrot.slane %v16650_v15, 2  ;;  %v13503_v15 = vld [vmem:[%s17020_s6 + $0x4a0] sm:$0xff]  }
 0x80e   : > { %11833 = vmatpush3.bf16.msra.mxu0 %v13454_v42  ;;  %8830 = vmatprep.subr.bf16.mxu1 %v13604_v3  ;;  %v13500_v42 = vld [vmem:[%s17020_s6 + $0x498] sm:$0xff]  }
 0x80f   : > { %11834 = vmatprep.subr.bf16.mxu0 %v13456_v7  ;;  %v13502_v7 = vld [vmem:[%s17020_s6 + $0x4e8] sm:$0xff]  }
 0x811   : > { %8831 = vmatpush1.bf16.msra.mxu1 %v13455_v12  ;;  %v13504_v12 = vld [vmem:[%s17020_s6 + $0x530] sm:$0xff]  }
 0x812   : > { %11835 = vmatpush3.bf16.msra.mxu0 %v13457_v24  ;;  %8832 = vmatprep.subr.bf16.mxu1 %v13604_v3  ;;  %v13505_v24 = vld [vmem:[%s17020_s6 + $0x4f0] sm:$0xff]  }
 0x813   : > { %11836 = vmatprep.subr.bf16.mxu0 %v13459_v27  ;;  %v13507_v27 = vld [vmem:[%s17020_s6 + $0x538] sm:$0xff]  }
 0x815   : > { %8833 = vmatpush1.bf16.msra.mxu1 %v13458_v16  ;;  %v13506_v16 = vld [vmem:[%s17020_s6 + $0x4a8] sm:$0xff]  }
 0x816   : > { %11837 = vmatpush3.bf16.msra.mxu0 %v13460_v30  ;;  %8834 = vmatprep.subr.bf16.mxu1 %v13604_v3  ;;  %v13508_v30 = vld [vmem:[%s17020_s6 + $0x4f8] sm:$0xff]  }
 0x817   : > { %11838 = vmatprep.subr.bf16.mxu0 %v13462_v32  ;;  %v13510_v32 = vld [vmem:[%s17020_s6 + $0x540] sm:$0xff]  }
 0x819   : > { %8835 = vmatpush1.bf16.msra.mxu1 %v13461_v34  ;;  %v13509_v34 = vld [vmem:[%s17020_s6 + $0x4b0] sm:$0xff]  }
 0x81a   : > { %11839 = vmatpush3.bf16.msra.mxu0 %v13463_v35  ;;  %8836 = vmatprep.subr.bf16.mxu1 %v13604_v3  ;;  %v13511_v35 = vld [vmem:[%s17020_s6 + $0x500] sm:$0xff]  }
 0x81b   : > { %11840 = vmatprep.subr.bf16.mxu0 %v13465_v11  ;;  %v13512_v11 = vld [vmem:[%s17020_s6 + $0x4b8] sm:$0xff]  }
 0x81d   : > { %8837 = vmatpush1.bf16.msra.mxu1 %v13464_v36  ;;  %v13514_v36 = vld [vmem:[%s17020_s6 + $0x508] sm:$0xff]  }
 0x81e   : > { %11841 = vmatpush3.bf16.msra.mxu0 %v13466_v38  ;;  %9115 = vmatprep.subr.bf16.mxu1 %v13604_v3  ;;  %v13516_v38 = vld [vmem:[%s17020_s6 + $0x550] sm:$0xff]  }
 0x81f   : > { %11842 = vmatprep.subr.bf16.mxu0 %v13467_v41  ;;  %v13517_v41 = vld [vmem:[%s17020_s6 + $0x510] sm:$0xff]  }
 0x820   : > { %8851 = vmatmul.mubr.bf16.vlgmr.msra.gmra.mrb[12].mxu1 %v8614_v10  ;;  %v13520_v10 = vld [vmem:[%s17020_s6 + $0x518] sm:$0xff]  }
 0x821   : > { %9116 = vmatpush1.bf16.msra.mxu1 %v13468_v25  ;;  %11579 = vmatprep.mubr.msk.bf16.mxu1 %vm304_vm0, %v16716_v1  ;;  %v13518_v25 = vld [vmem:[%s17020_s6 + $0x4c8] sm:$0xff]   ;;  %v13526_v1 = vld [vmem:[%s17020_s6 + $0x578] sm:$0xff]  }
 0x822   : > { %11843 = vmatpush3.bf16.msra.mxu0 %v13469_v19  ;;  %9117 = vmatprep.subr.bf16.mxu1 %v13604_v3  ;;  %v13521_v19 = vld [vmem:[%s17020_s6 + $0x4d0] sm:$0xff]  }
 0x823   : > { %11844 = vmatprep.subr.bf16.mxu0 %v13470_v4  ;;  %v9513_v4 = vrot.slane %v16744_v13, 2 }
 0x825   : > { %9118 = vmatpush1.bf16.msra.mxu1 %v13471_v39  ;;  %v13523_v39 = vld [vmem:[%s17020_s6 + $0x560] sm:$0xff]  }
 0x826   : > { %11845 = vmatpush3.bf16.msra.mxu0 %v13472_v21  ;;  %9119 = vmatprep.subr.bf16.mxu1 %v13604_v3  ;;  %v9215_v21 = vrot.slane %v16830_v61, 1 }
 0x827   : > { %11852 = vmatprep.subr.bf16.mxu0 %v13474_v33  ;;  %v13524_v33 = vld [vmem:[%s17020_s6 + $0x568] sm:$0xff]  }
 0x829   : > { %9108 = vmatmul.mubr.bf16.vlgmr.msra.gmra.mrb[44].mxu0 %v16744_v13  ;;  %9120 = vmatpush1.bf16.msra.mxu1 %v13473_v26  ;;  %v13525_v26 = vld [vmem:[%s17020_s6 + $0x570] sm:$0xff]  }
 0x82a   : > { %11853 = vmatpush3.bf16.msra.mxu0 %v13475_v2  ;;  %9411 = vmatprep.mubr.bf16.mxu0 %v9214_v44 }
 0x82b   : > { %9121 = vmatprep.subr.bf16.mxu1 %v13604_v3  ;;  %11854 = vmatprep.subr.bf16.mxu0 %v13477_v0  ;;  %v13527_v0 = vld [vmem:[%s17020_s6 + $0x580] sm:$0xff]  }
 0x82d   : > { %9122 = vmatpush1.bf16.msra.mxu1 %v13476_v23 }
 0x82e   : > { %11855 = vmatpush3.bf16.msra.mxu0 %v13478_v20  ;;  %9123 = vmatprep.subr.bf16.mxu1 %v13604_v3 }
 0x82f   : > { %11856 = vmatprep.subr.bf16.mxu0 %v13480_v22  ;;  %v13528_v22 = vld [vmem:[%s17020_s6 + $0x588] sm:$0xff]  }
 0x831   : > { %9124 = vmatpush1.bf16.msra.mxu1 %v13479_v28  ;;  %v13529_v28 = vld [vmem:[%s17020_s6 + $0x590] sm:$0xff]  }
 0x832   : > { %11857 = vmatpush3.bf16.msra.mxu0 %v13481_v63  ;;  %9125 = vmatprep.subr.bf16.mxu1 %v13604_v3  ;;  %v13530_v63 = vld [vmem:[%s17020_s6 + $0x598] sm:$0xff]  }
 0x833   : > { %11858 = vmatprep.subr.bf16.mxu0 %v13483_v18  ;;  %v13531_v18 = vld [vmem:[%s17020_s6 + $0x5a0] sm:$0xff]  }
 0x835   : > { %9126 = vmatpush1.bf16.msra.mxu1 %v13482_v45  ;;  %v13532_v45 = vld [vmem:[%s17020_s6 + $0x5a8] sm:$0xff]  }
 0x836   : > { %11859 = vmatpush3.bf16.msra.mxu0 %v13484_v46  ;;  %9127 = vmatprep.subr.bf16.mxu1 %v13604_v3  ;;  %v9515_v46 = vrot.slane %v16830_v61, 2 }
 0x837   : > { %11860 = vmatprep.subr.bf16.mxu0 %v13486_v47  ;;  %v7658_v47 = vld [vmem:[%s17021_s7] sm:$0x1] }
 0x839   : > { %9128 = vmatpush1.bf16.msra.mxu1 %v13485_v29 }
 0x83a   : > { %11861 = vmatpush3.bf16.msra.mxu0 %v13487_v48  ;;  %9129 = vmatprep.subr.bf16.mxu1 %v13604_v3 }
 0x83b   : > { %11862 = vmatprep.subr.bf16.mxu0 %v13489_v37 }
 0x83d   : > { %9130 = vmatpush1.bf16.msra.mxu1 %v13488_v49 }
 0x83e   : > { %11863 = vmatpush3.bf16.msra.mxu0 %v13490_v52  ;;  %9131 = vmatprep.subr.bf16.mxu1 %v13604_v3 }
 0x83f   : > { %11864 = vmatprep.subr.bf16.mxu0 %v13492_v53 }
 0x841   : > { %9132 = vmatpush1.bf16.msra.mxu1 %v13491_v54 }
 0x842   : > { %11865 = vmatpush3.bf16.msra.mxu0 %v13493_v56  ;;  %9133 = vmatprep.subr.bf16.mxu1 %v13604_v3 }
 0x843   : > { %11866 = vmatprep.subr.bf16.mxu0 %v13495_v58 }
 0x845   : > { %9134 = vmatpush1.bf16.msra.mxu1 %v13494_v59 }
 0x846   : > { %11867 = vmatpush3.bf16.msra.mxu0 %v13496_v17  ;;  %9419 = vmatprep.subr.bf16.mxu1 %v13604_v3 }
 0x847   : > { %11874 = vmatprep.subr.bf16.mxu0 %v13498_v50 }
 0x848   : > { %9148 = vmatmul.mubr.bf16.vlgmr.msra.gmra.mrb[12].mxu1 %v16830_v61 }
 0x849   : > { %9412 = vmatmul.mubr.bf16.vlgmr.msra.gmra.mrb[48].mxu0 %v9213_v9  ;;  %9420 = vmatpush1.bf16.msra.mxu1 %v13497_v60 }
 0x84a   : > { %11658 = vmatprep.mubr.msk.bf16.mxu1 %vm304_vm0, %v9216_v31  ;;  %11875 = vmatpush3.bf16.msra.mxu0 %v13499_v5 }
 0x84b   : > { %9711 = vmatprep.mubr.bf16.mxu0 %v9514_v62  ;;  %9421 = vmatprep.subr.bf16.mxu1 %v13604_v3 }
 0x84c   : > { %11876 = vmatprep.subr.bf16.mxu0 %v13501_v55 }
 0x84d   : > { %9422 = vmatpush1.bf16.msra.mxu1 %v13500_v42 }
 0x84e   : > { %11877 = vmatpush3.bf16.msra.mxu0 %v13502_v7  ;;  %9423 = vmatprep.subr.bf16.mxu1 %v13604_v3 }
 0x84f   : > { %11878 = vmatprep.subr.bf16.mxu0 %v13504_v12 }
 0x851   : > { %9424 = vmatpush1.bf16.msra.mxu1 %v13503_v15 }
 0x852   : > { %11879 = vmatpush3.bf16.msra.mxu0 %v13505_v24  ;;  %9425 = vmatprep.subr.bf16.mxu1 %v13604_v3 }
 0x853   : > { %11880 = vmatprep.subr.bf16.mxu0 %v13507_v27 }
 0x855   : > { %9426 = vmatpush1.bf16.msra.mxu1 %v13506_v16 }
 0x856   : > { %11881 = vmatpush3.bf16.msra.mxu0 %v13508_v30  ;;  %9427 = vmatprep.subr.bf16.mxu1 %v13604_v3 }
 0x857   : > { %11882 = vmatprep.subr.bf16.mxu0 %v13510_v32 }
 0x859   : > { %9428 = vmatpush1.bf16.msra.mxu1 %v13509_v34 }
 0x85a   : > { %11883 = vmatpush3.bf16.msra.mxu0 %v13511_v35  ;;  %9429 = vmatprep.subr.bf16.mxu1 %v13604_v3 }
 0x85b   : > { %11884 = vmatprep.subr.bf16.mxu0 %v13513_v8 }
 0x85d   : > { %9430 = vmatpush1.bf16.msra.mxu1 %v13512_v11 }
 0x85e   : > { %11885 = vmatpush3.bf16.msra.mxu0 %v13514_v36  ;;  %9431 = vmatprep.subr.bf16.mxu1 %v13604_v3 }
 0x85f   : > { %11886 = vmatprep.subr.bf16.mxu0 %v13516_v38 }
 0x861   : > { %9432 = vmatpush1.bf16.msra.mxu1 %v13515_v40 }
 0x862   : > { %11887 = vmatpush3.bf16.msra.mxu0 %v13517_v41  ;;  %9433 = vmatprep.subr.bf16.mxu1 %v13604_v3 }
 0x863   : > { %11888 = vmatprep.subr.bf16.mxu0 %v13519_v6 }
 0x865   : > { %9434 = vmatpush1.bf16.msra.mxu1 %v13518_v25 }
 0x866   : > { %11889 = vmatpush3.bf16.msra.mxu0 %v13520_v10  ;;  %9435 = vmatprep.subr.bf16.mxu1 %v13604_v3 }
 0x869   : > { %9436 = vmatpush1.bf16.msra.mxu1 %v13521_v19  ;;  %9712 = vmatmul.mubr.bf16.vlgmr.msra.gmra.mrb[52].mxu0 %v9513_v4 }
 0x86a   : > { %9437 = vmatprep.subr.bf16.mxu1 %v13604_v3 }
 0x86d   : > { %9438 = vmatpush1.bf16.msra.mxu1 %v13522_v14 }
 0x86e   : > { %9719 = vmatprep.subr.bf16.mxu1 %v13604_v3 }
 0x870   : > { %9452 = vmatmul.mubr.bf16.vlgmr.msra.gmra.mrb[12].mxu1 %v9215_v21 }
 0x871   : > { %9720 = vmatpush1.bf16.msra.mxu1 %v13523_v39  ;;  %11737 = vmatprep.mubr.msk.bf16.mxu1 %vm304_vm0, %v9516_v43  ;;  %vm9760_vm0 = vcmask 73728  }
 0x872   : > { %9721 = vmatprep.subr.bf16.mxu1 %v13604_v3 }
 0x875   : > { %9722 = vmatpush1.bf16.msra.mxu1 %v13524_v33 }
 0x876   : > { %9723 = vmatprep.subr.bf16.mxu1 %v13604_v3 }
 0x879   : > { %9724 = vmatpush1.bf16.msra.mxu1 %v13525_v26 }
 0x87a   : > { %9725 = vmatprep.subr.bf16.mxu1 %v13604_v3 }
 0x87c   : > { %v11758_v2 = vpop.f32.mrb[28].mxu0 }
 0x87d   : > { %9726 = vmatpush1.bf16.msra.mxu1 %v13526_v1  ;;  %v11759_v13 = vpop.f32.mrb[29].mxu0 }
 0x87e   : > { %v11760_v44 = vadd.f32 %v11759_v13, %v11758_v2  ;;  %v11761_v23 = vpop.f32.mrb[30].mxu0  ;;  %9727 = vmatprep.subr.bf16.mxu1 %v13604_v3 }
 0x87f   : > { %v11762_v20 = vpop.f32.mrb[31].mxu0 }
 0x880   : > { %v11904_v37 = vadd.f32 %v11760_v44, %v7658_v47 }
 0x881   : > { %9728 = vmatpush1.bf16.msra.mxu1 %v13527_v0 }
 0x882   : > { %9729 = vmatprep.subr.bf16.mxu1 %v13604_v3 }
 0x885   : > { %9730 = vmatpush1.bf16.msra.mxu1 %v13528_v22 }
 0x886   : > { %9731 = vmatprep.subr.bf16.mxu1 %v13604_v3 }
 0x889   : > { %9732 = vmatpush1.bf16.msra.mxu1 %v13529_v28 }
 0x88a   : > { %9733 = vmatprep.subr.bf16.mxu1 %v13604_v3 }
 0x88d   : > { %9734 = vmatpush1.bf16.msra.mxu1 %v13530_v63 }
 0x88e   : > { %9735 = vmatprep.subr.bf16.mxu1 %v13604_v3 }
 0x891   : > { %9736 = vmatpush1.bf16.msra.mxu1 %v13531_v18 }
 0x892   : > { %9737 = vmatprep.subr.bf16.mxu1 %v13604_v3 }
 0x895   : > { %9738 = vmatpush1.bf16.msra.mxu1 %v13532_v45 }
 0x898   : > { %9752 = vmatmul.mubr.bf16.vlgmr.msra.gmra.mrb[12].mxu1 %v9515_v46 }
 0x89c   : > { %v11780_v29 = vpop.f32.mrb[32].mxu0 }
 0x89d   : > { %v11781_v48 = vpop.f32.mrb[33].mxu0 }
 0x89e   : > { %v11782_v49 = vadd.f32 %v11781_v48, %v11780_v29  ;;  %v11783_v52 = vpop.f32.mrb[34].mxu0 }
 0x89f   : > { %v11784_v53 = vpop.f32.mrb[35].mxu0 }
 0x8a0   : > { %v11905_v54 = vadd.f32 %v11904_v37, %v11782_v49 }
 0x8bc   : > { %v11802_v56 = vpop.f32.mrb[36].mxu0 }
 0x8bd   : > { %v11803_v57 = vpop.f32.mrb[37].mxu0 }
 0x8be   : > { %v11804_v58 = vadd.f32 %v11803_v57, %v11802_v56  ;;  %v11805_v59 = vpop.f32.mrb[38].mxu0 }
 0x8bf   : > { %v11806_v3 = vpop.f32.mrb[39].mxu0 }
 0x8c0   : > { %v11906_v51 = vadd.f32 %v11905_v54, %v11804_v58 }
 0x8dc   : > { %v11824_v17 = vpop.f32.mrb[40].mxu0 }
 0x8dd   : > { %v11825_v50 = vpop.f32.mrb[41].mxu0 }
 0x8de   : > { %v11826_v60 = vadd.f32 %v11825_v50, %v11824_v17  ;;  %v11827_v61 = vpop.f32.mrb[42].mxu0 }
 0x8df   : > { %v11828_v5 = vpop.f32.mrb[43].mxu0 }
 0x8e0   : > { %v11907_v9 = vadd.f32 %v11906_v51, %v11826_v60 }
 0x8fc   : > { %v11846_v31 = vpop.f32.mrb[44].mxu0 }
 0x8fd   : > { %v11847_v55 = vpop.f32.mrb[45].mxu0 }
 0x8fe   : > { %v11848_v62 = vadd.f32 %v11847_v55, %v11846_v31  ;;  %v11849_v42 = vpop.f32.mrb[46].mxu0 }
 0x8ff   : > { %v11850_v7 = vpop.f32.mrb[47].mxu0 }
 0x900   : > { %v11908_v12 = vadd.f32 %v11907_v9, %v11848_v62 }
 0x91c   : > { %v11868_v15 = vpop.f32.mrb[48].mxu0 }
 0x91d   : > { %v11869_v24 = vpop.f32.mrb[49].mxu0 }
 0x91e   : > { %v11870_v27 = vadd.f32 %v11869_v24, %v11868_v15  ;;  %v11871_v16 = vpop.f32.mrb[50].mxu0 }
 0x91f   : > { %v11872_v30 = vpop.f32.mrb[51].mxu0 }
 0x920   : > { %v11909_v32 = vadd.f32 %v11908_v12, %v11870_v27 }
 0x93c   : > { %v11890_v34 = vpop.f32.mrb[52].mxu0 }
 0x93d   : > { %v11891_v35 = vpop.f32.mrb[53].mxu0 }
 0x93e   : > { %v11892_v8 = vadd.f32 %v11891_v35, %v11890_v34  ;;  %v11893_v11 = vpop.f32.mrb[54].mxu0 }
 0x93f   : > { %v11894_v36 = vpop.f32.mrb[55].mxu0 }
 0x940   : > { %v11910_v38 = vadd.f32 %v11909_v32, %v11892_v8 }
 0x96b   : > { %v9753_v40 = vpop.f32.mrb[12].mxu1 }
 0x96c   : > { %v11911_v41 = vadd.f32 %v11910_v38, %v9753_v40  ;;  %v9755_v6 = vpop.f32.mrb[13].mxu1 }
 0x96d   : > { %v9756_v25 = vpop.f32.mrb[14].mxu1 }
 0x96e   : > { %v9757_v10 = vpop.f32.mrb[15].mxu1  ;;  %9761 = vst.msk [vmem:[%s297_s23] sm:$0x1] %vm9760_vm0, %v11911_v41 }
 0x96f   : > { %13552 = shalt.err (!%p13549_p3)
}
 0x970   : > { %s13553_s20 = scalar_lea.hbm %s16972_s10, 16  ;;  %s13557_s22 = scalar_lea.hbm %s17022_s8, 32 }
 0x971   : > { %p13554_p4 = scmp.ne.s32.totalorder %s16972_s10, %s13553_s20  ;;  %p13558_p9 = scmp.lt.u32.totalorder %s16972_s10, %s17022_s8 }
 0x972   : > { %p13559_p10 = scmp.lt.u32.totalorder %s13557_s22, %s13553_s20  ;;  %p13561_p12 = scmp.lt.u32.totalorder %s13553_s20, %s16972_s10 }
 0x973   : > { %p13555_p7 = pnand %p13554_p4, %p13694_p5 }
 0x974   : > { %p13560_p11 = por %p13559_p10, %p13558_p9 }
 0x975   : > { %p13556_p8 = pneg %p13555_p7 }
 0x976   : > { %p13562_p13 = por %p13561_p12, %p13560_p11 }
 0x978   : > { %p13563_p0 = pnand %p13562_p13, %p13556_p8 }
 0x97a   : > { %13566 = shalt.err (!%p13563_p0)
}
 0x97b   : > { %12104 = dma.vmem_to_hbm [thread:$0]  (%p13694_p5), %s16974_s19, 16, %s16972_s10, %s9763_s9  }
 0x97c PF: > { %p12110_p1 = scmp.ge.s32.totalorder %s13601_s30, 2  ;;  %s9787_s26 = sand.u32 1, %s13589_s27  }
 0x97d   : > { %s9788_s12 = scalar_lea.sflag [#allocation5], %s9787_s26 }
 0x97e   : > { %p12107_p2 = pnand %p12110_p1, %p13698_p6 }
 0x980   : > { %13584 = dma.done.wait (!%p12107_p2), %s9788_s12, 16  }
 0x981   : > { %13586 = vsyncadd (!%p12107_p2), %s9788_s12, 4294967280  ;;  %p18_p3 = scmp.ge.s32.totalorder %s13681_s11, 4   ;;  %s17025_s27 = smov %s13593_s28 }
 0x982   : > { %s17026_s28 = smov %s13597_s29  ;;  %s17027_s29 = smov %s13692_s14 }
 0x983   : > { %s17028_s30 = smov %s13681_s11  ;;  %20 = sbr.rel (!%p18_p3) target bundleno = 3 (0x3), region = 101 }
 0x98a   :  { %9792 = vsyncpa [#allocation5], 1 }
 0x98b   :  { %9794 = vsyncpa [#allocation5 + $0x1], 1 }

</bundles_post_ra>
